<compile_context>
chip_gen: v7x
topology: tpu7x:2x2x1
jax: 0.10.0
libtpu: 0.0.40
codegen_flags: <defaults>
</compile_context>

<pallas_src>
import functools

import jax
import jax.numpy as jnp
import numpy as np
from jax.experimental import pallas as pl
from jax.experimental.pallas import tpu as pltpu

_COUTS = (32, 32, 32, 64)


def _fused_encoder_kernel(x_ref, w1_ref, w2_ref, w3_ref, w4_ref,
                          b1_ref, b2_ref, b3_ref, b4_ref, alpha_ref,
                          o_ref, pad_ref, *maybe_col,
                          H, W, c_in, c_pad, use_im2col):
    """Fused (conv3x3 + PReLU) x3 + conv3x3 for ONE batch element.

    x_ref    : (1, H, W, c_in)            f32  input image tile (NHWC)
    wN_ref   : use_im2col: (9*cin, cout)  bf16 im2col rows ordered (tap, cin)
               else      : (9, cin, cout) bf16 one (cin, cout) matrix per tap
    bN_ref   : (1, cout)                  f32
    alpha_ref: (1,)                       f32  shared PReLU alpha (SMEM)
    o_ref    : (1, H, W, 64)              f32
    pad_ref  : (H+2, W+2, c_pad)          f32  halo'd activation scratch (VMEM)
    maybe_col: ((H, W, 9*c_pad) bf16,)         im2col scratch, only if im2col
    """
    col_ref = maybe_col[0] if use_im2col else None
    HW = H * W
    alpha = alpha_ref[0]

    # Zero ONLY the 1-pixel halo strips (interior is fully overwritten for
    # every layer of every image; the halo is never written afterwards).
    zrow = jnp.zeros((1, W + 2, c_pad), jnp.float32)
    zcol = jnp.zeros((H + 2, 1, c_pad), jnp.float32)
    pad_ref[0:1, :, :] = zrow
    pad_ref[H + 1:H + 2, :, :] = zrow
    pad_ref[:, 0:1, :] = zcol
    pad_ref[:, W + 1:W + 2, :] = zcol

    # Layer-1 input.  Only channels [:c_in] are read by layer 1; layers 2-4
    # read [:32], which is overwritten by the layer writebacks below first,
    # so any channels in between may hold stale data harmlessly.
    pad_ref[1:H + 1, 1:W + 1, :c_in] = x_ref[0]

    def conv3x3(w_ref, b_ref, cin, cout, apply_prelu):
        if use_im2col:
            # Assemble the 9-tap patch matrix once (bf16, cast during the
            # copy), then a single MXU dot with K = 9*cin.
            for dy in range(3):
                for dx in range(3):
                    t = dy * 3 + dx
                    col_ref[:, :, t * cin:(t + 1) * cin] = (
                        pad_ref[dy:dy + H, dx:dx + W, :cin]
                        .astype(jnp.bfloat16))
            patch = col_ref[:, :, :9 * cin].reshape(HW, 9 * cin)
            acc = jnp.dot(patch, w_ref[...],
                          preferred_element_type=jnp.float32)
        else:
            # No-im2col variant: nine accumulating dots straight off the
            # padded activation (no VMEM<->VMEM patch assembly at all).
            acc = jnp.zeros((HW, cout), jnp.float32)
            for dy in range(3):
                for dx in range(3):
                    t = dy * 3 + dx
                    lhs = (pad_ref[dy:dy + H, dx:dx + W, :cin]
                           .reshape(HW, cin).astype(jnp.bfloat16))
                    acc = acc + jnp.dot(lhs, w_ref[t],
                                        preferred_element_type=jnp.float32)
        acc = acc + b_ref[...]
        if apply_prelu:
            acc = jnp.where(acc >= 0, acc, alpha * acc)
        return acc  # (HW, cout) f32

    out1 = conv3x3(w1_ref, b1_ref, c_in, 32, True)
    pad_ref[1:H + 1, 1:W + 1, :32] = out1.reshape(H, W, 32)
    out2 = conv3x3(w2_ref, b2_ref, 32, 32, True)
    pad_ref[1:H + 1, 1:W + 1, :32] = out2.reshape(H, W, 32)
    out3 = conv3x3(w3_ref, b3_ref, 32, 32, True)
    pad_ref[1:H + 1, 1:W + 1, :32] = out3.reshape(H, W, 32)
    f_e = conv3x3(w4_ref, b4_ref, 32, 64, False)
    o_ref[...] = f_e.reshape(1, H, W, 64).astype(o_ref.dtype)


def encoding_block_end(x_nchw, params, *, use_im2col=None):
    """Forward pass matching Encoding_Block_End.forward (NCHW in / NCHW out)."""
    N, C, H, W = x_nchw.shape
    if use_im2col is None:
        # The single big-K im2col dot only pays once the matmul is large
        # enough that MXU time exceeds the patch-assembly time.
        use_im2col = H * W >= 64 * 64
    c_pad = max(C, 32)
    cins = (C, 32, 32, 32)

    x = jnp.transpose(x_nchw, (0, 2, 3, 1)).astype(jnp.float32)  # NHWC

    ws, w_specs = [], []
    for i, (cin, cout) in enumerate(zip(cins, _COUTS)):
        w = params[f"w{i + 1}"].astype(jnp.bfloat16)       # (3,3,cin,cout)
        if use_im2col:
            ws.append(w.reshape(9 * cin, cout))
            w_specs.append(pl.BlockSpec((9 * cin, cout), lambda n: (0, 0)))
        else:
            ws.append(w.reshape(9, cin, cout))
            w_specs.append(pl.BlockSpec((9, cin, cout), lambda n: (0, 0, 0)))
    bs = [params[f"b{i + 1}"].reshape(1, -1).astype(jnp.float32)
          for i in range(4)]
    b_specs = [pl.BlockSpec((1, co), lambda n: (0, 0)) for co in _COUTS]
    alpha = jnp.asarray(params["alpha"], jnp.float32).reshape(1)

    kernel = functools.partial(
        _fused_encoder_kernel, H=H, W=W, c_in=C, c_pad=c_pad,
        use_im2col=use_im2col)

    scratch = [pltpu.VMEM((H + 2, W + 2, c_pad), jnp.float32)]
    if use_im2col:
        scratch.append(pltpu.VMEM((H, W, 9 * c_pad), jnp.bfloat16))

    flops = 2 * N * H * W * 9 * sum(ci * co for ci, co in zip(cins, _COUTS))
    bytes_accessed = (N * H * W * (C + 64) * 4
                      + sum(9 * ci * co for ci, co in zip(cins, _COUTS)) * 2
                      + sum(_COUTS) * 4)

    out = pl.pallas_call(
        kernel,
        out_shape=jax.ShapeDtypeStruct((N, H, W, 64), jnp.float32),
        grid_spec=pltpu.PrefetchScalarGridSpec(
            num_scalar_prefetch=0,
            grid=(N,),
            in_specs=[pl.BlockSpec((1, H, W, C), lambda n: (n, 0, 0, 0))]
                     + w_specs + b_specs
                     + [pl.BlockSpec(memory_space=pltpu.MemorySpace.SMEM)],
            out_specs=pl.BlockSpec((1, H, W, 64), lambda n: (n, 0, 0, 0)),
            scratch_shapes=scratch,
        ),
        compiler_params=pltpu.CompilerParams(
            dimension_semantics=("parallel",),
        ),
        cost_estimate=pl.CostEstimate(
            flops=flops, transcendentals=0, bytes_accessed=bytes_accessed),
    )(x, *ws, *bs, alpha)

    return jnp.transpose(out, (0, 3, 1, 2))  # NHWC -> NCHW


def _xavier_normal(key, cout, cin, k=3):
    fan_in = cin * k * k
    fan_out = cout * k * k
    std = np.sqrt(2.0 / (fan_in + fan_out))
    # stored directly in (kh, kw, Cin, Cout) layout
    return jax.random.normal(key, (k, k, cin, cout), jnp.float32) * std


def init_params(c_in=64, seed=0):
    keys = jax.random.split(jax.random.PRNGKey(seed), 8)
    channels = [(c_in, 32), (32, 32), (32, 32), (32, 64)]
    params = {}
    for i, (ci, co) in enumerate(channels):
        w = _xavier_normal(keys[2 * i], co, ci)
        # PyTorch default conv bias init: U(-1/sqrt(fan_in), 1/sqrt(fan_in))
        bound = 1.0 / np.sqrt(ci * 9)
        b = jax.random.uniform(
            keys[2 * i + 1], (co,), jnp.float32, -bound, bound)
        params[f"w{i + 1}"] = w
        params[f"b{i + 1}"] = b
    # nn.PReLU() default: one alpha=0.25 shared by the single self.act module.
    params["alpha"] = jnp.float32(0.25)
    return params


def _reference(x_nchw, params):
    """Pure-JAX f32 reference (lax conv) for correctness checking."""
    def conv(x, w, b):
        return jax.lax.conv_general_dilated(
            x, w, window_strides=(1, 1), padding="SAME",
            dimension_numbers=("NCHW", "HWIO", "NCHW"),
        ) + b[None, :, None, None]

    def prelu(x, a):
        return jnp.where(x >= 0, x, a * x)

    a = params["alpha"]
    o1 = prelu(conv(x_nchw, params["w1"], params["b1"]), a)
    o2 = prelu(conv(o1, params["w2"], params["b2"]), a)
    o3 = prelu(conv(o2, params["w3"], params["b3"]), a)
    return conv(o3, params["w4"], params["b4"])


if __name__ == "__main__":
    # Primary config: module default c_in=64, small spatial demo.
    N, C, H, W = 2, 64, 16, 16
    params = init_params(c_in=C, seed=0)
    x = jax.random.normal(jax.random.PRNGKey(0), (N, C, H, W), jnp.float32)
    ref = jax.block_until_ready(_reference(x, params))

    # bf16 MXU operands (f32 accumulation) vs f32 reference -> relaxed tol.
    TOL = dict(rtol=5e-2, atol=5e-2)

    # (a) default path at this size: no-im2col, nine accumulating dots.
    fwd = jax.jit(functools.partial(encoding_block_end, use_im2col=False))
    out = jax.block_until_ready(fwd(x, params))
    assert out.shape == (N, 64, H, W), out.shape
    np.testing.assert_allclose(np.asarray(out), np.asarray(ref), **TOL)

    # (b) also exercise the large-tile im2col path at the same small size.
    fwd_col = jax.jit(functools.partial(encoding_block_end, use_im2col=True))
    out_col = jax.block_until_ready(fwd_col(x, params))
    np.testing.assert_allclose(np.asarray(out_col), np.asarray(ref), **TOL)

    # (c) c_in < 32 case (lane-masked layer-1 channel slice).
    params8 = init_params(c_in=8, seed=1)
    x8 = jax.random.normal(jax.random.PRNGKey(2), (2, 8, H, W), jnp.float32)
    out8 = jax.block_until_ready(jax.jit(encoding_block_end)(x8, params8))
    ref8 = jax.block_until_ready(_reference(x8, params8))
    np.testing.assert_allclose(np.asarray(out8), np.asarray(ref8), **TOL)

    print("KERNEL_OK")
</pallas_src>

<mosaic_0001>
module attributes {stable_mosaic.version = 11 : i64} {
  func.func @_fused_encoder_kernel(%arg0: i32, %arg1: memref<1x16x16x64xf32, #tpu.memory_space<vmem>>, %arg2: memref<9x64x32xbf16, #tpu.memory_space<vmem>>, %arg3: memref<9x32x32xbf16, #tpu.memory_space<vmem>>, %arg4: memref<9x32x32xbf16, #tpu.memory_space<vmem>>, %arg5: memref<9x32x64xbf16, #tpu.memory_space<vmem>>, %arg6: memref<1x32xf32, #tpu.memory_space<vmem>>, %arg7: memref<1x32xf32, #tpu.memory_space<vmem>>, %arg8: memref<1x32xf32, #tpu.memory_space<vmem>>, %arg9: memref<1x64xf32, #tpu.memory_space<vmem>>, %arg10: memref<1xf32, #tpu.memory_space<smem>>, %arg11: memref<1x16x16x64xf32, #tpu.memory_space<vmem>>, %arg12: memref<18x18x64xf32, #tpu.memory_space<vmem>>) attributes {dimension_semantics = [#tpu.dimension_semantics<parallel>], iteration_bounds = array<i64: 2>, scalar_prefetch = 0 : i64, scratch_operands = 1 : i64, tpu.core_type = #tpu.core_type<tc>, window_params = [{transform_indices = @transform_0, window_bounds = array<i64: 1, 16, 16, 64>}, {pipeline_mode = #tpu.pipeline_mode<synchronous>, transform_indices = @transform_1, window_bounds = array<i64: 9, 64, 32>}, {pipeline_mode = #tpu.pipeline_mode<synchronous>, transform_indices = @transform_2, window_bounds = array<i64: 9, 32, 32>}, {pipeline_mode = #tpu.pipeline_mode<synchronous>, transform_indices = @transform_3, window_bounds = array<i64: 9, 32, 32>}, {pipeline_mode = #tpu.pipeline_mode<synchronous>, transform_indices = @transform_4, window_bounds = array<i64: 9, 32, 64>}, {pipeline_mode = #tpu.pipeline_mode<synchronous>, transform_indices = @transform_5, window_bounds = array<i64: 1, 32>}, {pipeline_mode = #tpu.pipeline_mode<synchronous>, transform_indices = @transform_6, window_bounds = array<i64: 1, 32>}, {pipeline_mode = #tpu.pipeline_mode<synchronous>, transform_indices = @transform_7, window_bounds = array<i64: 1, 32>}, {pipeline_mode = #tpu.pipeline_mode<synchronous>, transform_indices = @transform_8, window_bounds = array<i64: 1, 64>}, {transform_indices = @transform_9, window_bounds = array<i64: 1>}, {transform_indices = @transform_10, window_bounds = array<i64: 1, 16, 16, 64>}]} {
    %c0 = arith.constant 0 : index
    %0 = memref.load %arg10[%c0] : memref<1xf32, #tpu.memory_space<smem>>
    %cst = arith.constant 0.000000e+00 : f32
    %1 = vector.broadcast %cst : f32 to vector<1x18x64xf32>
    %cst_0 = arith.constant 0.000000e+00 : f32
    %2 = vector.broadcast %cst_0 : f32 to vector<18x1x64xf32>
    %c0_1 = arith.constant 0 : index
    %c0_2 = arith.constant 0 : index
    %c0_3 = arith.constant 0 : index
    %3 = vector.load %arg12[%c0_1, %c0_2, %c0_3] : memref<18x18x64xf32, #tpu.memory_space<vmem>>, vector<1x18x64xf32>
    tpu.vector_store %arg12[%c0_1, %c0_2, %c0_3], %1 {strides = array<i32>} : memref<18x18x64xf32, #tpu.memory_space<vmem>>, vector<1x18x64xf32>,
    %c17 = arith.constant 17 : index
    %c0_4 = arith.constant 0 : index
    %c0_5 = arith.constant 0 : index
    %4 = vector.load %arg12[%c17, %c0_4, %c0_5] : memref<18x18x64xf32, #tpu.memory_space<vmem>>, vector<1x18x64xf32>
    tpu.vector_store %arg12[%c17, %c0_4, %c0_5], %1 {strides = array<i32>} : memref<18x18x64xf32, #tpu.memory_space<vmem>>, vector<1x18x64xf32>,
    %c0_6 = arith.constant 0 : index
    %c0_7 = arith.constant 0 : index
    %c0_8 = arith.constant 0 : index
    %5 = vector.load %arg12[%c0_6, %c0_7, %c0_8] : memref<18x18x64xf32, #tpu.memory_space<vmem>>, vector<18x1x64xf32>
    tpu.vector_store %arg12[%c0_6, %c0_7, %c0_8], %2 {strides = array<i32>} : memref<18x18x64xf32, #tpu.memory_space<vmem>>, vector<18x1x64xf32>,
    %c0_9 = arith.constant 0 : index
    %c17_10 = arith.constant 17 : index
    %c0_11 = arith.constant 0 : index
    %6 = vector.load %arg12[%c0_9, %c17_10, %c0_11] : memref<18x18x64xf32, #tpu.memory_space<vmem>>, vector<18x1x64xf32>
    tpu.vector_store %arg12[%c0_9, %c17_10, %c0_11], %2 {strides = array<i32>} : memref<18x18x64xf32, #tpu.memory_space<vmem>>, vector<18x1x64xf32>,
    %c0_12 = arith.constant 0 : index
    %c0_13 = arith.constant 0 : index
    %c0_14 = arith.constant 0 : index
    %c0_15 = arith.constant 0 : index
    %7 = vector.load %arg1[%c0_12, %c0_13, %c0_14, %c0_15] : memref<1x16x16x64xf32, #tpu.memory_space<vmem>>, vector<1x16x16x64xf32>
    %8 = vector.shape_cast %7 : vector<1x16x16x64xf32> to vector<16x16x64xf32>
    %c1 = arith.constant 1 : index
    %c1_16 = arith.constant 1 : index
    %c0_17 = arith.constant 0 : index
    %9 = vector.load %arg12[%c1, %c1_16, %c0_17] : memref<18x18x64xf32, #tpu.memory_space<vmem>>, vector<16x16x64xf32>
    tpu.vector_store %arg12[%c1, %c1_16, %c0_17], %8 {strides = array<i32>} : memref<18x18x64xf32, #tpu.memory_space<vmem>>, vector<16x16x64xf32>,
    %cst_18 = arith.constant 0.000000e+00 : f32
    %10 = vector.broadcast %cst_18 : f32 to vector<256x32xf32>
    %c0_19 = arith.constant 0 : index
    %c0_20 = arith.constant 0 : index
    %c0_21 = arith.constant 0 : index
    %11 = vector.load %arg12[%c0_19, %c0_20, %c0_21] : memref<18x18x64xf32, #tpu.memory_space<vmem>>, vector<16x16x64xf32>
    %12 = vector.shape_cast %11 : vector<16x16x64xf32> to vector<256x64xf32>
    %13 = arith.truncf %12 : vector<256x64xf32> to vector<256x64xbf16>
    %c0_22 = arith.constant 0 : index
    %c0_23 = arith.constant 0 : index
    %c0_24 = arith.constant 0 : index
    %14 = vector.load %arg2[%c0_22, %c0_23, %c0_24] : memref<9x64x32xbf16, #tpu.memory_space<vmem>>, vector<1x64x32xbf16>
    %15 = vector.shape_cast %14 : vector<1x64x32xbf16> to vector<64x32xbf16>
    %cst_25 = arith.constant dense<0.000000e+00> : vector<256x32xf32>
    %16 = tpu.matmul %13, %15, %cst_25 {dimension_numbers = #tpu.dot_dimension_numbers<[1], [0], [0], [1], [0, 0, 1, 1], [], []>} : vector<256x64xbf16>, vector<64x32xbf16>, vector<256x32xf32> -> vector<256x32xf32>
    %17 = arith.addf %10, %16 : vector<256x32xf32>
    %c0_26 = arith.constant 0 : index
    %c1_27 = arith.constant 1 : index
    %c0_28 = arith.constant 0 : index
    %18 = vector.load %arg12[%c0_26, %c1_27, %c0_28] : memref<18x18x64xf32, #tpu.memory_space<vmem>>, vector<16x16x64xf32>
    %19 = vector.shape_cast %18 : vector<16x16x64xf32> to vector<256x64xf32>
    %20 = arith.truncf %19 : vector<256x64xf32> to vector<256x64xbf16>
    %c1_29 = arith.constant 1 : index
    %c0_30 = arith.constant 0 : index
    %c0_31 = arith.constant 0 : index
    %21 = vector.load %arg2[%c1_29, %c0_30, %c0_31] : memref<9x64x32xbf16, #tpu.memory_space<vmem>>, vector<1x64x32xbf16>
    %22 = vector.shape_cast %21 : vector<1x64x32xbf16> to vector<64x32xbf16>
    %cst_32 = arith.constant dense<0.000000e+00> : vector<256x32xf32>
    %23 = tpu.matmul %20, %22, %cst_32 {dimension_numbers = #tpu.dot_dimension_numbers<[1], [0], [0], [1], [0, 0, 1, 1], [], []>} : vector<256x64xbf16>, vector<64x32xbf16>, vector<256x32xf32> -> vector<256x32xf32>
    %24 = arith.addf %17, %23 : vector<256x32xf32>
    %c0_33 = arith.constant 0 : index
    %c2 = arith.constant 2 : index
    %c0_34 = arith.constant 0 : index
    %25 = vector.load %arg12[%c0_33, %c2, %c0_34] : memref<18x18x64xf32, #tpu.memory_space<vmem>>, vector<16x16x64xf32>
    %26 = vector.shape_cast %25 : vector<16x16x64xf32> to vector<256x64xf32>
    %27 = arith.truncf %26 : vector<256x64xf32> to vector<256x64xbf16>
    %c2_35 = arith.constant 2 : index
    %c0_36 = arith.constant 0 : index
    %c0_37 = arith.constant 0 : index
    %28 = vector.load %arg2[%c2_35, %c0_36, %c0_37] : memref<9x64x32xbf16, #tpu.memory_space<vmem>>, vector<1x64x32xbf16>
    %29 = vector.shape_cast %28 : vector<1x64x32xbf16> to vector<64x32xbf16>
    %cst_38 = arith.constant dense<0.000000e+00> : vector<256x32xf32>
    %30 = tpu.matmul %27, %29, %cst_38 {dimension_numbers = #tpu.dot_dimension_numbers<[1], [0], [0], [1], [0, 0, 1, 1], [], []>} : vector<256x64xbf16>, vector<64x32xbf16>, vector<256x32xf32> -> vector<256x32xf32>
    %31 = arith.addf %24, %30 : vector<256x32xf32>
    %c1_39 = arith.constant 1 : index
    %c0_40 = arith.constant 0 : index
    %c0_41 = arith.constant 0 : index
    %32 = vector.load %arg12[%c1_39, %c0_40, %c0_41] : memref<18x18x64xf32, #tpu.memory_space<vmem>>, vector<16x16x64xf32>
    %33 = vector.shape_cast %32 : vector<16x16x64xf32> to vector<256x64xf32>
    %34 = arith.truncf %33 : vector<256x64xf32> to vector<256x64xbf16>
    %c3 = arith.constant 3 : index
    %c0_42 = arith.constant 0 : index
    %c0_43 = arith.constant 0 : index
    %35 = vector.load %arg2[%c3, %c0_42, %c0_43] : memref<9x64x32xbf16, #tpu.memory_space<vmem>>, vector<1x64x32xbf16>
    %36 = vector.shape_cast %35 : vector<1x64x32xbf16> to vector<64x32xbf16>
    %cst_44 = arith.constant dense<0.000000e+00> : vector<256x32xf32>
    %37 = tpu.matmul %34, %36, %cst_44 {dimension_numbers = #tpu.dot_dimension_numbers<[1], [0], [0], [1], [0, 0, 1, 1], [], []>} : vector<256x64xbf16>, vector<64x32xbf16>, vector<256x32xf32> -> vector<256x32xf32>
    %38 = arith.addf %31, %37 : vector<256x32xf32>
    %c1_45 = arith.constant 1 : index
    %c1_46 = arith.constant 1 : index
    %c0_47 = arith.constant 0 : index
    %39 = vector.load %arg12[%c1_45, %c1_46, %c0_47] : memref<18x18x64xf32, #tpu.memory_space<vmem>>, vector<16x16x64xf32>
    %40 = vector.shape_cast %39 : vector<16x16x64xf32> to vector<256x64xf32>
    %41 = arith.truncf %40 : vector<256x64xf32> to vector<256x64xbf16>
    %c4 = arith.constant 4 : index
    %c0_48 = arith.constant 0 : index
    %c0_49 = arith.constant 0 : index
    %42 = vector.load %arg2[%c4, %c0_48, %c0_49] : memref<9x64x32xbf16, #tpu.memory_space<vmem>>, vector<1x64x32xbf16>
    %43 = vector.shape_cast %42 : vector<1x64x32xbf16> to vector<64x32xbf16>
    %cst_50 = arith.constant dense<0.000000e+00> : vector<256x32xf32>
    %44 = tpu.matmul %41, %43, %cst_50 {dimension_numbers = #tpu.dot_dimension_numbers<[1], [0], [0], [1], [0, 0, 1, 1], [], []>} : vector<256x64xbf16>, vector<64x32xbf16>, vector<256x32xf32> -> vector<256x32xf32>
    %45 = arith.addf %38, %44 : vector<256x32xf32>
    %c1_51 = arith.constant 1 : index
    %c2_52 = arith.constant 2 : index
    %c0_53 = arith.constant 0 : index
    %46 = vector.load %arg12[%c1_51, %c2_52, %c0_53] : memref<18x18x64xf32, #tpu.memory_space<vmem>>, vector<16x16x64xf32>
    %47 = vector.shape_cast %46 : vector<16x16x64xf32> to vector<256x64xf32>
    %48 = arith.truncf %47 : vector<256x64xf32> to vector<256x64xbf16>
    %c5 = arith.constant 5 : index
    %c0_54 = arith.constant 0 : index
    %c0_55 = arith.constant 0 : index
    %49 = vector.load %arg2[%c5, %c0_54, %c0_55] : memref<9x64x32xbf16, #tpu.memory_space<vmem>>, vector<1x64x32xbf16>
    %50 = vector.shape_cast %49 : vector<1x64x32xbf16> to vector<64x32xbf16>
    %cst_56 = arith.constant dense<0.000000e+00> : vector<256x32xf32>
    %51 = tpu.matmul %48, %50, %cst_56 {dimension_numbers = #tpu.dot_dimension_numbers<[1], [0], [0], [1], [0, 0, 1, 1], [], []>} : vector<256x64xbf16>, vector<64x32xbf16>, vector<256x32xf32> -> vector<256x32xf32>
    %52 = arith.addf %45, %51 : vector<256x32xf32>
    %c2_57 = arith.constant 2 : index
    %c0_58 = arith.constant 0 : index
    %c0_59 = arith.constant 0 : index
    %53 = vector.load %arg12[%c2_57, %c0_58, %c0_59] : memref<18x18x64xf32, #tpu.memory_space<vmem>>, vector<16x16x64xf32>
    %54 = vector.shape_cast %53 : vector<16x16x64xf32> to vector<256x64xf32>
    %55 = arith.truncf %54 : vector<256x64xf32> to vector<256x64xbf16>
    %c6 = arith.constant 6 : index
    %c0_60 = arith.constant 0 : index
    %c0_61 = arith.constant 0 : index
    %56 = vector.load %arg2[%c6, %c0_60, %c0_61] : memref<9x64x32xbf16, #tpu.memory_space<vmem>>, vector<1x64x32xbf16>
    %57 = vector.shape_cast %56 : vector<1x64x32xbf16> to vector<64x32xbf16>
    %cst_62 = arith.constant dense<0.000000e+00> : vector<256x32xf32>
    %58 = tpu.matmul %55, %57, %cst_62 {dimension_numbers = #tpu.dot_dimension_numbers<[1], [0], [0], [1], [0, 0, 1, 1], [], []>} : vector<256x64xbf16>, vector<64x32xbf16>, vector<256x32xf32> -> vector<256x32xf32>
    %59 = arith.addf %52, %58 : vector<256x32xf32>
    %c2_63 = arith.constant 2 : index
    %c1_64 = arith.constant 1 : index
    %c0_65 = arith.constant 0 : index
    %60 = vector.load %arg12[%c2_63, %c1_64, %c0_65] : memref<18x18x64xf32, #tpu.memory_space<vmem>>, vector<16x16x64xf32>
    %61 = vector.shape_cast %60 : vector<16x16x64xf32> to vector<256x64xf32>
    %62 = arith.truncf %61 : vector<256x64xf32> to vector<256x64xbf16>
    %c7 = arith.constant 7 : index
    %c0_66 = arith.constant 0 : index
    %c0_67 = arith.constant 0 : index
    %63 = vector.load %arg2[%c7, %c0_66, %c0_67] : memref<9x64x32xbf16, #tpu.memory_space<vmem>>, vector<1x64x32xbf16>
    %64 = vector.shape_cast %63 : vector<1x64x32xbf16> to vector<64x32xbf16>
    %cst_68 = arith.constant dense<0.000000e+00> : vector<256x32xf32>
    %65 = tpu.matmul %62, %64, %cst_68 {dimension_numbers = #tpu.dot_dimension_numbers<[1], [0], [0], [1], [0, 0, 1, 1], [], []>} : vector<256x64xbf16>, vector<64x32xbf16>, vector<256x32xf32> -> vector<256x32xf32>
    %66 = arith.addf %59, %65 : vector<256x32xf32>
    %c2_69 = arith.constant 2 : index
    %c2_70 = arith.constant 2 : index
    %c0_71 = arith.constant 0 : index
    %67 = vector.load %arg12[%c2_69, %c2_70, %c0_71] : memref<18x18x64xf32, #tpu.memory_space<vmem>>, vector<16x16x64xf32>
    %68 = vector.shape_cast %67 : vector<16x16x64xf32> to vector<256x64xf32>
    %69 = arith.truncf %68 : vector<256x64xf32> to vector<256x64xbf16>
    %c8 = arith.constant 8 : index
    %c0_72 = arith.constant 0 : index
    %c0_73 = arith.constant 0 : index
    %70 = vector.load %arg2[%c8, %c0_72, %c0_73] : memref<9x64x32xbf16, #tpu.memory_space<vmem>>, vector<1x64x32xbf16>
    %71 = vector.shape_cast %70 : vector<1x64x32xbf16> to vector<64x32xbf16>
    %cst_74 = arith.constant dense<0.000000e+00> : vector<256x32xf32>
    %72 = tpu.matmul %69, %71, %cst_74 {dimension_numbers = #tpu.dot_dimension_numbers<[1], [0], [0], [1], [0, 0, 1, 1], [], []>} : vector<256x64xbf16>, vector<64x32xbf16>, vector<256x32xf32> -> vector<256x32xf32>
    %73 = arith.addf %66, %72 : vector<256x32xf32>
    %c0_75 = arith.constant 0 : index
    %c0_76 = arith.constant 0 : index
    %74 = vector.load %arg6[%c0_75, %c0_76] : memref<1x32xf32, #tpu.memory_space<vmem>>, vector<1x32xf32>
    %75 = vector.broadcast %74 : vector<1x32xf32> to vector<256x32xf32>
    %76 = arith.addf %73, %75 : vector<256x32xf32>
    %cst_77 = arith.constant 0.000000e+00 : f32
    %77 = vector.broadcast %cst_77 : f32 to vector<256x32xf32>
    %78 = arith.cmpf oge, %76, %77 : vector<256x32xf32>
    %79 = vector.broadcast %0 : f32 to vector<256x32xf32>
    %80 = arith.mulf %79, %76 : vector<256x32xf32>
    %81 = arith.select %78, %76, %80 : vector<256x32xi1>, vector<256x32xf32>
    %82 = vector.shape_cast %81 : vector<256x32xf32> to vector<16x16x32xf32>
    %c1_78 = arith.constant 1 : index
    %c1_79 = arith.constant 1 : index
    %c0_80 = arith.constant 0 : index
    %83 = vector.load %arg12[%c1_78, %c1_79, %c0_80] : memref<18x18x64xf32, #tpu.memory_space<vmem>>, vector<16x16x32xf32>
    tpu.vector_store %arg12[%c1_78, %c1_79, %c0_80], %82 {strides = array<i32>} : memref<18x18x64xf32, #tpu.memory_space<vmem>>, vector<16x16x32xf32>,
    %cst_81 = arith.constant 0.000000e+00 : f32
    %84 = vector.broadcast %cst_81 : f32 to vector<256x32xf32>
    %c0_82 = arith.constant 0 : index
    %c0_83 = arith.constant 0 : index
    %c0_84 = arith.constant 0 : index
    %85 = vector.load %arg12[%c0_82, %c0_83, %c0_84] : memref<18x18x64xf32, #tpu.memory_space<vmem>>, vector<16x16x32xf32>
    %86 = vector.shape_cast %85 : vector<16x16x32xf32> to vector<256x32xf32>
    %87 = arith.truncf %86 : vector<256x32xf32> to vector<256x32xbf16>
    %c0_85 = arith.constant 0 : index
    %c0_86 = arith.constant 0 : index
    %c0_87 = arith.constant 0 : index
    %88 = vector.load %arg3[%c0_85, %c0_86, %c0_87] : memref<9x32x32xbf16, #tpu.memory_space<vmem>>, vector<1x32x32xbf16>
    %89 = vector.shape_cast %88 : vector<1x32x32xbf16> to vector<32x32xbf16>
    %cst_88 = arith.constant dense<0.000000e+00> : vector<256x32xf32>
    %90 = tpu.matmul %87, %89, %cst_88 {dimension_numbers = #tpu.dot_dimension_numbers<[1], [0], [0], [1], [0, 0, 1, 1], [], []>} : vector<256x32xbf16>, vector<32x32xbf16>, vector<256x32xf32> -> vector<256x32xf32>
    %91 = arith.addf %84, %90 : vector<256x32xf32>
    %c0_89 = arith.constant 0 : index
    %c1_90 = arith.constant 1 : index
    %c0_91 = arith.constant 0 : index
    %92 = vector.load %arg12[%c0_89, %c1_90, %c0_91] : memref<18x18x64xf32, #tpu.memory_space<vmem>>, vector<16x16x32xf32>
    %93 = vector.shape_cast %92 : vector<16x16x32xf32> to vector<256x32xf32>
    %94 = arith.truncf %93 : vector<256x32xf32> to vector<256x32xbf16>
    %c1_92 = arith.constant 1 : index
    %c0_93 = arith.constant 0 : index
    %c0_94 = arith.constant 0 : index
    %95 = vector.load %arg3[%c1_92, %c0_93, %c0_94] : memref<9x32x32xbf16, #tpu.memory_space<vmem>>, vector<1x32x32xbf16>
    %96 = vector.shape_cast %95 : vector<1x32x32xbf16> to vector<32x32xbf16>
    %cst_95 = arith.constant dense<0.000000e+00> : vector<256x32xf32>
    %97 = tpu.matmul %94, %96, %cst_95 {dimension_numbers = #tpu.dot_dimension_numbers<[1], [0], [0], [1], [0, 0, 1, 1], [], []>} : vector<256x32xbf16>, vector<32x32xbf16>, vector<256x32xf32> -> vector<256x32xf32>
    %98 = arith.addf %91, %97 : vector<256x32xf32>
    %c0_96 = arith.constant 0 : index
    %c2_97 = arith.constant 2 : index
    %c0_98 = arith.constant 0 : index
    %99 = vector.load %arg12[%c0_96, %c2_97, %c0_98] : memref<18x18x64xf32, #tpu.memory_space<vmem>>, vector<16x16x32xf32>
    %100 = vector.shape_cast %99 : vector<16x16x32xf32> to vector<256x32xf32>
    %101 = arith.truncf %100 : vector<256x32xf32> to vector<256x32xbf16>
    %c2_99 = arith.constant 2 : index
    %c0_100 = arith.constant 0 : index
    %c0_101 = arith.constant 0 : index
    %102 = vector.load %arg3[%c2_99, %c0_100, %c0_101] : memref<9x32x32xbf16, #tpu.memory_space<vmem>>, vector<1x32x32xbf16>
    %103 = vector.shape_cast %102 : vector<1x32x32xbf16> to vector<32x32xbf16>
    %cst_102 = arith.constant dense<0.000000e+00> : vector<256x32xf32>
    %104 = tpu.matmul %101, %103, %cst_102 {dimension_numbers = #tpu.dot_dimension_numbers<[1], [0], [0], [1], [0, 0, 1, 1], [], []>} : vector<256x32xbf16>, vector<32x32xbf16>, vector<256x32xf32> -> vector<256x32xf32>
    %105 = arith.addf %98, %104 : vector<256x32xf32>
    %c1_103 = arith.constant 1 : index
    %c0_104 = arith.constant 0 : index
    %c0_105 = arith.constant 0 : index
    %106 = vector.load %arg12[%c1_103, %c0_104, %c0_105] : memref<18x18x64xf32, #tpu.memory_space<vmem>>, vector<16x16x32xf32>
    %107 = vector.shape_cast %106 : vector<16x16x32xf32> to vector<256x32xf32>
    %108 = arith.truncf %107 : vector<256x32xf32> to vector<256x32xbf16>
    %c3_106 = arith.constant 3 : index
    %c0_107 = arith.constant 0 : index
    %c0_108 = arith.constant 0 : index
    %109 = vector.load %arg3[%c3_106, %c0_107, %c0_108] : memref<9x32x32xbf16, #tpu.memory_space<vmem>>, vector<1x32x32xbf16>
    %110 = vector.shape_cast %109 : vector<1x32x32xbf16> to vector<32x32xbf16>
    %cst_109 = arith.constant dense<0.000000e+00> : vector<256x32xf32>
    %111 = tpu.matmul %108, %110, %cst_109 {dimension_numbers = #tpu.dot_dimension_numbers<[1], [0], [0], [1], [0, 0, 1, 1], [], []>} : vector<256x32xbf16>, vector<32x32xbf16>, vector<256x32xf32> -> vector<256x32xf32>
    %112 = arith.addf %105, %111 : vector<256x32xf32>
    %c1_110 = arith.constant 1 : index
    %c1_111 = arith.constant 1 : index
    %c0_112 = arith.constant 0 : index
    %113 = vector.load %arg12[%c1_110, %c1_111, %c0_112] : memref<18x18x64xf32, #tpu.memory_space<vmem>>, vector<16x16x32xf32>
    %114 = vector.shape_cast %113 : vector<16x16x32xf32> to vector<256x32xf32>
    %115 = arith.truncf %114 : vector<256x32xf32> to vector<256x32xbf16>
    %c4_113 = arith.constant 4 : index
    %c0_114 = arith.constant 0 : index
    %c0_115 = arith.constant 0 : index
    %116 = vector.load %arg3[%c4_113, %c0_114, %c0_115] : memref<9x32x32xbf16, #tpu.memory_space<vmem>>, vector<1x32x32xbf16>
    %117 = vector.shape_cast %116 : vector<1x32x32xbf16> to vector<32x32xbf16>
    %cst_116 = arith.constant dense<0.000000e+00> : vector<256x32xf32>
    %118 = tpu.matmul %115, %117, %cst_116 {dimension_numbers = #tpu.dot_dimension_numbers<[1], [0], [0], [1], [0, 0, 1, 1], [], []>} : vector<256x32xbf16>, vector<32x32xbf16>, vector<256x32xf32> -> vector<256x32xf32>
    %119 = arith.addf %112, %118 : vector<256x32xf32>
    %c1_117 = arith.constant 1 : index
    %c2_118 = arith.constant 2 : index
    %c0_119 = arith.constant 0 : index
    %120 = vector.load %arg12[%c1_117, %c2_118, %c0_119] : memref<18x18x64xf32, #tpu.memory_space<vmem>>, vector<16x16x32xf32>
    %121 = vector.shape_cast %120 : vector<16x16x32xf32> to vector<256x32xf32>
    %122 = arith.truncf %121 : vector<256x32xf32> to vector<256x32xbf16>
    %c5_120 = arith.constant 5 : index
    %c0_121 = arith.constant 0 : index
    %c0_122 = arith.constant 0 : index
    %123 = vector.load %arg3[%c5_120, %c0_121, %c0_122] : memref<9x32x32xbf16, #tpu.memory_space<vmem>>, vector<1x32x32xbf16>
    %124 = vector.shape_cast %123 : vector<1x32x32xbf16> to vector<32x32xbf16>
    %cst_123 = arith.constant dense<0.000000e+00> : vector<256x32xf32>
    %125 = tpu.matmul %122, %124, %cst_123 {dimension_numbers = #tpu.dot_dimension_numbers<[1], [0], [0], [1], [0, 0, 1, 1], [], []>} : vector<256x32xbf16>, vector<32x32xbf16>, vector<256x32xf32> -> vector<256x32xf32>
    %126 = arith.addf %119, %125 : vector<256x32xf32>
    %c2_124 = arith.constant 2 : index
    %c0_125 = arith.constant 0 : index
    %c0_126 = arith.constant 0 : index
    %127 = vector.load %arg12[%c2_124, %c0_125, %c0_126] : memref<18x18x64xf32, #tpu.memory_space<vmem>>, vector<16x16x32xf32>
    %128 = vector.shape_cast %127 : vector<16x16x32xf32> to vector<256x32xf32>
    %129 = arith.truncf %128 : vector<256x32xf32> to vector<256x32xbf16>
    %c6_127 = arith.constant 6 : index
    %c0_128 = arith.constant 0 : index
    %c0_129 = arith.constant 0 : index
    %130 = vector.load %arg3[%c6_127, %c0_128, %c0_129] : memref<9x32x32xbf16, #tpu.memory_space<vmem>>, vector<1x32x32xbf16>
    %131 = vector.shape_cast %130 : vector<1x32x32xbf16> to vector<32x32xbf16>
    %cst_130 = arith.constant dense<0.000000e+00> : vector<256x32xf32>
    %132 = tpu.matmul %129, %131, %cst_130 {dimension_numbers = #tpu.dot_dimension_numbers<[1], [0], [0], [1], [0, 0, 1, 1], [], []>} : vector<256x32xbf16>, vector<32x32xbf16>, vector<256x32xf32> -> vector<256x32xf32>
    %133 = arith.addf %126, %132 : vector<256x32xf32>
    %c2_131 = arith.constant 2 : index
    %c1_132 = arith.constant 1 : index
    %c0_133 = arith.constant 0 : index
    %134 = vector.load %arg12[%c2_131, %c1_132, %c0_133] : memref<18x18x64xf32, #tpu.memory_space<vmem>>, vector<16x16x32xf32>
    %135 = vector.shape_cast %134 : vector<16x16x32xf32> to vector<256x32xf32>
    %136 = arith.truncf %135 : vector<256x32xf32> to vector<256x32xbf16>
    %c7_134 = arith.constant 7 : index
    %c0_135 = arith.constant 0 : index
    %c0_136 = arith.constant 0 : index
    %137 = vector.load %arg3[%c7_134, %c0_135, %c0_136] : memref<9x32x32xbf16, #tpu.memory_space<vmem>>, vector<1x32x32xbf16>
    %138 = vector.shape_cast %137 : vector<1x32x32xbf16> to vector<32x32xbf16>
    %cst_137 = arith.constant dense<0.000000e+00> : vector<256x32xf32>
    %139 = tpu.matmul %136, %138, %cst_137 {dimension_numbers = #tpu.dot_dimension_numbers<[1], [0], [0], [1], [0, 0, 1, 1], [], []>} : vector<256x32xbf16>, vector<32x32xbf16>, vector<256x32xf32> -> vector<256x32xf32>
    %140 = arith.addf %133, %139 : vector<256x32xf32>
    %c2_138 = arith.constant 2 : index
    %c2_139 = arith.constant 2 : index
    %c0_140 = arith.constant 0 : index
    %141 = vector.load %arg12[%c2_138, %c2_139, %c0_140] : memref<18x18x64xf32, #tpu.memory_space<vmem>>, vector<16x16x32xf32>
    %142 = vector.shape_cast %141 : vector<16x16x32xf32> to vector<256x32xf32>
    %143 = arith.truncf %142 : vector<256x32xf32> to vector<256x32xbf16>
    %c8_141 = arith.constant 8 : index
    %c0_142 = arith.constant 0 : index
    %c0_143 = arith.constant 0 : index
    %144 = vector.load %arg3[%c8_141, %c0_142, %c0_143] : memref<9x32x32xbf16, #tpu.memory_space<vmem>>, vector<1x32x32xbf16>
    %145 = vector.shape_cast %144 : vector<1x32x32xbf16> to vector<32x32xbf16>
    %cst_144 = arith.constant dense<0.000000e+00> : vector<256x32xf32>
    %146 = tpu.matmul %143, %145, %cst_144 {dimension_numbers = #tpu.dot_dimension_numbers<[1], [0], [0], [1], [0, 0, 1, 1], [], []>} : vector<256x32xbf16>, vector<32x32xbf16>, vector<256x32xf32> -> vector<256x32xf32>
    %147 = arith.addf %140, %146 : vector<256x32xf32>
    %c0_145 = arith.constant 0 : index
    %c0_146 = arith.constant 0 : index
    %148 = vector.load %arg7[%c0_145, %c0_146] : memref<1x32xf32, #tpu.memory_space<vmem>>, vector<1x32xf32>
    %149 = vector.broadcast %148 : vector<1x32xf32> to vector<256x32xf32>
    %150 = arith.addf %147, %149 : vector<256x32xf32>
    %cst_147 = arith.constant 0.000000e+00 : f32
    %151 = vector.broadcast %cst_147 : f32 to vector<256x32xf32>
    %152 = arith.cmpf oge, %150, %151 : vector<256x32xf32>
    %153 = vector.broadcast %0 : f32 to vector<256x32xf32>
    %154 = arith.mulf %153, %150 : vector<256x32xf32>
    %155 = arith.select %152, %150, %154 : vector<256x32xi1>, vector<256x32xf32>
    %156 = vector.shape_cast %155 : vector<256x32xf32> to vector<16x16x32xf32>
    %c1_148 = arith.constant 1 : index
    %c1_149 = arith.constant 1 : index
    %c0_150 = arith.constant 0 : index
    %157 = vector.load %arg12[%c1_148, %c1_149, %c0_150] : memref<18x18x64xf32, #tpu.memory_space<vmem>>, vector<16x16x32xf32>
    tpu.vector_store %arg12[%c1_148, %c1_149, %c0_150], %156 {strides = array<i32>} : memref<18x18x64xf32, #tpu.memory_space<vmem>>, vector<16x16x32xf32>,
    %cst_151 = arith.constant 0.000000e+00 : f32
    %158 = vector.broadcast %cst_151 : f32 to vector<256x32xf32>
    %c0_152 = arith.constant 0 : index
    %c0_153 = arith.constant 0 : index
    %c0_154 = arith.constant 0 : index
    %159 = vector.load %arg12[%c0_152, %c0_153, %c0_154] : memref<18x18x64xf32, #tpu.memory_space<vmem>>, vector<16x16x32xf32>
    %160 = vector.shape_cast %159 : vector<16x16x32xf32> to vector<256x32xf32>
    %161 = arith.truncf %160 : vector<256x32xf32> to vector<256x32xbf16>
    %c0_155 = arith.constant 0 : index
    %c0_156 = arith.constant 0 : index
    %c0_157 = arith.constant 0 : index
    %162 = vector.load %arg4[%c0_155, %c0_156, %c0_157] : memref<9x32x32xbf16, #tpu.memory_space<vmem>>, vector<1x32x32xbf16>
    %163 = vector.shape_cast %162 : vector<1x32x32xbf16> to vector<32x32xbf16>
    %cst_158 = arith.constant dense<0.000000e+00> : vector<256x32xf32>
    %164 = tpu.matmul %161, %163, %cst_158 {dimension_numbers = #tpu.dot_dimension_numbers<[1], [0], [0], [1], [0, 0, 1, 1], [], []>} : vector<256x32xbf16>, vector<32x32xbf16>, vector<256x32xf32> -> vector<256x32xf32>
    %165 = arith.addf %158, %164 : vector<256x32xf32>
    %c0_159 = arith.constant 0 : index
    %c1_160 = arith.constant 1 : index
    %c0_161 = arith.constant 0 : index
    %166 = vector.load %arg12[%c0_159, %c1_160, %c0_161] : memref<18x18x64xf32, #tpu.memory_space<vmem>>, vector<16x16x32xf32>
    %167 = vector.shape_cast %166 : vector<16x16x32xf32> to vector<256x32xf32>
    %168 = arith.truncf %167 : vector<256x32xf32> to vector<256x32xbf16>
    %c1_162 = arith.constant 1 : index
    %c0_163 = arith.constant 0 : index
    %c0_164 = arith.constant 0 : index
    %169 = vector.load %arg4[%c1_162, %c0_163, %c0_164] : memref<9x32x32xbf16, #tpu.memory_space<vmem>>, vector<1x32x32xbf16>
    %170 = vector.shape_cast %169 : vector<1x32x32xbf16> to vector<32x32xbf16>
    %cst_165 = arith.constant dense<0.000000e+00> : vector<256x32xf32>
    %171 = tpu.matmul %168, %170, %cst_165 {dimension_numbers = #tpu.dot_dimension_numbers<[1], [0], [0], [1], [0, 0, 1, 1], [], []>} : vector<256x32xbf16>, vector<32x32xbf16>, vector<256x32xf32> -> vector<256x32xf32>
    %172 = arith.addf %165, %171 : vector<256x32xf32>
    %c0_166 = arith.constant 0 : index
    %c2_167 = arith.constant 2 : index
    %c0_168 = arith.constant 0 : index
    %173 = vector.load %arg12[%c0_166, %c2_167, %c0_168] : memref<18x18x64xf32, #tpu.memory_space<vmem>>, vector<16x16x32xf32>
    %174 = vector.shape_cast %173 : vector<16x16x32xf32> to vector<256x32xf32>
    %175 = arith.truncf %174 : vector<256x32xf32> to vector<256x32xbf16>
    %c2_169 = arith.constant 2 : index
    %c0_170 = arith.constant 0 : index
    %c0_171 = arith.constant 0 : index
    %176 = vector.load %arg4[%c2_169, %c0_170, %c0_171] : memref<9x32x32xbf16, #tpu.memory_space<vmem>>, vector<1x32x32xbf16>
    %177 = vector.shape_cast %176 : vector<1x32x32xbf16> to vector<32x32xbf16>
    %cst_172 = arith.constant dense<0.000000e+00> : vector<256x32xf32>
    %178 = tpu.matmul %175, %177, %cst_172 {dimension_numbers = #tpu.dot_dimension_numbers<[1], [0], [0], [1], [0, 0, 1, 1], [], []>} : vector<256x32xbf16>, vector<32x32xbf16>, vector<256x32xf32> -> vector<256x32xf32>
    %179 = arith.addf %172, %178 : vector<256x32xf32>
    %c1_173 = arith.constant 1 : index
    %c0_174 = arith.constant 0 : index
    %c0_175 = arith.constant 0 : index
    %180 = vector.load %arg12[%c1_173, %c0_174, %c0_175] : memref<18x18x64xf32, #tpu.memory_space<vmem>>, vector<16x16x32xf32>
    %181 = vector.shape_cast %180 : vector<16x16x32xf32> to vector<256x32xf32>
    %182 = arith.truncf %181 : vector<256x32xf32> to vector<256x32xbf16>
    %c3_176 = arith.constant 3 : index
    %c0_177 = arith.constant 0 : index
    %c0_178 = arith.constant 0 : index
    %183 = vector.load %arg4[%c3_176, %c0_177, %c0_178] : memref<9x32x32xbf16, #tpu.memory_space<vmem>>, vector<1x32x32xbf16>
    %184 = vector.shape_cast %183 : vector<1x32x32xbf16> to vector<32x32xbf16>
    %cst_179 = arith.constant dense<0.000000e+00> : vector<256x32xf32>
    %185 = tpu.matmul %182, %184, %cst_179 {dimension_numbers = #tpu.dot_dimension_numbers<[1], [0], [0], [1], [0, 0, 1, 1], [], []>} : vector<256x32xbf16>, vector<32x32xbf16>, vector<256x32xf32> -> vector<256x32xf32>
    %186 = arith.addf %179, %185 : vector<256x32xf32>
    %c1_180 = arith.constant 1 : index
    %c1_181 = arith.constant 1 : index
    %c0_182 = arith.constant 0 : index
    %187 = vector.load %arg12[%c1_180, %c1_181, %c0_182] : memref<18x18x64xf32, #tpu.memory_space<vmem>>, vector<16x16x32xf32>
    %188 = vector.shape_cast %187 : vector<16x16x32xf32> to vector<256x32xf32>
    %189 = arith.truncf %188 : vector<256x32xf32> to vector<256x32xbf16>
    %c4_183 = arith.constant 4 : index
    %c0_184 = arith.constant 0 : index
    %c0_185 = arith.constant 0 : index
    %190 = vector.load %arg4[%c4_183, %c0_184, %c0_185] : memref<9x32x32xbf16, #tpu.memory_space<vmem>>, vector<1x32x32xbf16>
    %191 = vector.shape_cast %190 : vector<1x32x32xbf16> to vector<32x32xbf16>
    %cst_186 = arith.constant dense<0.000000e+00> : vector<256x32xf32>
    %192 = tpu.matmul %189, %191, %cst_186 {dimension_numbers = #tpu.dot_dimension_numbers<[1], [0], [0], [1], [0, 0, 1, 1], [], []>} : vector<256x32xbf16>, vector<32x32xbf16>, vector<256x32xf32> -> vector<256x32xf32>
    %193 = arith.addf %186, %192 : vector<256x32xf32>
    %c1_187 = arith.constant 1 : index
    %c2_188 = arith.constant 2 : index
    %c0_189 = arith.constant 0 : index
    %194 = vector.load %arg12[%c1_187, %c2_188, %c0_189] : memref<18x18x64xf32, #tpu.memory_space<vmem>>, vector<16x16x32xf32>
    %195 = vector.shape_cast %194 : vector<16x16x32xf32> to vector<256x32xf32>
    %196 = arith.truncf %195 : vector<256x32xf32> to vector<256x32xbf16>
    %c5_190 = arith.constant 5 : index
    %c0_191 = arith.constant 0 : index
    %c0_192 = arith.constant 0 : index
    %197 = vector.load %arg4[%c5_190, %c0_191, %c0_192] : memref<9x32x32xbf16, #tpu.memory_space<vmem>>, vector<1x32x32xbf16>
    %198 = vector.shape_cast %197 : vector<1x32x32xbf16> to vector<32x32xbf16>
    %cst_193 = arith.constant dense<0.000000e+00> : vector<256x32xf32>
    %199 = tpu.matmul %196, %198, %cst_193 {dimension_numbers = #tpu.dot_dimension_numbers<[1], [0], [0], [1], [0, 0, 1, 1], [], []>} : vector<256x32xbf16>, vector<32x32xbf16>, vector<256x32xf32> -> vector<256x32xf32>
    %200 = arith.addf %193, %199 : vector<256x32xf32>
    %c2_194 = arith.constant 2 : index
    %c0_195 = arith.constant 0 : index
    %c0_196 = arith.constant 0 : index
    %201 = vector.load %arg12[%c2_194, %c0_195, %c0_196] : memref<18x18x64xf32, #tpu.memory_space<vmem>>, vector<16x16x32xf32>
    %202 = vector.shape_cast %201 : vector<16x16x32xf32> to vector<256x32xf32>
    %203 = arith.truncf %202 : vector<256x32xf32> to vector<256x32xbf16>
    %c6_197 = arith.constant 6 : index
    %c0_198 = arith.constant 0 : index
    %c0_199 = arith.constant 0 : index
    %204 = vector.load %arg4[%c6_197, %c0_198, %c0_199] : memref<9x32x32xbf16, #tpu.memory_space<vmem>>, vector<1x32x32xbf16>
    %205 = vector.shape_cast %204 : vector<1x32x32xbf16> to vector<32x32xbf16>
    %cst_200 = arith.constant dense<0.000000e+00> : vector<256x32xf32>
    %206 = tpu.matmul %203, %205, %cst_200 {dimension_numbers = #tpu.dot_dimension_numbers<[1], [0], [0], [1], [0, 0, 1, 1], [], []>} : vector<256x32xbf16>, vector<32x32xbf16>, vector<256x32xf32> -> vector<256x32xf32>
    %207 = arith.addf %200, %206 : vector<256x32xf32>
    %c2_201 = arith.constant 2 : index
    %c1_202 = arith.constant 1 : index
    %c0_203 = arith.constant 0 : index
    %208 = vector.load %arg12[%c2_201, %c1_202, %c0_203] : memref<18x18x64xf32, #tpu.memory_space<vmem>>, vector<16x16x32xf32>
    %209 = vector.shape_cast %208 : vector<16x16x32xf32> to vector<256x32xf32>
    %210 = arith.truncf %209 : vector<256x32xf32> to vector<256x32xbf16>
    %c7_204 = arith.constant 7 : index
    %c0_205 = arith.constant 0 : index
    %c0_206 = arith.constant 0 : index
    %211 = vector.load %arg4[%c7_204, %c0_205, %c0_206] : memref<9x32x32xbf16, #tpu.memory_space<vmem>>, vector<1x32x32xbf16>
    %212 = vector.shape_cast %211 : vector<1x32x32xbf16> to vector<32x32xbf16>
    %cst_207 = arith.constant dense<0.000000e+00> : vector<256x32xf32>
    %213 = tpu.matmul %210, %212, %cst_207 {dimension_numbers = #tpu.dot_dimension_numbers<[1], [0], [0], [1], [0, 0, 1, 1], [], []>} : vector<256x32xbf16>, vector<32x32xbf16>, vector<256x32xf32> -> vector<256x32xf32>
    %214 = arith.addf %207, %213 : vector<256x32xf32>
    %c2_208 = arith.constant 2 : index
    %c2_209 = arith.constant 2 : index
    %c0_210 = arith.constant 0 : index
    %215 = vector.load %arg12[%c2_208, %c2_209, %c0_210] : memref<18x18x64xf32, #tpu.memory_space<vmem>>, vector<16x16x32xf32>
    %216 = vector.shape_cast %215 : vector<16x16x32xf32> to vector<256x32xf32>
    %217 = arith.truncf %216 : vector<256x32xf32> to vector<256x32xbf16>
    %c8_211 = arith.constant 8 : index
    %c0_212 = arith.constant 0 : index
    %c0_213 = arith.constant 0 : index
    %218 = vector.load %arg4[%c8_211, %c0_212, %c0_213] : memref<9x32x32xbf16, #tpu.memory_space<vmem>>, vector<1x32x32xbf16>
    %219 = vector.shape_cast %218 : vector<1x32x32xbf16> to vector<32x32xbf16>
    %cst_214 = arith.constant dense<0.000000e+00> : vector<256x32xf32>
    %220 = tpu.matmul %217, %219, %cst_214 {dimension_numbers = #tpu.dot_dimension_numbers<[1], [0], [0], [1], [0, 0, 1, 1], [], []>} : vector<256x32xbf16>, vector<32x32xbf16>, vector<256x32xf32> -> vector<256x32xf32>
    %221 = arith.addf %214, %220 : vector<256x32xf32>
    %c0_215 = arith.constant 0 : index
    %c0_216 = arith.constant 0 : index
    %222 = vector.load %arg8[%c0_215, %c0_216] : memref<1x32xf32, #tpu.memory_space<vmem>>, vector<1x32xf32>
    %223 = vector.broadcast %222 : vector<1x32xf32> to vector<256x32xf32>
    %224 = arith.addf %221, %223 : vector<256x32xf32>
    %cst_217 = arith.constant 0.000000e+00 : f32
    %225 = vector.broadcast %cst_217 : f32 to vector<256x32xf32>
    %226 = arith.cmpf oge, %224, %225 : vector<256x32xf32>
    %227 = vector.broadcast %0 : f32 to vector<256x32xf32>
    %228 = arith.mulf %227, %224 : vector<256x32xf32>
    %229 = arith.select %226, %224, %228 : vector<256x32xi1>, vector<256x32xf32>
    %230 = vector.shape_cast %229 : vector<256x32xf32> to vector<16x16x32xf32>
    %c1_218 = arith.constant 1 : index
    %c1_219 = arith.constant 1 : index
    %c0_220 = arith.constant 0 : index
    %231 = vector.load %arg12[%c1_218, %c1_219, %c0_220] : memref<18x18x64xf32, #tpu.memory_space<vmem>>, vector<16x16x32xf32>
    tpu.vector_store %arg12[%c1_218, %c1_219, %c0_220], %230 {strides = array<i32>} : memref<18x18x64xf32, #tpu.memory_space<vmem>>, vector<16x16x32xf32>,
    %cst_221 = arith.constant 0.000000e+00 : f32
    %232 = vector.broadcast %cst_221 : f32 to vector<256x64xf32>
    %c0_222 = arith.constant 0 : index
    %c0_223 = arith.constant 0 : index
    %c0_224 = arith.constant 0 : index
    %233 = vector.load %arg12[%c0_222, %c0_223, %c0_224] : memref<18x18x64xf32, #tpu.memory_space<vmem>>, vector<16x16x32xf32>
    %234 = vector.shape_cast %233 : vector<16x16x32xf32> to vector<256x32xf32>
    %235 = arith.truncf %234 : vector<256x32xf32> to vector<256x32xbf16>
    %c0_225 = arith.constant 0 : index
    %c0_226 = arith.constant 0 : index
    %c0_227 = arith.constant 0 : index
    %236 = vector.load %arg5[%c0_225, %c0_226, %c0_227] : memref<9x32x64xbf16, #tpu.memory_space<vmem>>, vector<1x32x64xbf16>
    %237 = vector.shape_cast %236 : vector<1x32x64xbf16> to vector<32x64xbf16>
    %cst_228 = arith.constant dense<0.000000e+00> : vector<256x64xf32>
    %238 = tpu.matmul %235, %237, %cst_228 {dimension_numbers = #tpu.dot_dimension_numbers<[1], [0], [0], [1], [0, 0, 1, 1], [], []>} : vector<256x32xbf16>, vector<32x64xbf16>, vector<256x64xf32> -> vector<256x64xf32>
    %239 = arith.addf %232, %238 : vector<256x64xf32>
    %c0_229 = arith.constant 0 : index
    %c1_230 = arith.constant 1 : index
    %c0_231 = arith.constant 0 : index
    %240 = vector.load %arg12[%c0_229, %c1_230, %c0_231] : memref<18x18x64xf32, #tpu.memory_space<vmem>>, vector<16x16x32xf32>
    %241 = vector.shape_cast %240 : vector<16x16x32xf32> to vector<256x32xf32>
    %242 = arith.truncf %241 : vector<256x32xf32> to vector<256x32xbf16>
    %c1_232 = arith.constant 1 : index
    %c0_233 = arith.constant 0 : index
    %c0_234 = arith.constant 0 : index
    %243 = vector.load %arg5[%c1_232, %c0_233, %c0_234] : memref<9x32x64xbf16, #tpu.memory_space<vmem>>, vector<1x32x64xbf16>
    %244 = vector.shape_cast %243 : vector<1x32x64xbf16> to vector<32x64xbf16>
    %cst_235 = arith.constant dense<0.000000e+00> : vector<256x64xf32>
    %245 = tpu.matmul %242, %244, %cst_235 {dimension_numbers = #tpu.dot_dimension_numbers<[1], [0], [0], [1], [0, 0, 1, 1], [], []>} : vector<256x32xbf16>, vector<32x64xbf16>, vector<256x64xf32> -> vector<256x64xf32>
    %246 = arith.addf %239, %245 : vector<256x64xf32>
    %c0_236 = arith.constant 0 : index
    %c2_237 = arith.constant 2 : index
    %c0_238 = arith.constant 0 : index
    %247 = vector.load %arg12[%c0_236, %c2_237, %c0_238] : memref<18x18x64xf32, #tpu.memory_space<vmem>>, vector<16x16x32xf32>
    %248 = vector.shape_cast %247 : vector<16x16x32xf32> to vector<256x32xf32>
    %249 = arith.truncf %248 : vector<256x32xf32> to vector<256x32xbf16>
    %c2_239 = arith.constant 2 : index
    %c0_240 = arith.constant 0 : index
    %c0_241 = arith.constant 0 : index
    %250 = vector.load %arg5[%c2_239, %c0_240, %c0_241] : memref<9x32x64xbf16, #tpu.memory_space<vmem>>, vector<1x32x64xbf16>
    %251 = vector.shape_cast %250 : vector<1x32x64xbf16> to vector<32x64xbf16>
    %cst_242 = arith.constant dense<0.000000e+00> : vector<256x64xf32>
    %252 = tpu.matmul %249, %251, %cst_242 {dimension_numbers = #tpu.dot_dimension_numbers<[1], [0], [0], [1], [0, 0, 1, 1], [], []>} : vector<256x32xbf16>, vector<32x64xbf16>, vector<256x64xf32> -> vector<256x64xf32>
    %253 = arith.addf %246, %252 : vector<256x64xf32>
    %c1_243 = arith.constant 1 : index
    %c0_244 = arith.constant 0 : index
    %c0_245 = arith.constant 0 : index
    %254 = vector.load %arg12[%c1_243, %c0_244, %c0_245] : memref<18x18x64xf32, #tpu.memory_space<vmem>>, vector<16x16x32xf32>
    %255 = vector.shape_cast %254 : vector<16x16x32xf32> to vector<256x32xf32>
    %256 = arith.truncf %255 : vector<256x32xf32> to vector<256x32xbf16>
    %c3_246 = arith.constant 3 : index
    %c0_247 = arith.constant 0 : index
    %c0_248 = arith.constant 0 : index
    %257 = vector.load %arg5[%c3_246, %c0_247, %c0_248] : memref<9x32x64xbf16, #tpu.memory_space<vmem>>, vector<1x32x64xbf16>
    %258 = vector.shape_cast %257 : vector<1x32x64xbf16> to vector<32x64xbf16>
    %cst_249 = arith.constant dense<0.000000e+00> : vector<256x64xf32>
    %259 = tpu.matmul %256, %258, %cst_249 {dimension_numbers = #tpu.dot_dimension_numbers<[1], [0], [0], [1], [0, 0, 1, 1], [], []>} : vector<256x32xbf16>, vector<32x64xbf16>, vector<256x64xf32> -> vector<256x64xf32>
    %260 = arith.addf %253, %259 : vector<256x64xf32>
    %c1_250 = arith.constant 1 : index
    %c1_251 = arith.constant 1 : index
    %c0_252 = arith.constant 0 : index
    %261 = vector.load %arg12[%c1_250, %c1_251, %c0_252] : memref<18x18x64xf32, #tpu.memory_space<vmem>>, vector<16x16x32xf32>
    %262 = vector.shape_cast %261 : vector<16x16x32xf32> to vector<256x32xf32>
    %263 = arith.truncf %262 : vector<256x32xf32> to vector<256x32xbf16>
    %c4_253 = arith.constant 4 : index
    %c0_254 = arith.constant 0 : index
    %c0_255 = arith.constant 0 : index
    %264 = vector.load %arg5[%c4_253, %c0_254, %c0_255] : memref<9x32x64xbf16, #tpu.memory_space<vmem>>, vector<1x32x64xbf16>
    %265 = vector.shape_cast %264 : vector<1x32x64xbf16> to vector<32x64xbf16>
    %cst_256 = arith.constant dense<0.000000e+00> : vector<256x64xf32>
    %266 = tpu.matmul %263, %265, %cst_256 {dimension_numbers = #tpu.dot_dimension_numbers<[1], [0], [0], [1], [0, 0, 1, 1], [], []>} : vector<256x32xbf16>, vector<32x64xbf16>, vector<256x64xf32> -> vector<256x64xf32>
    %267 = arith.addf %260, %266 : vector<256x64xf32>
    %c1_257 = arith.constant 1 : index
    %c2_258 = arith.constant 2 : index
    %c0_259 = arith.constant 0 : index
    %268 = vector.load %arg12[%c1_257, %c2_258, %c0_259] : memref<18x18x64xf32, #tpu.memory_space<vmem>>, vector<16x16x32xf32>
    %269 = vector.shape_cast %268 : vector<16x16x32xf32> to vector<256x32xf32>
    %270 = arith.truncf %269 : vector<256x32xf32> to vector<256x32xbf16>
    %c5_260 = arith.constant 5 : index
    %c0_261 = arith.constant 0 : index
    %c0_262 = arith.constant 0 : index
    %271 = vector.load %arg5[%c5_260, %c0_261, %c0_262] : memref<9x32x64xbf16, #tpu.memory_space<vmem>>, vector<1x32x64xbf16>
    %272 = vector.shape_cast %271 : vector<1x32x64xbf16> to vector<32x64xbf16>
    %cst_263 = arith.constant dense<0.000000e+00> : vector<256x64xf32>
    %273 = tpu.matmul %270, %272, %cst_263 {dimension_numbers = #tpu.dot_dimension_numbers<[1], [0], [0], [1], [0, 0, 1, 1], [], []>} : vector<256x32xbf16>, vector<32x64xbf16>, vector<256x64xf32> -> vector<256x64xf32>
    %274 = arith.addf %267, %273 : vector<256x64xf32>
    %c2_264 = arith.constant 2 : index
    %c0_265 = arith.constant 0 : index
    %c0_266 = arith.constant 0 : index
    %275 = vector.load %arg12[%c2_264, %c0_265, %c0_266] : memref<18x18x64xf32, #tpu.memory_space<vmem>>, vector<16x16x32xf32>
    %276 = vector.shape_cast %275 : vector<16x16x32xf32> to vector<256x32xf32>
    %277 = arith.truncf %276 : vector<256x32xf32> to vector<256x32xbf16>
    %c6_267 = arith.constant 6 : index
    %c0_268 = arith.constant 0 : index
    %c0_269 = arith.constant 0 : index
    %278 = vector.load %arg5[%c6_267, %c0_268, %c0_269] : memref<9x32x64xbf16, #tpu.memory_space<vmem>>, vector<1x32x64xbf16>
    %279 = vector.shape_cast %278 : vector<1x32x64xbf16> to vector<32x64xbf16>
    %cst_270 = arith.constant dense<0.000000e+00> : vector<256x64xf32>
    %280 = tpu.matmul %277, %279, %cst_270 {dimension_numbers = #tpu.dot_dimension_numbers<[1], [0], [0], [1], [0, 0, 1, 1], [], []>} : vector<256x32xbf16>, vector<32x64xbf16>, vector<256x64xf32> -> vector<256x64xf32>
    %281 = arith.addf %274, %280 : vector<256x64xf32>
    %c2_271 = arith.constant 2 : index
    %c1_272 = arith.constant 1 : index
    %c0_273 = arith.constant 0 : index
    %282 = vector.load %arg12[%c2_271, %c1_272, %c0_273] : memref<18x18x64xf32, #tpu.memory_space<vmem>>, vector<16x16x32xf32>
    %283 = vector.shape_cast %282 : vector<16x16x32xf32> to vector<256x32xf32>
    %284 = arith.truncf %283 : vector<256x32xf32> to vector<256x32xbf16>
    %c7_274 = arith.constant 7 : index
    %c0_275 = arith.constant 0 : index
    %c0_276 = arith.constant 0 : index
    %285 = vector.load %arg5[%c7_274, %c0_275, %c0_276] : memref<9x32x64xbf16, #tpu.memory_space<vmem>>, vector<1x32x64xbf16>
    %286 = vector.shape_cast %285 : vector<1x32x64xbf16> to vector<32x64xbf16>
    %cst_277 = arith.constant dense<0.000000e+00> : vector<256x64xf32>
    %287 = tpu.matmul %284, %286, %cst_277 {dimension_numbers = #tpu.dot_dimension_numbers<[1], [0], [0], [1], [0, 0, 1, 1], [], []>} : vector<256x32xbf16>, vector<32x64xbf16>, vector<256x64xf32> -> vector<256x64xf32>
    %288 = arith.addf %281, %287 : vector<256x64xf32>
    %c2_278 = arith.constant 2 : index
    %c2_279 = arith.constant 2 : index
    %c0_280 = arith.constant 0 : index
    %289 = vector.load %arg12[%c2_278, %c2_279, %c0_280] : memref<18x18x64xf32, #tpu.memory_space<vmem>>, vector<16x16x32xf32>
    %290 = vector.shape_cast %289 : vector<16x16x32xf32> to vector<256x32xf32>
    %291 = arith.truncf %290 : vector<256x32xf32> to vector<256x32xbf16>
    %c8_281 = arith.constant 8 : index
    %c0_282 = arith.constant 0 : index
    %c0_283 = arith.constant 0 : index
    %292 = vector.load %arg5[%c8_281, %c0_282, %c0_283] : memref<9x32x64xbf16, #tpu.memory_space<vmem>>, vector<1x32x64xbf16>
    %293 = vector.shape_cast %292 : vector<1x32x64xbf16> to vector<32x64xbf16>
    %cst_284 = arith.constant dense<0.000000e+00> : vector<256x64xf32>
    %294 = tpu.matmul %291, %293, %cst_284 {dimension_numbers = #tpu.dot_dimension_numbers<[1], [0], [0], [1], [0, 0, 1, 1], [], []>} : vector<256x32xbf16>, vector<32x64xbf16>, vector<256x64xf32> -> vector<256x64xf32>
    %295 = arith.addf %288, %294 : vector<256x64xf32>
    %c0_285 = arith.constant 0 : index
    %c0_286 = arith.constant 0 : index
    %296 = vector.load %arg9[%c0_285, %c0_286] : memref<1x64xf32, #tpu.memory_space<vmem>>, vector<1x64xf32>
    %297 = vector.broadcast %296 : vector<1x64xf32> to vector<256x64xf32>
    %298 = arith.addf %295, %297 : vector<256x64xf32>
    %299 = vector.shape_cast %298 : vector<256x64xf32> to vector<1x16x16x64xf32>
    %c0_287 = arith.constant 0 : index
    %c0_288 = arith.constant 0 : index
    %c0_289 = arith.constant 0 : index
    %c0_290 = arith.constant 0 : index
    %300 = vector.load %arg11[%c0_287, %c0_288, %c0_289, %c0_290] : memref<1x16x16x64xf32, #tpu.memory_space<vmem>>, vector<1x16x16x64xf32>
    tpu.vector_store %arg11[%c0_287, %c0_288, %c0_289, %c0_290], %299 {strides = array<i32>} : memref<1x16x16x64xf32, #tpu.memory_space<vmem>>, vector<1x16x16x64xf32>,
    return
  }
  func.func @transform_0(%arg0: i32) -> (i32, i32, i32, i32) {
    %c0_i32 = arith.constant 0 : i32
    %c0_i32_0 = arith.constant 0 : i32
    %c0_i32_1 = arith.constant 0 : i32
    %c0_i32_2 = arith.constant 0 : i32
    return %arg0, %c0_i32, %c0_i32_0, %c0_i32_1 : i32, i32, i32, i32
  }
  func.func @transform_1(%arg0: i32) -> (i32, i32, i32) {
    %c0_i32 = arith.constant 0 : i32
    %c0_i32_0 = arith.constant 0 : i32
    %c0_i32_1 = arith.constant 0 : i32
    %c0_i32_2 = arith.constant 0 : i32
    return %c0_i32, %c0_i32_0, %c0_i32_1 : i32, i32, i32
  }
  func.func @transform_2(%arg0: i32) -> (i32, i32, i32) {
    %c0_i32 = arith.constant 0 : i32
    %c0_i32_0 = arith.constant 0 : i32
    %c0_i32_1 = arith.constant 0 : i32
    %c0_i32_2 = arith.constant 0 : i32
    return %c0_i32, %c0_i32_0, %c0_i32_1 : i32, i32, i32
  }
  func.func @transform_3(%arg0: i32) -> (i32, i32, i32) {
    %c0_i32 = arith.constant 0 : i32
    %c0_i32_0 = arith.constant 0 : i32
    %c0_i32_1 = arith.constant 0 : i32
    %c0_i32_2 = arith.constant 0 : i32
    return %c0_i32, %c0_i32_0, %c0_i32_1 : i32, i32, i32
  }
  func.func @transform_4(%arg0: i32) -> (i32, i32, i32) {
    %c0_i32 = arith.constant 0 : i32
    %c0_i32_0 = arith.constant 0 : i32
    %c0_i32_1 = arith.constant 0 : i32
    %c0_i32_2 = arith.constant 0 : i32
    return %c0_i32, %c0_i32_0, %c0_i32_1 : i32, i32, i32
  }
  func.func @transform_5(%arg0: i32) -> (i32, i32) {
    %c0_i32 = arith.constant 0 : i32
    %c0_i32_0 = arith.constant 0 : i32
    %c0_i32_1 = arith.constant 0 : i32
    return %c0_i32, %c0_i32_0 : i32, i32
  }
  func.func @transform_6(%arg0: i32) -> (i32, i32) {
    %c0_i32 = arith.constant 0 : i32
    %c0_i32_0 = arith.constant 0 : i32
    %c0_i32_1 = arith.constant 0 : i32
    return %c0_i32, %c0_i32_0 : i32, i32
  }
  func.func @transform_7(%arg0: i32) -> (i32, i32) {
    %c0_i32 = arith.constant 0 : i32
    %c0_i32_0 = arith.constant 0 : i32
    %c0_i32_1 = arith.constant 0 : i32
    return %c0_i32, %c0_i32_0 : i32, i32
  }
  func.func @transform_8(%arg0: i32) -> (i32, i32) {
    %c0_i32 = arith.constant 0 : i32
    %c0_i32_0 = arith.constant 0 : i32
    %c0_i32_1 = arith.constant 0 : i32
    return %c0_i32, %c0_i32_0 : i32, i32
  }
  func.func @transform_9(%arg0: i32) -> i32 {
    %c0_i32 = arith.constant 0 : i32
    %c0_i32_0 = arith.constant 0 : i32
    return %c0_i32 : i32
  }
  func.func @transform_10(%arg0: i32) -> (i32, i32, i32, i32) {
    %c0_i32 = arith.constant 0 : i32
    %c0_i32_0 = arith.constant 0 : i32
    %c0_i32_1 = arith.constant 0 : i32
    %c0_i32_2 = arith.constant 0 : i32
    return %arg0, %c0_i32, %c0_i32_0, %c0_i32_1 : i32, i32, i32, i32
  }
}

</mosaic_0001>

<bundles_post_ra>
// kernel: encoding_block_end.1
= control target key start
LH: loop header
LB: loop body
LE: loop exit
PB: predicated region body
PF: predicated region fallthrough
CT: control target
= control target key end

     0   :  { %s18549_s0 = inlined_call_operand.vmem [shape: f32[2,16,16,64], index: 0, kind: input, shape index: {}]   ;;  %s18550_s1 = inlined_call_operand.vmem [shape: bf16[9,64,32], index: 1, kind: input, shape index: {}]   ;;  %s18551_s2 = inlined_call_operand.vmem [shape: bf16[9,32,32], index: 2, kind: input, shape index: {}]   ;;  %s18552_s3 = inlined_call_operand.vmem [shape: bf16[9,32,32], index: 3, kind: input, shape index: {}]   ;;  %s18553_s4 = inlined_call_operand.vmem [shape: bf16[9,32,64], index: 4, kind: input, shape index: {}]   ;;  %s18554_s5 = inlined_call_operand.vmem [shape: f32[1,32], index: 5, kind: input, shape index: {}]   ;;  %s18555_s6 = inlined_call_operand.vmem [shape: f32[1,32], index: 6, kind: input, shape index: {}]   ;;  %s18556_s7 = inlined_call_operand.vmem [shape: f32[1,32], index: 7, kind: input, shape index: {}]   ;;  %s18557_s8 = inlined_call_operand.vmem [shape: f32[1,64], index: 8, kind: input, shape index: {}]   ;;  %s18558_s9 = inlined_call_operand.<no memory space> [shape: f32[1], index: 9, kind: input, shape index: {}]   ;;  %s18559_s10 = inlined_call_operand.hbm [shape: f32[2,16,16,64], index: 10, kind: output, shape index: {}]  }
   0x1   :  { %15 = sst [smem:[#allocation3]] %s18558_s9 }
   0x2   :  { %16 = vsyncpa [#allocation5], 0 }
   0x3   :  { %18 = vsyncpa [#allocation5 + $0x1], 0  ;;  %s16147_s15 = smov 0   ;;  %s16149_s16 = smov 0  }
   0x4   :  { %s16151_s17 = smov 0   ;;  %s16153_s18 = smov 0  }
   0x5 LB: > { %s16168_s9 = sadd.s32 4294967295, %s16083_s18   ;;  %s12023_s19 = sadd.s32 4294967294, %s16083_s18   ;;  %s16083_s18 = sphi %s16153_s18, %s18565_s18   ;;  %s16079_s17 = sphi %s16151_s17, %s18564_s17   ;;  %s16075_s16 = sphi %s16149_s16, %s18563_s16   ;;  %s16071_s15 = sphi %s16147_s15, %s18562_s15  }
   0x6   : > { %s16172_s20 = sadd.s32 1, %s16083_s18   ;;  %s246_s21 = sadd.s32 1, %s16079_s17 }
   0x7   : > { %s243_s22 = ssub.s32 %s16083_s18, %s16172_s20  ;;  %p256_p0 = scmp.ne.s32.totalorder %s16079_s17, %s16075_s16 }
   0x8   : > { %p244_p1 = scmp.eq.s32.totalorder %s243_s22, 0  ;;  %p257_p2 = scmp.eq.s32.totalorder %s16168_s9, 1 }
   0x9   : > { %p262_p3 = scmp.ne.s32.totalorder %s16075_s16, %s16071_s15  ;;  %p263_p4 = scmp.eq.s32.totalorder %s12023_s19, 1 }
   0xa   : > { %s16183_s23 = scalar_select %p244_p1, %s16079_s17, %s246_s21  }
   0xb   : > { %p16185_p5 = por %p257_p2, %p256_p0  ;;  %p16189_p6 = por %p263_p4, %p262_p3 }
   0xc   : > { %p12026_p7 = scmp.ge.s32.totalorder %s16083_s18, 1  ;;  %p316_p8 = scmp.lt.s32.totalorder %s16083_s18, 3 }
   0xe   : > { %p317_p9 = pnand %p12026_p7, %p316_p8 }
   0xf   : > { %v15931_v0 = vld [vmem:[%s18550_s1 + $0x20] sm:$0xff] (!%p317_p9)   ;;  %vm361_vm0 = vcmask (!%p317_p9), 523264   ;;  %v15932_v1 = vld [vmem:[%s18550_s1 + $0x28] sm:$0xff] (!%p317_p9)   ;;  %v16085_v2 = vmov (!%p317_p9), 0.0   ;;  %vm364_vm1 = vcmask (!%p317_p9), 517120   ;;  %p354_p10 = scmp.lt.s32.totalorder (!%p317_p9), %s16168_s9, 1 }
  0x10   : > { %320 = sbr.rel (%p317_p9) target bundleno = 3073 (0xc01), region = 60  ;;  %13533 = vmatprep.subr.bf16.mxu0 (!%p317_p9), %v15931_v0  ;;  %362 = vst.msk [vmem:[#allocation2] sm:$0xff] (!%p317_p9), %vm361_vm0, %v16085_v2  ;;  %363 = vst.msk [vmem:[#allocation2 + $0x8] sm:$0xff] (!%p317_p9), %vm361_vm0, %v16085_v2  ;;  %v15933_v3 = vld [vmem:[%s18550_s1 + $0x30] sm:$0xff] (!%p317_p9)   ;;  %vm370_vm2 = vcmask (!%p317_p9), 516096   ;;  %v15934_v4 = vld [vmem:[%s18550_s1 + $0x38] sm:$0xff] (!%p317_p9)  }
  0x11   : > { %367 = vst.msk [vmem:[#allocation2 + $0x198] sm:$0xff] (!%p317_p9), %vm361_vm0, %v16085_v2  ;;  %368 = vst.msk [vmem:[#allocation2 + $0x1a0] sm:$0xff] (!%p317_p9), %vm361_vm0, %v16085_v2  ;;  %13534 = vmatpush3.bf16.msra.mxu0 (!%p317_p9), %v15931_v0  ;;  %v15935_v9 = vld [vmem:[%s18550_s1] sm:$0xff] (!%p317_p9)   ;;  %v15936_v28 = vld [vmem:[%s18550_s1 + $0x8] sm:$0xff] (!%p317_p9)   ;;  %vm3442_vm3 = vcmask (!%p317_p9), 261120   ;;  %s360_s22 = sld [smem:[#allocation3]] (!%p317_p9) }
  0x12   : > { %365 = vst.msk [vmem:[#allocation2 + $0x10] sm:$0x3] (!%p317_p9), %vm364_vm1, %v16085_v2  ;;  %369 = vst.msk [vmem:[#allocation2 + $0x1a8] sm:$0x3] (!%p317_p9), %vm364_vm1, %v16085_v2  ;;  %13535 = vmatprep.subr.bf16.mxu0 (!%p317_p9), %v15932_v1  ;;  %v15937_v44 = vld [vmem:[%s18550_s1 + $0x10] sm:$0xff] (!%p317_p9)   ;;  %v15938_v49 = vld [vmem:[%s18550_s1 + $0x18] sm:$0xff] (!%p317_p9)  }
  0x13   : > { %371 = vst.msk [vmem:[#allocation2] sm:$0x1] (!%p317_p9), %vm370_vm2, %v16085_v2  ;;  %372 = vst.msk [vmem:[#allocation2 + $0x18] sm:$0x1] (!%p317_p9), %vm370_vm2, %v16085_v2  ;;  %v15939_v58 = vld [vmem:[%s18550_s1 + $0x40] sm:$0xff] (!%p317_p9)   ;;  %s351_s27 = sand.u32 (!%p317_p9), 1, %s16075_s16  }
  0x14   : > { %373 = vst.msk [vmem:[#allocation2 + $0x30] sm:$0x1] (!%p317_p9), %vm370_vm2, %v16085_v2  ;;  %374 = vst.msk [vmem:[#allocation2 + $0x48] sm:$0x1] (!%p317_p9), %vm370_vm2, %v16085_v2  ;;  %s12027_s28 = sshll.u32 (!%p317_p9), %s351_s27, 8 }
  0x15   : > { %375 = vst.msk [vmem:[#allocation2 + $0x60] sm:$0x1] (!%p317_p9), %vm370_vm2, %v16085_v2  ;;  %376 = vst.msk [vmem:[#allocation2 + $0x78] sm:$0x1] (!%p317_p9), %vm370_vm2, %v16085_v2  ;;  %13536 = vmatpush3.bf16.msra.mxu0 (!%p317_p9), %v15932_v1  ;;  %s18401_s11 = scalar_lea.vmem (!%p317_p9), [#allocation4], %s12027_s28 }
  0x16   : > { %377 = vst.msk [vmem:[#allocation2 + $0x90] sm:$0x1] (!%p317_p9), %vm370_vm2, %v16085_v2  ;;  %378 = vst.msk [vmem:[#allocation2 + $0xa8] sm:$0x1] (!%p317_p9), %vm370_vm2, %v16085_v2  ;;  %13537 = vmatprep.subr.bf16.mxu0 (!%p317_p9), %v15933_v3 }
  0x17   : > { %s16210_s12 = scalar_select %p354_p10, %s16168_s9, 1  ;;  %379 = vst.msk [vmem:[#allocation2 + $0xc0] sm:$0x1] %vm370_vm2, %v16085_v2  ;;  %380 = vst.msk [vmem:[#allocation2 + $0xd8] sm:$0x1] %vm370_vm2, %v16085_v2  ;;  %v528_v5 = vld [vmem:[#allocation2 + $0x1] sm:$0xff] }
  0x18   : > { %381 = vst.msk [vmem:[#allocation2 + $0xf0] sm:$0x1] %vm370_vm2, %v16085_v2  ;;  %382 = vst.msk [vmem:[#allocation2 + $0x108] sm:$0x1] %vm370_vm2, %v16085_v2 }
  0x19   : > { %383 = vst.msk [vmem:[#allocation2 + $0x120] sm:$0x1] %vm370_vm2, %v16085_v2  ;;  %384 = vst.msk [vmem:[#allocation2 + $0x138] sm:$0x1] %vm370_vm2, %v16085_v2  ;;  %s12865_s13 = sshll.u32 %s16210_s12, 8  ;;  %v529_v8 = vld [vmem:[#allocation2 + $0x9] sm:$0xff]  ;;  %13538 = vmatpush3.bf16.msra.mxu0 %v15933_v3 }
  0x1a   : > { %385 = vst.msk [vmem:[#allocation2 + $0x150] sm:$0x1] %vm370_vm2, %v16085_v2  ;;  %386 = vst.msk [vmem:[#allocation2 + $0x168] sm:$0x1] %vm370_vm2, %v16085_v2  ;;  %s16255_s26 = scalar_lea.vmem %s18549_s0, %s12865_s13  ;;  %v560_v12 = vpack.c.bf16 %v529_v8, %v528_v5  ;;  %13539 = vmatprep.subr.bf16.mxu0 %v15934_v4  ;;  %s12866_s12 = sshll.u32 %s16168_s9, 12 }
  0x1b   : > { %387 = vst.msk [vmem:[#allocation2 + $0x180] sm:$0x1] %vm370_vm2, %v16085_v2  ;;  %388 = vst.msk [vmem:[#allocation2 + $0x198] sm:$0x1] %vm370_vm2, %v16085_v2  ;;  %v407_v6 = vld [vmem:[%s16255_s26] sm:$0xff]  ;;  %v408_v7 = vld [vmem:[%s16255_s26 + $0x8] sm:$0xff]  ;;  %s18495_s19 = scalar_lea.hbm %s18559_s10, %s12866_s12 }
  0x1c   : > { %389 = vst.msk [vmem:[#allocation2 + $0x11] sm:$0x1] %vm370_vm2, %v16085_v2  ;;  %390 = vst.msk [vmem:[#allocation2 + $0x29] sm:$0x1] %vm370_vm2, %v16085_v2  ;;  %v409_v10 = vld [vmem:[%s16255_s26 + $0x10] sm:$0xff]  ;;  %v410_v11 = vld [vmem:[%s16255_s26 + $0x18] sm:$0xff]  ;;  %13541 = vmatprep.mubr.msk.bf16.mxu0 %vm361_vm0, %v560_v12 }
  0x1d   : > { %391 = vst.msk [vmem:[#allocation2 + $0x41] sm:$0x1] %vm370_vm2, %v16085_v2  ;;  %392 = vst.msk [vmem:[#allocation2 + $0x59] sm:$0x1] %vm370_vm2, %v16085_v2  ;;  %v411_v13 = vld [vmem:[%s16255_s26 + $0x20] sm:$0xff]  ;;  %v412_v14 = vld [vmem:[%s16255_s26 + $0x28] sm:$0xff]  ;;  %13540 = vmatpush3.bf16.msra.mxu0 %v15934_v4 }
  0x1e   : > { %393 = vst.msk [vmem:[#allocation2 + $0x71] sm:$0x1] %vm370_vm2, %v16085_v2  ;;  %394 = vst.msk [vmem:[#allocation2 + $0x89] sm:$0x1] %vm370_vm2, %v16085_v2  ;;  %v413_v15 = vld [vmem:[%s16255_s26 + $0x30] sm:$0xff]  ;;  %v414_v16 = vld [vmem:[%s16255_s26 + $0x38] sm:$0xff]  ;;  %13573 = vmatprep.subr.bf16.mxu0 %v15935_v9 }
  0x1f   : > { %395 = vst.msk [vmem:[#allocation2 + $0xa1] sm:$0x1] %vm370_vm2, %v16085_v2  ;;  %396 = vst.msk [vmem:[#allocation2 + $0xb9] sm:$0x1] %vm370_vm2, %v16085_v2  ;;  %v415_v17 = vld [vmem:[%s16255_s26 + $0x40] sm:$0xff]  ;;  %v416_v18 = vld [vmem:[%s16255_s26 + $0x48] sm:$0xff] }
  0x20   : > { %397 = vst.msk [vmem:[#allocation2 + $0xd1] sm:$0x1] %vm370_vm2, %v16085_v2  ;;  %398 = vst.msk [vmem:[#allocation2 + $0xe9] sm:$0x1] %vm370_vm2, %v16085_v2  ;;  %v417_v19 = vld [vmem:[%s16255_s26 + $0x50] sm:$0xff]  ;;  %v418_v20 = vld [vmem:[%s16255_s26 + $0x58] sm:$0xff] }
  0x21   : > { %399 = vst.msk [vmem:[#allocation2 + $0x101] sm:$0x1] %vm370_vm2, %v16085_v2  ;;  %400 = vst.msk [vmem:[#allocation2 + $0x119] sm:$0x1] %vm370_vm2, %v16085_v2  ;;  %v419_v21 = vld [vmem:[%s16255_s26 + $0x60] sm:$0xff]  ;;  %v420_v22 = vld [vmem:[%s16255_s26 + $0x68] sm:$0xff] }
  0x22   : > { %401 = vst.msk [vmem:[#allocation2 + $0x131] sm:$0x1] %vm370_vm2, %v16085_v2  ;;  %402 = vst.msk [vmem:[#allocation2 + $0x149] sm:$0x1] %vm370_vm2, %v16085_v2  ;;  %v421_v23 = vld [vmem:[%s16255_s26 + $0x70] sm:$0xff]  ;;  %v422_v24 = vld [vmem:[%s16255_s26 + $0x78] sm:$0xff] }
  0x23   : > { %403 = vst.msk [vmem:[#allocation2 + $0x161] sm:$0x1] %vm370_vm2, %v16085_v2  ;;  %404 = vst.msk [vmem:[#allocation2 + $0x179] sm:$0x1] %vm370_vm2, %v16085_v2  ;;  %v423_v25 = vld [vmem:[%s16255_s26 + $0x80] sm:$0xff]  ;;  %v424_v26 = vld [vmem:[%s16255_s26 + $0x88] sm:$0xff] }
  0x24   : > { %405 = vst.msk [vmem:[#allocation2 + $0x191] sm:$0x1] %vm370_vm2, %v16085_v2  ;;  %406 = vst.msk [vmem:[#allocation2 + $0x1a9] sm:$0x1] %vm370_vm2, %v16085_v2  ;;  %v425_v27 = vld [vmem:[%s16255_s26 + $0x90] sm:$0xff]  ;;  %v426_v29 = vld [vmem:[%s16255_s26 + $0x98] sm:$0xff] }
  0x25   : > { %440 = vst.msk [vmem:[#allocation2 + $0x19] sm:$0xff] %vm361_vm0, %v407_v6  ;;  %441 = vst.msk [vmem:[#allocation2 + $0x21] sm:$0xff] %vm361_vm0, %v408_v7  ;;  %v427_v30 = vld [vmem:[%s16255_s26 + $0xa0] sm:$0xff]  ;;  %v428_v31 = vld [vmem:[%s16255_s26 + $0xa8] sm:$0xff]  ;;  %s11961_s13 = sshll.u32 %s18401_s11, 4  ;;  %s18508_s9 = scalar_lea.sflag [#allocation5], %s351_s27  ;;  %s18497_s13 = int_to_ptr.vmem [resolvable:$true] %s11961_s13 }
  0x26   : > { %442 = vst.msk [vmem:[#allocation2 + $0x31] sm:$0xff] %vm361_vm0, %v409_v10  ;;  %443 = vst.msk [vmem:[#allocation2 + $0x39] sm:$0xff] %vm361_vm0, %v410_v11  ;;  %v429_v34 = vld [vmem:[%s16255_s26 + $0xb0] sm:$0xff]  ;;  %v430_v38 = vld [vmem:[%s16255_s26 + $0xb8] sm:$0xff]  ;;  %s16021_s21 = scalar_lea.vmem %s18497_s13, 4096 }
  0x27   : > { %444 = vst.msk [vmem:[#allocation2 + $0x49] sm:$0xff] %vm361_vm0, %v411_v13  ;;  %445 = vst.msk [vmem:[#allocation2 + $0x51] sm:$0xff] %vm361_vm0, %v412_v14  ;;  %v431_v47 = vld [vmem:[%s16255_s26 + $0xc0] sm:$0xff]  ;;  %v432_v48 = vld [vmem:[%s16255_s26 + $0xc8] sm:$0xff]  ;;  %p16022_p11 = scmp.ne.s32.totalorder %s18497_s13, %s16021_s21 }
  0x28   : > { %446 = vst.msk [vmem:[#allocation2 + $0x61] sm:$0xff] %vm361_vm0, %v413_v15  ;;  %447 = vst.msk [vmem:[#allocation2 + $0x69] sm:$0xff] %vm361_vm0, %v414_v16  ;;  %v433_v50 = vld [vmem:[%s16255_s26 + $0xd0] sm:$0xff]  ;;  %v434_v51 = vld [vmem:[%s16255_s26 + $0xd8] sm:$0xff] }
  0x29   : > { %448 = vst.msk [vmem:[#allocation2 + $0x79] sm:$0xff] %vm361_vm0, %v415_v17  ;;  %449 = vst.msk [vmem:[#allocation2 + $0x81] sm:$0xff] %vm361_vm0, %v416_v18  ;;  %v435_v52 = vld [vmem:[%s16255_s26 + $0xe0] sm:$0xff]  ;;  %v436_v53 = vld [vmem:[%s16255_s26 + $0xe8] sm:$0xff]  ;;  %p16023_p12 = pnand %p16022_p11, %p16185_p5 }
  0x2a   : > { %450 = vst.msk [vmem:[#allocation2 + $0x91] sm:$0xff] %vm361_vm0, %v417_v19  ;;  %451 = vst.msk [vmem:[#allocation2 + $0x99] sm:$0xff] %vm361_vm0, %v418_v20 }
  0x2b   : > { %452 = vst.msk [vmem:[#allocation2 + $0xa9] sm:$0xff] %vm361_vm0, %v419_v21  ;;  %453 = vst.msk [vmem:[#allocation2 + $0xb1] sm:$0xff] %vm361_vm0, %v420_v22  ;;  %v472_v21 = vld [vmem:[#allocation2] sm:$0xff]  ;;  %v473_v22 = vld [vmem:[#allocation2 + $0x8] sm:$0xff]  ;;  %p16024_p13 = pneg %p16023_p12 }
  0x2c   : > { %454 = vst.msk [vmem:[#allocation2 + $0xc1] sm:$0xff] %vm361_vm0, %v421_v23  ;;  %455 = vst.msk [vmem:[#allocation2 + $0xc9] sm:$0xff] %vm361_vm0, %v422_v24  ;;  %v530_v32 = vld [vmem:[#allocation2 + $0x19] sm:$0xff]  ;;  %v531_v33 = vld [vmem:[#allocation2 + $0x21] sm:$0xff] }
  0x2d   : > { %456 = vst.msk [vmem:[#allocation2 + $0xd9] sm:$0xff] %vm361_vm0, %v423_v25  ;;  %457 = vst.msk [vmem:[#allocation2 + $0xe1] sm:$0xff] %vm361_vm0, %v424_v26  ;;  %v16309_v35 = vpack.c.bf16 %v531_v33, %v530_v32  ;;  %v532_v36 = vld [vmem:[#allocation2 + $0x31] sm:$0xff]  ;;  %v533_v37 = vld [vmem:[#allocation2 + $0x39] sm:$0xff]  ;;  %v504_v26 = vpack.c.bf16 %v473_v22, %v472_v21 }
  0x2e   : > { %458 = vst.msk [vmem:[#allocation2 + $0xf1] sm:$0xff] %vm361_vm0, %v425_v27  ;;  %459 = vst.msk [vmem:[#allocation2 + $0xf9] sm:$0xff] %vm361_vm0, %v426_v29  ;;  %v16313_v39 = vpack.c.bf16 %v533_v37, %v532_v36  ;;  %v534_v40 = vld [vmem:[#allocation2 + $0x49] sm:$0xff]  ;;  %v535_v41 = vld [vmem:[#allocation2 + $0x51] sm:$0xff] }
  0x2f   : > { %460 = vst.msk [vmem:[#allocation2 + $0x109] sm:$0xff] %vm361_vm0, %v427_v30  ;;  %461 = vst.msk [vmem:[#allocation2 + $0x111] sm:$0xff] %vm361_vm0, %v428_v31  ;;  %13542 = vmatmul.mubr.msk.bf16.vlgmr.msra.gmra.mrb[0].mxu0 %vm361_vm0, %v16309_v35  ;;  %v536_v42 = vld [vmem:[#allocation2 + $0x61] sm:$0xff]  ;;  %v537_v43 = vld [vmem:[#allocation2 + $0x69] sm:$0xff]  ;;  %v16323_v45 = vpack.c.bf16 %v535_v41, %v534_v40 }
  0x30   : > { %462 = vst.msk [vmem:[#allocation2 + $0x121] sm:$0xff] %vm361_vm0, %v429_v34  ;;  %463 = vst.msk [vmem:[#allocation2 + $0x129] sm:$0xff] %vm361_vm0, %v430_v38  ;;  %13574 = vmatpush3.bf16.msra.mxu0 %v15935_v9  ;;  %13545 = vmatprep.mubr.msk.bf16.mxu0 %vm361_vm0, %v16313_v39  ;;  %v16325_v46 = vpack.c.bf16 %v537_v43, %v536_v42  ;;  %v538_v54 = vld [vmem:[#allocation2 + $0x79] sm:$0xff]  ;;  %v539_v55 = vld [vmem:[#allocation2 + $0x81] sm:$0xff] }
  0x31   : > { %13575 = vmatprep.subr.bf16.mxu0 %v15936_v28  ;;  %464 = vst.msk [vmem:[#allocation2 + $0x139] sm:$0xff] %vm361_vm0, %v431_v47  ;;  %465 = vst.msk [vmem:[#allocation2 + $0x141] sm:$0xff] %vm361_vm0, %v432_v48  ;;  %v540_v56 = vld [vmem:[#allocation2 + $0x91] sm:$0xff]  ;;  %v541_v57 = vld [vmem:[#allocation2 + $0x99] sm:$0xff]  ;;  %v16349_v59 = vpack.c.bf16 %v539_v55, %v538_v54 }
  0x32   : > { %466 = vst.msk [vmem:[#allocation2 + $0x151] sm:$0xff] %vm361_vm0, %v433_v50  ;;  %467 = vst.msk [vmem:[#allocation2 + $0x159] sm:$0xff] %vm361_vm0, %v434_v51  ;;  %v16351_v60 = vpack.c.bf16 %v541_v57, %v540_v56  ;;  %v542_v61 = vld [vmem:[#allocation2 + $0xa9] sm:$0xff]  ;;  %v543_v62 = vld [vmem:[#allocation2 + $0xb1] sm:$0xff] }
  0x33   : > { %468 = vst.msk [vmem:[#allocation2 + $0x169] sm:$0xff] %vm361_vm0, %v435_v52  ;;  %469 = vst.msk [vmem:[#allocation2 + $0x171] sm:$0xff] %vm361_vm0, %v436_v53  ;;  %v544_v63 = vld [vmem:[#allocation2 + $0xc1] sm:$0xff]  ;;  %v545_v0 = vld [vmem:[#allocation2 + $0xc9] sm:$0xff]  ;;  %v16357_v1 = vpack.c.bf16 %v543_v62, %v542_v61 }
  0x34   : > { %13576 = vmatpush3.bf16.msra.mxu0 %v15936_v28  ;;  %v16359_v2 = vpack.c.bf16 %v545_v0, %v544_v63  ;;  %v546_v3 = vld [vmem:[#allocation2 + $0xd9] sm:$0xff]  ;;  %v547_v4 = vld [vmem:[#allocation2 + $0xe1] sm:$0xff]  ;;  %v476_v29 = vld [vmem:[#allocation2 + $0x30] sm:$0xff] }
  0x35   : > { %13577 = vmatprep.subr.bf16.mxu0 %v15937_v44  ;;  %v548_v5 = vld [vmem:[#allocation2 + $0xf1] sm:$0xff]  ;;  %v549_v6 = vld [vmem:[#allocation2 + $0xf9] sm:$0xff]  ;;  %v16365_v7 = vpack.c.bf16 %v547_v4, %v546_v3  ;;  %v15940_v32 = vld [vmem:[%s18550_s1 + $0x48] sm:$0xff]  }
  0x36   : > { %v16367_v8 = vpack.c.bf16 %v549_v6, %v548_v5  ;;  %v550_v9 = vld [vmem:[#allocation2 + $0x109] sm:$0xff]  ;;  %v551_v10 = vld [vmem:[#allocation2 + $0x111] sm:$0xff]  ;;  %v475_v28 = vld [vmem:[#allocation2 + $0x20] sm:$0xff] }
  0x37   : > { %13546 = vmatmul.mubr.msk.bf16.gmra.mrb[4].mxu0 %vm361_vm0, %v16323_v45  ;;  %v552_v11 = vld [vmem:[#allocation2 + $0x121] sm:$0xff]  ;;  %v553_v12 = vld [vmem:[#allocation2 + $0x129] sm:$0xff]  ;;  %v16373_v13 = vpack.c.bf16 %v551_v10, %v550_v9  ;;  %v474_v27 = vld [vmem:[#allocation2 + $0x18] sm:$0xff] }
  0x38   : > { %13549 = vmatprep.mubr.msk.bf16.mxu0 %vm361_vm0, %v16325_v46  ;;  %13578 = vmatpush3.bf16.msra.mxu0 %v15937_v44  ;;  %v16375_v14 = vpack.c.bf16 %v553_v12, %v552_v11  ;;  %v554_v15 = vld [vmem:[#allocation2 + $0x139] sm:$0xff]  ;;  %v555_v16 = vld [vmem:[#allocation2 + $0x141] sm:$0xff]  ;;  %v16394_v31 = vpack.c.bf16 %v475_v28, %v474_v27  ;;  %v479_v36 = vld [vmem:[#allocation2 + $0x50] sm:$0xff] }
  0x39   : > { %13579 = vmatprep.subr.bf16.mxu0 %v15938_v49  ;;  %v556_v17 = vld [vmem:[#allocation2 + $0x151] sm:$0xff]  ;;  %v557_v18 = vld [vmem:[#allocation2 + $0x159] sm:$0xff]  ;;  %v16381_v19 = vpack.c.bf16 %v555_v16, %v554_v15  ;;  %v478_v34 = vld [vmem:[#allocation2 + $0x48] sm:$0xff] }
  0x3a   : > { %v16383_v20 = vpack.c.bf16 %v557_v18, %v556_v17  ;;  %v558_v23 = vld [vmem:[#allocation2 + $0x169] sm:$0xff]  ;;  %v559_v24 = vld [vmem:[#allocation2 + $0x171] sm:$0xff]  ;;  %v480_v37 = vld [vmem:[#allocation2 + $0x60] sm:$0xff]  ;;  %v16408_v41 = vpack.c.bf16 %v479_v36, %v478_v34 }
  0x3b   : > { %v16389_v25 = vpack.c.bf16 %v559_v24, %v558_v23  ;;  %v477_v30 = vld [vmem:[#allocation2 + $0x38] sm:$0xff]  ;;  %v481_v38 = vld [vmem:[#allocation2 + $0x68] sm:$0xff]  ;;  %v15941_v40 = vld [vmem:[%s18550_s1 + $0x50] sm:$0xff]  }
  0x3c   : > { %13580 = vmatpush3.bf16.msra.mxu0 %v15938_v49  ;;  %v16399_v33 = vpack.c.bf16 %v477_v30, %v476_v29  ;;  %v15942_v42 = vld [vmem:[%s18550_s1 + $0x58] sm:$0xff]   ;;  %v16413_v43 = vpack.c.bf16 %v481_v38, %v480_v37  ;;  %v483_v47 = vld [vmem:[#allocation2 + $0x80] sm:$0xff]  ;;  %v484_v48 = vld [vmem:[#allocation2 + $0x90] sm:$0xff] }
  0x3d   : > { %13613 = vmatprep.subr.bf16.mxu0 %v15939_v58  ;;  %v482_v44 = vld [vmem:[#allocation2 + $0x78] sm:$0xff]  ;;  %v15943_v50 = vld [vmem:[%s18550_s1 + $0x60] sm:$0xff]   ;;  %v486_v53 = vld [vmem:[#allocation2 + $0xa8] sm:$0xff] }
  0x3e   : > { %v485_v49 = vld [vmem:[#allocation2 + $0x98] sm:$0xff]  ;;  %v16422_v51 = vpack.c.bf16 %v483_v47, %v482_v44  ;;  %v487_v54 = vld [vmem:[#allocation2 + $0xb0] sm:$0xff]  ;;  %v488_v55 = vld [vmem:[#allocation2 + $0xc0] sm:$0xff] }
  0x3f   : > { %13550 = vmatmul.mubr.msk.bf16.gmra.mrb[8].mxu0 %vm361_vm0, %v16349_v59  ;;  %v16424_v52 = vpack.c.bf16 %v485_v49, %v484_v48  ;;  %v489_v56 = vld [vmem:[#allocation2 + $0xc8] sm:$0xff]  ;;  %v16430_v57 = vpack.c.bf16 %v487_v54, %v486_v53  ;;  %v490_v61 = vld [vmem:[#allocation2 + $0xd8] sm:$0xff]  ;;  %v491_v62 = vld [vmem:[#allocation2 + $0xe0] sm:$0xff] }
  0x40   : > { %13553 = vmatprep.mubr.msk.bf16.mxu0 %vm361_vm0, %v16351_v60  ;;  %v492_v63 = vld [vmem:[#allocation2 + $0xf0] sm:$0xff]  ;;  %v493_v0 = vld [vmem:[#allocation2 + $0xf8] sm:$0xff]  ;;  %v16438_v3 = vpack.c.bf16 %v491_v62, %v490_v61  ;;  %v494_v5 = vld [vmem:[#allocation2 + $0x108] sm:$0xff] }
  0x41   : > { %v16440_v4 = vpack.c.bf16 %v493_v0, %v492_v63  ;;  %v495_v6 = vld [vmem:[#allocation2 + $0x110] sm:$0xff]  ;;  %v496_v9 = vld [vmem:[#allocation2 + $0x120] sm:$0xff]  ;;  %v497_v10 = vld [vmem:[#allocation2 + $0x128] sm:$0xff] }
  0x42   : > { %v16446_v11 = vpack.c.bf16 %v495_v6, %v494_v5  ;;  %v16448_v12 = vpack.c.bf16 %v497_v10, %v496_v9  ;;  %v498_v15 = vld [vmem:[#allocation2 + $0x138] sm:$0xff]  ;;  %v499_v16 = vld [vmem:[#allocation2 + $0x140] sm:$0xff]  ;;  %v500_v17 = vld [vmem:[#allocation2 + $0x150] sm:$0xff] }
  0x43   : > { %v501_v18 = vld [vmem:[#allocation2 + $0x158] sm:$0xff]  ;;  %v16454_v21 = vpack.c.bf16 %v499_v16, %v498_v15  ;;  %v437_v23 = vld [vmem:[%s16255_s26 + $0xf0] sm:$0xff]  ;;  %v1051_v28 = vld [vmem:[#allocation2 + $0x2] sm:$0xff] }
  0x44   : > { %v16456_v22 = vpack.c.bf16 %v501_v18, %v500_v17  ;;  %v438_v24 = vld [vmem:[%s16255_s26 + $0xf8] sm:$0xff]  ;;  %470 = vst.msk [vmem:[#allocation2 + $0x181] sm:$0xff] %vm361_vm0, %v437_v23  ;;  %v503_v27 = vld [vmem:[#allocation2 + $0x170] sm:$0xff]  ;;  %v1054_v36 = vld [vmem:[#allocation2 + $0x22] sm:$0xff] }
  0x45   : > { %471 = vst.msk [vmem:[#allocation2 + $0x189] sm:$0xff] %vm361_vm0, %v438_v24  ;;  %v1052_v29 = vld [vmem:[#allocation2 + $0xa] sm:$0xff]  ;;  %v1053_v34 = vld [vmem:[#allocation2 + $0x1a] sm:$0xff]  ;;  %v1055_v37 = vld [vmem:[#allocation2 + $0x32] sm:$0xff] }
  0x46   : > { %v1056_v38 = vld [vmem:[#allocation2 + $0x3a] sm:$0xff]  ;;  %v15944_v44 = vld [vmem:[%s18550_s1 + $0x68] sm:$0xff]   ;;  %v1058_v48 = vld [vmem:[#allocation2 + $0x52] sm:$0xff] }
  0x47   : > { %13554 = vmatmul.mubr.msk.bf16.gmra.mrb[12].mxu0 %vm361_vm0, %v16357_v1  ;;  %v1057_v47 = vld [vmem:[#allocation2 + $0x4a] sm:$0xff]  ;;  %v1059_v49 = vld [vmem:[#allocation2 + $0x62] sm:$0xff]  ;;  %v1061_v61 = vld [vmem:[#allocation2 + $0x7a] sm:$0xff] }
  0x48   : > { %13557 = vmatprep.mubr.msk.bf16.mxu0 %vm361_vm0, %v16359_v2  ;;  %v1060_v53 = vld [vmem:[#allocation2 + $0x6a] sm:$0xff]  ;;  %v1062_v62 = vld [vmem:[#allocation2 + $0x82] sm:$0xff]  ;;  %v1063_v63 = vld [vmem:[#allocation2 + $0x92] sm:$0xff] }
  0x49   : > { %v15945_v54 = vld [vmem:[%s18550_s1 + $0x70] sm:$0xff]   ;;  %v1064_v0 = vld [vmem:[#allocation2 + $0x9a] sm:$0xff]  ;;  %v16499_v6 = vpack.c.bf16 %v1062_v62, %v1061_v61  ;;  %v1067_v16 = vld [vmem:[#allocation2 + $0xc2] sm:$0xff] }
  0x4a   : > { %v15947_v5 = vld [vmem:[%s18550_s1 + $0x80] sm:$0xff]   ;;  %v16501_v9 = vpack.c.bf16 %v1064_v0, %v1063_v63  ;;  %v1065_v10 = vld [vmem:[#allocation2 + $0xaa] sm:$0xff]  ;;  %v1066_v15 = vld [vmem:[#allocation2 + $0xb2] sm:$0xff] }
  0x4b   : > { %v1068_v17 = vld [vmem:[#allocation2 + $0xca] sm:$0xff]  ;;  %v16507_v18 = vpack.c.bf16 %v1066_v15, %v1065_v10  ;;  %v1069_v24 = vld [vmem:[#allocation2 + $0xda] sm:$0xff]  ;;  %v1082_v63 = vld [vmem:[#allocation2 + $0x172] sm:$0xff] }
  0x4c   : > { %v16509_v23 = vpack.c.bf16 %v1068_v17, %v1067_v16  ;;  %v1081_v62 = vld [vmem:[#allocation2 + $0x16a] sm:$0xff]  ;;  %v1403_v16 = vld [vmem:[#allocation2 + $0x180] sm:$0xff] }
  0x4d   : > { %v16539_v0 = vpack.c.bf16 %v1082_v63, %v1081_v62  ;;  %v15948_v10 = vld [vmem:[%s18550_s1 + $0x88] sm:$0xff]   ;;  %v15949_v15 = vld [vmem:[%s18550_s1 + $0x90] sm:$0xff]  }
  0x4e   : > { %v1404_v17 = vld [vmem:[#allocation2 + $0x188] sm:$0xff] }
  0x4f   : > { %13558 = vmatmul.mubr.msk.bf16.gmra.mrb[16].mxu0 %vm361_vm0, %v16365_v7  ;;  %v2674_v62 = vld [vmem:[#allocation2 + $0xc1] sm:$0xff]  ;;  %v2675_v63 = vld [vmem:[#allocation2 + $0xc9] sm:$0xff] }
  0x50   : > { %13561 = vmatprep.mubr.msk.bf16.mxu0 %vm361_vm0, %v16367_v8 }
  0x57   : > { %13562 = vmatmul.mubr.msk.bf16.gmra.mrb[20].mxu0 %vm361_vm0, %v16373_v13 }
  0x58   : > { %13565 = vmatprep.mubr.msk.bf16.mxu0 %vm361_vm0, %v16375_v14 }
  0x5f   : > { %13566 = vmatmul.mubr.msk.bf16.gmra.mrb[24].mxu0 %vm361_vm0, %v16381_v19 }
  0x60   : > { %13569 = vmatprep.mubr.msk.bf16.mxu0 %vm361_vm0, %v16383_v20 }
  0x67   : > { %13570 = vmatmul.mubr.msk.bf16.gmra.mrb[28].mxu0 %vm361_vm0, %v16389_v25 }
  0x68   : > { %13581 = vmatprep.mubr.msk.bf16.mxu0 %vm361_vm0, %v504_v26  ;;  %v502_v26 = vld [vmem:[#allocation2 + $0x168] sm:$0xff] }
  0x69   : > { %v16466_v30 = vpack.c.bf16 %v503_v27, %v502_v26  ;;  %v1070_v26 = vld [vmem:[#allocation2 + $0xe2] sm:$0xff]  ;;  %v1071_v27 = vld [vmem:[#allocation2 + $0xf2] sm:$0xff] }
  0x6f   : > { %13582 = vmatmul.mubr.msk.bf16.vlgmr.msra.gmra.mrb[0].mxu0 %vm361_vm0, %v16394_v31 }
  0x70   : > { %13614 = vmatpush3.bf16.msra.mxu0 %v15939_v58  ;;  %13585 = vmatprep.mubr.msk.bf16.mxu0 %vm361_vm0, %v16399_v33  ;;  %v16432_v58 = vpack.c.bf16 %v489_v56, %v488_v55  ;;  %v16485_v55 = vpack.c.bf16 %v1058_v48, %v1057_v47  ;;  %v16487_v56 = vpack.c.bf16 %v1060_v53, %v1059_v49  ;;  %v1077_v48 = vld [vmem:[#allocation2 + $0x13a] sm:$0xff]  ;;  %v1078_v49 = vld [vmem:[#allocation2 + $0x142] sm:$0xff]  ;;  %v1079_v53 = vld [vmem:[#allocation2 + $0x152] sm:$0xff] }
  0x71   : > { %13615 = vmatprep.subr.bf16.mxu0 %v15940_v32 }
  0x74   : > { %13616 = vmatpush3.bf16.msra.mxu0 %v15940_v32  ;;  %v1083_v32 = vpack.c.bf16 %v1052_v29, %v1051_v28  ;;  %v1072_v28 = vld [vmem:[#allocation2 + $0xfa] sm:$0xff]  ;;  %v16515_v29 = vpack.c.bf16 %v1070_v26, %v1069_v24  ;;  %v16585_v24 = vpack.c.bf16 %v1404_v17, %v1403_v16  ;;  %v15952_v26 = vld [vmem:[%s18550_s1 + $0xa8] sm:$0xff]   ;;  %v2678_v16 = vld [vmem:[#allocation2 + $0xf1] sm:$0xff] }
  0x75   : > { %13617 = vmatprep.subr.bf16.mxu0 %v15941_v40  ;;  %v2679_v17 = vld [vmem:[#allocation2 + $0xf9] sm:$0xff] }
  0x77   : > { %13586 = vmatmul.mubr.msk.bf16.gmra.mrb[4].mxu0 %vm361_vm0, %v16408_v41 }
  0x78   : > { %13589 = vmatprep.mubr.msk.bf16.mxu0 %vm361_vm0, %v16413_v43  ;;  %13618 = vmatpush3.bf16.msra.mxu0 %v15941_v40  ;;  %v16471_v40 = vpack.c.bf16 %v1054_v36, %v1053_v34  ;;  %v1073_v34 = vld [vmem:[#allocation2 + $0x10a] sm:$0xff]  ;;  %v1074_v36 = vld [vmem:[#allocation2 + $0x112] sm:$0xff] }
  0x79   : > { %13619 = vmatprep.subr.bf16.mxu0 %v15942_v42 }
  0x7c   : > { %13620 = vmatpush3.bf16.msra.mxu0 %v15942_v42  ;;  %v16473_v42 = vpack.c.bf16 %v1056_v38, %v1055_v37  ;;  %v1075_v37 = vld [vmem:[#allocation2 + $0x122] sm:$0xff]  ;;  %v1076_v38 = vld [vmem:[#allocation2 + $0x12a] sm:$0xff] }
  0x7d   : > { %13653 = vmatprep.subr.bf16.mxu0 %v15943_v50  ;;  %v16525_v47 = vpack.c.bf16 %v1076_v38, %v1075_v37  ;;  %v15965_v37 = vld [vmem:[%s18550_s1 + $0x110] sm:$0xff]  }
  0x7f   : > { %13590 = vmatmul.mubr.msk.bf16.gmra.mrb[8].mxu0 %vm361_vm0, %v16422_v51 }
  0x80   : > { %13593 = vmatprep.mubr.msk.bf16.mxu0 %vm361_vm0, %v16424_v52 }
  0x87   : > { %13594 = vmatmul.mubr.msk.bf16.gmra.mrb[12].mxu0 %vm361_vm0, %v16430_v57 }
  0x88   : > { %13597 = vmatprep.mubr.msk.bf16.mxu0 %vm361_vm0, %v16432_v58 }
  0x8f   : > { %13598 = vmatmul.mubr.msk.bf16.gmra.mrb[16].mxu0 %vm361_vm0, %v16438_v3 }
  0x90   : > { %13601 = vmatprep.mubr.msk.bf16.mxu0 %vm361_vm0, %v16440_v4 }
  0x97   : > { %13602 = vmatmul.mubr.msk.bf16.gmra.mrb[20].mxu0 %vm361_vm0, %v16446_v11 }
  0x98   : > { %13605 = vmatprep.mubr.msk.bf16.mxu0 %vm361_vm0, %v16448_v12 }
  0x9f   : > { %13606 = vmatmul.mubr.msk.bf16.gmra.mrb[24].mxu0 %vm361_vm0, %v16454_v21 }
  0xa0   : > { %13609 = vmatprep.mubr.msk.bf16.mxu0 %vm361_vm0, %v16456_v22 }
  0xa7   : > { %13610 = vmatmul.mubr.msk.bf16.gmra.mrb[28].mxu0 %vm361_vm0, %v16466_v30 }
  0xa8   : > { %13621 = vmatprep.mubr.msk.bf16.mxu0 %vm361_vm0, %v1083_v32  ;;  %v16517_v32 = vpack.c.bf16 %v1072_v28, %v1071_v27  ;;  %v15953_v27 = vld [vmem:[%s18550_s1 + $0xb0] sm:$0xff]   ;;  %v2669_v28 = vld [vmem:[#allocation2 + $0x81] sm:$0xff] }
  0xaf   : > { %13622 = vmatmul.mubr.msk.bf16.vlgmr.msra.gmra.mrb[0].mxu0 %vm361_vm0, %v16471_v40 }
  0xb0   : > { %13654 = vmatpush3.bf16.msra.mxu0 %v15943_v50  ;;  %13625 = vmatprep.mubr.msk.bf16.mxu0 %vm361_vm0, %v16473_v42  ;;  %v15946_v50 = vld [vmem:[%s18550_s1 + $0x78] sm:$0xff]  }
  0xb1   : > { %13655 = vmatprep.subr.bf16.mxu0 %v15944_v44 }
  0xb4   : > { %13656 = vmatpush3.bf16.msra.mxu0 %v15944_v44  ;;  %v16523_v44 = vpack.c.bf16 %v1074_v36, %v1073_v34  ;;  %v2670_v34 = vld [vmem:[#allocation2 + $0x91] sm:$0xff]  ;;  %v2671_v36 = vld [vmem:[#allocation2 + $0x99] sm:$0xff] }
  0xb5   : > { %13657 = vmatprep.subr.bf16.mxu0 %v15945_v54 }
  0xb7   : > { %13626 = vmatmul.mubr.msk.bf16.gmra.mrb[4].mxu0 %vm361_vm0, %v16485_v55 }
  0xb8   : > { %13629 = vmatprep.mubr.msk.bf16.mxu0 %vm361_vm0, %v16487_v56  ;;  %13658 = vmatpush3.bf16.msra.mxu0 %v15945_v54  ;;  %v1080_v54 = vld [vmem:[#allocation2 + $0x15a] sm:$0xff] }
  0xb9   : > { %13659 = vmatprep.subr.bf16.mxu0 %v15946_v50  ;;  %v16533_v61 = vpack.c.bf16 %v1080_v54, %v1079_v53  ;;  %v2672_v53 = vld [vmem:[#allocation2 + $0xa9] sm:$0xff]  ;;  %v2673_v54 = vld [vmem:[#allocation2 + $0xb1] sm:$0xff] }
  0xbc   : > { %13660 = vmatpush3.bf16.msra.mxu0 %v15946_v50  ;;  %v16531_v50 = vpack.c.bf16 %v1078_v49, %v1077_v48  ;;  %v2698_v48 = vpack.c.bf16 %v2671_v36, %v2670_v34  ;;  %v15966_v49 = vld [vmem:[%s18550_s1 + $0x118] sm:$0xff]  }
  0xbd   : > { %13693 = vmatprep.subr.bf16.mxu0 %v15947_v5 }
  0xbf   : > { %13630 = vmatmul.mubr.msk.bf16.gmra.mrb[8].mxu0 %vm361_vm0, %v16499_v6 }
  0xc0   : > { %13633 = vmatprep.mubr.msk.bf16.mxu0 %vm361_vm0, %v16501_v9 }
  0xc7   : > { %13634 = vmatmul.mubr.msk.bf16.gmra.mrb[12].mxu0 %vm361_vm0, %v16507_v18 }
  0xc8   : > { %13637 = vmatprep.mubr.msk.bf16.mxu0 %vm361_vm0, %v16509_v23 }
  0xcf   : > { %13638 = vmatmul.mubr.msk.bf16.gmra.mrb[16].mxu0 %vm361_vm0, %v16515_v29 }
  0xd0   : > { %13641 = vmatprep.mubr.msk.bf16.mxu0 %vm361_vm0, %v16517_v32 }
  0xd7   : > { %13642 = vmatmul.mubr.msk.bf16.gmra.mrb[20].mxu0 %vm361_vm0, %v16523_v44 }
  0xd8   : > { %13645 = vmatprep.mubr.msk.bf16.mxu0 %vm361_vm0, %v16525_v47 }
  0xdf   : > { %13646 = vmatmul.mubr.msk.bf16.gmra.mrb[24].mxu0 %vm361_vm0, %v16531_v50 }
  0xe0   : > { %13649 = vmatprep.mubr.msk.bf16.mxu0 %vm361_vm0, %v16533_v61 }
  0xe7   : > { %13650 = vmatmul.mubr.msk.bf16.gmra.mrb[28].mxu0 %vm361_vm0, %v16539_v0 }
  0xe8   : > { %13661 = vmatprep.mubr.msk.bf16.mxu0 %vm361_vm0, %v16394_v31  ;;  %v15950_v31 = vld [vmem:[%s18550_s1 + $0x98] sm:$0xff]  }
  0xef   : > { %13662 = vmatmul.mubr.msk.bf16.vlgmr.msra.gmra.mrb[0].mxu0 %vm361_vm0, %v16399_v33 }
  0xf0   : > { %13694 = vmatpush3.bf16.msra.mxu0 %v15947_v5  ;;  %13665 = vmatprep.mubr.msk.bf16.mxu0 %vm361_vm0, %v16408_v41  ;;  %v15951_v5 = vld [vmem:[%s18550_s1 + $0xa0] sm:$0xff]  }
  0xf1   : > { %13695 = vmatprep.subr.bf16.mxu0 %v15948_v10 }
  0xf4   : > { %13696 = vmatpush3.bf16.msra.mxu0 %v15948_v10  ;;  %v2699_v10 = vpack.c.bf16 %v2673_v54, %v2672_v53 }
  0xf5   : > { %13697 = vmatprep.subr.bf16.mxu0 %v15949_v15 }
  0xf7   : > { %13666 = vmatmul.mubr.msk.bf16.gmra.mrb[4].mxu0 %vm361_vm0, %v16413_v43 }
  0xf8   : > { %13669 = vmatprep.mubr.msk.bf16.mxu0 %vm361_vm0, %v16422_v51  ;;  %13698 = vmatpush3.bf16.msra.mxu0 %v15949_v15  ;;  %v2700_v15 = vpack.c.bf16 %v2675_v63, %v2674_v62 }
  0xf9   : > { %13699 = vmatprep.subr.bf16.mxu0 %v15950_v31 }
  0xfc   : > { %13700 = vmatpush3.bf16.msra.mxu0 %v15950_v31  ;;  %v2676_v31 = vld [vmem:[#allocation2 + $0xd9] sm:$0xff] }
  0xfd   : > { %13733 = vmatprep.subr.bf16.mxu0 %v15951_v5 }
  0xff   : > { %13670 = vmatmul.mubr.msk.bf16.gmra.mrb[8].mxu0 %vm361_vm0, %v16424_v52 }
 0x100   : > { %13673 = vmatprep.mubr.msk.bf16.mxu0 %vm361_vm0, %v16430_v57 }
 0x107   : > { %13674 = vmatmul.mubr.msk.bf16.gmra.mrb[12].mxu0 %vm361_vm0, %v16432_v58 }
 0x108   : > { %13677 = vmatprep.mubr.msk.bf16.mxu0 %vm361_vm0, %v16438_v3 }
 0x10f   : > { %13678 = vmatmul.mubr.msk.bf16.gmra.mrb[16].mxu0 %vm361_vm0, %v16440_v4 }
 0x110   : > { %13681 = vmatprep.mubr.msk.bf16.mxu0 %vm361_vm0, %v16446_v11 }
 0x117   : > { %13682 = vmatmul.mubr.msk.bf16.gmra.mrb[20].mxu0 %vm361_vm0, %v16448_v12 }
 0x118   : > { %13685 = vmatprep.mubr.msk.bf16.mxu0 %vm361_vm0, %v16454_v21 }
 0x11f   : > { %13686 = vmatmul.mubr.msk.bf16.gmra.mrb[24].mxu0 %vm361_vm0, %v16456_v22 }
 0x120   : > { %13689 = vmatprep.mubr.msk.bf16.mxu0 %vm361_vm0, %v16466_v30 }
 0x127   : > { %13690 = vmatmul.mubr.msk.bf16.gmra.mrb[28].mxu0 %vm361_vm0, %v16585_v24 }
 0x128   : > { %13701 = vmatprep.mubr.msk.bf16.mxu0 %vm361_vm0, %v16309_v35  ;;  %v15954_v35 = vld [vmem:[%s18550_s1 + $0xb8] sm:$0xff]  }
 0x12f   : > { %13702 = vmatmul.mubr.msk.bf16.vlgmr.msra.gmra.mrb[0].mxu0 %vm361_vm0, %v16313_v39  ;;  %v15955_v39 = vld [vmem:[%s18550_s1 + $0xc0] sm:$0xff]  }
 0x130   : > { %13734 = vmatpush3.bf16.msra.mxu0 %v15951_v5  ;;  %13705 = vmatprep.mubr.msk.bf16.mxu0 %vm361_vm0, %v16323_v45  ;;  %v1725_v45 = vld [vmem:[#allocation2 + $0x181] sm:$0xff] }
 0x131   : > { %13735 = vmatprep.subr.bf16.mxu0 %v15952_v26  ;;  %v2677_v5 = vld [vmem:[#allocation2 + $0xe1] sm:$0xff] }
 0x134   : > { %13736 = vmatpush3.bf16.msra.mxu0 %v15952_v26  ;;  %v2702_v26 = vpack.c.bf16 %v2679_v17, %v2678_v16 }
 0x135   : > { %13737 = vmatprep.subr.bf16.mxu0 %v15953_v27 }
 0x137   : > { %13706 = vmatmul.mubr.msk.bf16.gmra.mrb[4].mxu0 %vm361_vm0, %v16325_v46  ;;  %v1726_v46 = vld [vmem:[#allocation2 + $0x189] sm:$0xff] }
 0x138   : > { %13709 = vmatprep.mubr.msk.bf16.mxu0 %vm361_vm0, %v16349_v59  ;;  %13738 = vmatpush3.bf16.msra.mxu0 %v15953_v27  ;;  %v16631_v59 = vpack.c.bf16 %v1726_v46, %v1725_v45  ;;  %v2680_v27 = vld [vmem:[#allocation2 + $0x109] sm:$0xff] }
 0x139   : > { %13739 = vmatprep.subr.bf16.mxu0 %v15954_v35  ;;  %v2683_v45 = vld [vmem:[#allocation2 + $0x129] sm:$0xff] }
 0x13c   : > { %13740 = vmatpush3.bf16.msra.mxu0 %v15954_v35  ;;  %v2681_v35 = vld [vmem:[#allocation2 + $0x111] sm:$0xff] }
 0x13d   : > { %13773 = vmatprep.subr.bf16.mxu0 %v15955_v39  ;;  %v2703_v46 = vpack.c.bf16 %v2681_v35, %v2680_v27 }
 0x13f   : > { %13710 = vmatmul.mubr.msk.bf16.gmra.mrb[8].mxu0 %vm361_vm0, %v16351_v60  ;;  %v15956_v60 = vld [vmem:[%s18550_s1 + $0xc8] sm:$0xff]  }
 0x140   : > { %13713 = vmatprep.mubr.msk.bf16.mxu0 %vm361_vm0, %v16357_v1  ;;  %v15957_v1 = vld [vmem:[%s18550_s1 + $0xd0] sm:$0xff]  }
 0x147   : > { %13714 = vmatmul.mubr.msk.bf16.gmra.mrb[12].mxu0 %vm361_vm0, %v16359_v2  ;;  %v15958_v2 = vld [vmem:[%s18550_s1 + $0xd8] sm:$0xff]  }
 0x148   : > { %13717 = vmatprep.mubr.msk.bf16.mxu0 %vm361_vm0, %v16365_v7  ;;  %v15959_v7 = vld [vmem:[%s18550_s1 + $0xe0] sm:$0xff]  }
 0x14f   : > { %13718 = vmatmul.mubr.msk.bf16.gmra.mrb[16].mxu0 %vm361_vm0, %v16367_v8  ;;  %v2047_v8 = vld [vmem:[#allocation2 + $0x182] sm:$0xff] }
 0x150   : > { %13721 = vmatprep.mubr.msk.bf16.mxu0 %vm361_vm0, %v16373_v13  ;;  %v2048_v13 = vld [vmem:[#allocation2 + $0x18a] sm:$0xff] }
 0x157   : > { %13722 = vmatmul.mubr.msk.bf16.gmra.mrb[20].mxu0 %vm361_vm0, %v16375_v14  ;;  %v16677_v14 = vpack.c.bf16 %v2048_v13, %v2047_v8  ;;  %v2687_v8 = vld [vmem:[#allocation2 + $0x159] sm:$0xff] }
 0x158   : > { %13725 = vmatprep.mubr.msk.bf16.mxu0 %vm361_vm0, %v16381_v19  ;;  %v15960_v19 = vld [vmem:[%s18550_s1 + $0xe8] sm:$0xff]  }
 0x15f   : > { %13726 = vmatmul.mubr.msk.bf16.gmra.mrb[24].mxu0 %vm361_vm0, %v16383_v20  ;;  %v15961_v20 = vld [vmem:[%s18550_s1 + $0xf0] sm:$0xff]  }
 0x160   : > { %13729 = vmatprep.mubr.msk.bf16.mxu0 %vm361_vm0, %v16389_v25  ;;  %v15962_v25 = vld [vmem:[%s18550_s1 + $0xf8] sm:$0xff]  }
 0x167   : > { %13730 = vmatmul.mubr.msk.bf16.gmra.mrb[28].mxu0 %vm361_vm0, %v16631_v59 }
 0x168   : > { %13741 = vmatprep.mubr.msk.bf16.mxu0 %vm361_vm0, %v16471_v40  ;;  %v2668_v40 = vld [vmem:[#allocation2 + $0x79] sm:$0xff] }
 0x169   : > { %v2697_v38 = vpack.c.bf16 %v2669_v28, %v2668_v40 }
 0x16f   : > { %13742 = vmatmul.mubr.msk.bf16.vlgmr.msra.gmra.mrb[0].mxu0 %vm361_vm0, %v16473_v42 }
 0x170   : > { %13774 = vmatpush3.bf16.msra.mxu0 %v15955_v39  ;;  %13745 = vmatprep.mubr.msk.bf16.mxu0 %vm361_vm0, %v16485_v55  ;;  %v2682_v39 = vld [vmem:[#allocation2 + $0x121] sm:$0xff] }
 0x171   : > { %13775 = vmatprep.subr.bf16.mxu0 %v15956_v60 }
 0x174   : > { %13776 = vmatpush3.bf16.msra.mxu0 %v15956_v60  ;;  %v2704_v60 = vpack.c.bf16 %v2683_v45, %v2682_v39 }
 0x175   : > { %13777 = vmatprep.subr.bf16.mxu0 %v15957_v1 }
 0x177   : > { %13746 = vmatmul.mubr.msk.bf16.gmra.mrb[4].mxu0 %vm361_vm0, %v16487_v56 }
 0x178   : > { %13749 = vmatprep.mubr.msk.bf16.mxu0 %vm361_vm0, %v16499_v6  ;;  %13778 = vmatpush3.bf16.msra.mxu0 %v15957_v1  ;;  %v2684_v1 = vld [vmem:[#allocation2 + $0x139] sm:$0xff] }
 0x179   : > { %13779 = vmatprep.subr.bf16.mxu0 %v15958_v2 }
 0x17c   : > { %13780 = vmatpush3.bf16.msra.mxu0 %v15958_v2  ;;  %v2685_v2 = vld [vmem:[#allocation2 + $0x141] sm:$0xff] }
 0x17d   : > { %13813 = vmatprep.subr.bf16.mxu0 %v15959_v7  ;;  %v2705_v13 = vpack.c.bf16 %v2685_v2, %v2684_v1 }
 0x17f   : > { %13750 = vmatmul.mubr.msk.bf16.gmra.mrb[8].mxu0 %vm361_vm0, %v16501_v9 }
 0x180   : > { %13753 = vmatprep.mubr.msk.bf16.mxu0 %vm361_vm0, %v16507_v18 }
 0x187   : > { %13754 = vmatmul.mubr.msk.bf16.gmra.mrb[12].mxu0 %vm361_vm0, %v16509_v23 }
 0x188   : > { %13757 = vmatprep.mubr.msk.bf16.mxu0 %vm361_vm0, %v16515_v29 }
 0x18f   : > { %13758 = vmatmul.mubr.msk.bf16.gmra.mrb[16].mxu0 %vm361_vm0, %v16517_v32 }
 0x190   : > { %13761 = vmatprep.mubr.msk.bf16.mxu0 %vm361_vm0, %v16523_v44 }
 0x197   : > { %13762 = vmatmul.mubr.msk.bf16.gmra.mrb[20].mxu0 %vm361_vm0, %v16525_v47 }
 0x198   : > { %13765 = vmatprep.mubr.msk.bf16.mxu0 %vm361_vm0, %v16531_v50 }
 0x19f   : > { %13766 = vmatmul.mubr.msk.bf16.gmra.mrb[24].mxu0 %vm361_vm0, %v16533_v61 }
 0x1a0   : > { %13769 = vmatprep.mubr.msk.bf16.mxu0 %vm361_vm0, %v16539_v0 }
 0x1a7   : > { %13770 = vmatmul.mubr.msk.bf16.gmra.mrb[28].mxu0 %vm361_vm0, %v16677_v14 }
 0x1a8   : > { %13781 = vmatprep.mubr.msk.bf16.mxu0 %vm361_vm0, %v16399_v33  ;;  %v15963_v33 = vld [vmem:[%s18550_s1 + $0x100] sm:$0xff]  }
 0x1af   : > { %13782 = vmatmul.mubr.msk.bf16.vlgmr.msra.gmra.mrb[0].mxu0 %vm361_vm0, %v16408_v41  ;;  %v2370_v41 = vld [vmem:[#allocation2 + $0x198] sm:$0xff] }
 0x1b0   : > { %13814 = vmatpush3.bf16.msra.mxu0 %v15959_v7  ;;  %13785 = vmatprep.mubr.msk.bf16.mxu0 %vm361_vm0, %v16413_v43  ;;  %v2371_v43 = vld [vmem:[#allocation2 + $0x1a0] sm:$0xff]  ;;  %v2686_v7 = vld [vmem:[#allocation2 + $0x151] sm:$0xff] }
 0x1b1   : > { %13815 = vmatprep.subr.bf16.mxu0 %v15960_v19 }
 0x1b4   : > { %13816 = vmatpush3.bf16.msra.mxu0 %v15960_v19  ;;  %v2706_v19 = vpack.c.bf16 %v2687_v8, %v2686_v7 }
 0x1b5   : > { %13817 = vmatprep.subr.bf16.mxu0 %v15961_v20 }
 0x1b7   : > { %13786 = vmatmul.mubr.msk.bf16.gmra.mrb[4].mxu0 %vm361_vm0, %v16422_v51  ;;  %v2662_v51 = vld [vmem:[#allocation2 + $0x31] sm:$0xff] }
 0x1b8   : > { %13789 = vmatprep.mubr.msk.bf16.mxu0 %vm361_vm0, %v16424_v52  ;;  %13818 = vmatpush3.bf16.msra.mxu0 %v15961_v20  ;;  %v2663_v52 = vld [vmem:[#allocation2 + $0x39] sm:$0xff]  ;;  %v2688_v20 = vld [vmem:[#allocation2 + $0x169] sm:$0xff] }
 0x1b9   : > { %13819 = vmatprep.subr.bf16.mxu0 %v15962_v25 }
 0x1bc   : > { %13820 = vmatpush3.bf16.msra.mxu0 %v15962_v25  ;;  %v2689_v25 = vld [vmem:[#allocation2 + $0x171] sm:$0xff] }
 0x1bd   : > { %13853 = vmatprep.subr.bf16.mxu0 %v15963_v33 }
 0x1bf   : > { %13790 = vmatmul.mubr.msk.bf16.gmra.mrb[8].mxu0 %vm361_vm0, %v16430_v57  ;;  %v2387_v57 = vpack.c.bf16 %v2371_v43, %v2370_v41  ;;  %v2692_v41 = vld [vmem:[#allocation2 + $0x199] sm:$0xff]  ;;  %v2693_v43 = vld [vmem:[#allocation2 + $0x1a1] sm:$0xff] }
 0x1c0   : > { %13793 = vmatprep.mubr.msk.bf16.mxu0 %vm361_vm0, %v16432_v58  ;;  %v2694_v58 = vpack.c.bf16 %v2663_v52, %v2662_v51  ;;  %v2709_v51 = vpack.c.bf16 %v2693_v43, %v2692_v41  ;;  %v16847_v43 = vld [vmem:[%s18551_s2 + $0x20] sm:$0xff]  }
 0x1c7   : > { %13794 = vmatmul.mubr.msk.bf16.gmra.mrb[12].mxu0 %vm361_vm0, %v16438_v3  ;;  %v2664_v3 = vld [vmem:[#allocation2 + $0x49] sm:$0xff] }
 0x1c8   : > { %13797 = vmatprep.mubr.msk.bf16.mxu0 %vm361_vm0, %v16440_v4  ;;  %v2665_v4 = vld [vmem:[#allocation2 + $0x51] sm:$0xff] }
 0x1cf   : > { %13798 = vmatmul.mubr.msk.bf16.gmra.mrb[16].mxu0 %vm361_vm0, %v16446_v11  ;;  %v2666_v11 = vld [vmem:[#allocation2 + $0x61] sm:$0xff] }
 0x1d0   : > { %13801 = vmatprep.mubr.msk.bf16.mxu0 %vm361_vm0, %v16448_v12  ;;  %v2667_v12 = vld [vmem:[#allocation2 + $0x69] sm:$0xff] }
 0x1d7   : > { %13802 = vmatmul.mubr.msk.bf16.gmra.mrb[20].mxu0 %vm361_vm0, %v16454_v21  ;;  %v2695_v21 = vpack.c.bf16 %v2665_v4, %v2664_v3 }
 0x1d8   : > { %13805 = vmatprep.mubr.msk.bf16.mxu0 %vm361_vm0, %v16456_v22  ;;  %v2696_v22 = vpack.c.bf16 %v2667_v12, %v2666_v11 }
 0x1df   : > { %13806 = vmatmul.mubr.msk.bf16.gmra.mrb[24].mxu0 %vm361_vm0, %v16466_v30  ;;  %v15964_v30 = vld [vmem:[%s18550_s1 + $0x108] sm:$0xff]  }
 0x1e0   : > { %13809 = vmatprep.mubr.msk.bf16.mxu0 %vm361_vm0, %v16585_v24  ;;  %v2701_v24 = vpack.c.bf16 %v2677_v5, %v2676_v31 }
 0x1e7   : > { %13810 = vmatmul.mubr.msk.bf16.gmra.mrb[28].mxu0 %vm361_vm0, %v2387_v57 }
 0x1e8   : > { %13821 = vmatprep.mubr.msk.bf16.mxu0 %vm361_vm0, %v2694_v58 }
 0x1ef   : > { %13822 = vmatmul.mubr.msk.bf16.vlgmr.msra.gmra.mrb[0].mxu0 %vm361_vm0, %v2695_v21 }
 0x1f0   : > { %13854 = vmatpush3.bf16.msra.mxu0 %v15963_v33  ;;  %13825 = vmatprep.mubr.msk.bf16.mxu0 %vm361_vm0, %v2696_v22  ;;  %v2707_v33 = vpack.c.bf16 %v2689_v25, %v2688_v20 }
 0x1f1   : > { %13855 = vmatprep.subr.bf16.mxu0 %v15964_v30 }
 0x1f4   : > { %13856 = vmatpush3.bf16.msra.mxu0 %v15964_v30 }
 0x1f5   : > { %13857 = vmatprep.subr.bf16.mxu0 %v15965_v37 }
 0x1f7   : > { %13826 = vmatmul.mubr.msk.bf16.gmra.mrb[4].mxu0 %vm361_vm0, %v2697_v38 }
 0x1f8   : > { %13829 = vmatprep.mubr.msk.bf16.mxu0 %vm361_vm0, %v2698_v48  ;;  %13858 = vmatpush3.bf16.msra.mxu0 %v15965_v37 }
 0x1f9   : > { %13859 = vmatprep.subr.bf16.mxu0 %v15966_v49 }
 0x1fc   : > { %13860 = vmatpush3.bf16.msra.mxu0 %v15966_v49 }
 0x1ff   : > { %13830 = vmatmul.mubr.msk.bf16.gmra.mrb[8].mxu0 %vm361_vm0, %v2699_v10 }
 0x200   : > { %13833 = vmatprep.mubr.msk.bf16.mxu0 %vm361_vm0, %v2700_v15 }
 0x207   : > { %13834 = vmatmul.mubr.msk.bf16.gmra.mrb[12].mxu0 %vm361_vm0, %v2701_v24 }
 0x208   : > { %13837 = vmatprep.mubr.msk.bf16.mxu0 %vm361_vm0, %v2702_v26 }
 0x20f   : > { %13838 = vmatmul.mubr.msk.bf16.gmra.mrb[16].mxu0 %vm361_vm0, %v2703_v46 }
 0x210   : > { %13841 = vmatprep.mubr.msk.bf16.mxu0 %vm361_vm0, %v2704_v60  ;;  %v15970_v60 = vld [vmem:[%s18551_s2 + $0x8] sm:$0xff]  }
 0x217   : > { %13842 = vmatmul.mubr.msk.bf16.gmra.mrb[20].mxu0 %vm361_vm0, %v2705_v13 }
 0x218   : > { %13845 = vmatprep.mubr.msk.bf16.mxu0 %vm361_vm0, %v2706_v19 }
 0x21f   : > { %13846 = vmatmul.mubr.msk.bf16.gmra.mrb[24].mxu0 %vm361_vm0, %v2707_v33 }
 0x220   : > { %13849 = vmatprep.mubr.msk.bf16.mxu0 %vm361_vm0, %v16631_v59 }
 0x227   : > { %13850 = vmatmul.mubr.msk.bf16.gmra.mrb[28].mxu0 %vm361_vm0, %v2709_v51 }
 0x228   : > { %13861 = vmatprep.mubr.msk.bf16.mxu0 %vm361_vm0, %v16473_v42  ;;  %v3014_v42 = vld [vmem:[#allocation2 + $0x19a] sm:$0xff] }
 0x22f   : > { %13862 = vmatmul.mubr.msk.bf16.vlgmr.msra.gmra.mrb[0].mxu0 %vm361_vm0, %v16485_v55  ;;  %v3015_v55 = vld [vmem:[#allocation2 + $0x1a2] sm:$0xff] }
 0x230   : > { %13865 = vmatprep.mubr.msk.bf16.mxu0 %vm361_vm0, %v16487_v56  ;;  %v3031_v56 = vpack.c.bf16 %v3015_v55, %v3014_v42 }
 0x237   : > { %13866 = vmatmul.mubr.msk.bf16.gmra.mrb[4].mxu0 %vm361_vm0, %v16499_v6  ;;  %v15967_v6 = vld [vmem:[%s18551_s2 + $0x10] sm:$0xff]  }
 0x238   : > { %13869 = vmatprep.mubr.msk.bf16.mxu0 %vm361_vm0, %v16501_v9  ;;  %13893 = vmatprep.subr.bf16.mxu1 %v15967_v6  ;;  %v15968_v9 = vld [vmem:[%s18551_s2 + $0x18] sm:$0xff]  }
 0x239   : > { %13894 = vmatpush3.bf16.msra.mxu1 %v15967_v6 }
 0x23a   : > { %13895 = vmatprep.subr.bf16.mxu1 %v15968_v9 }
 0x23d   : > { %13896 = vmatpush3.bf16.msra.mxu1 %v15968_v9 }
 0x23f   : > { %13870 = vmatmul.mubr.msk.bf16.gmra.mrb[8].mxu0 %vm361_vm0, %v16507_v18  ;;  %v3527_v18 = vld [vmem:[#allocation2 + $0x1] sm:$0xff] }
 0x240   : > { %13873 = vmatprep.mubr.msk.bf16.mxu0 %vm361_vm0, %v16509_v23  ;;  %v3528_v23 = vld [vmem:[#allocation2 + $0x9] sm:$0xff] }
 0x247   : > { %13874 = vmatmul.mubr.msk.bf16.gmra.mrb[12].mxu0 %vm361_vm0, %v16515_v29  ;;  %v3559_v29 = vpack.c.bf16 %v3528_v23, %v3527_v18 }
 0x248   : > { %13877 = vmatprep.mubr.msk.bf16.mxu0 %vm361_vm0, %v16517_v32  ;;  %v16791_v32 = vld [vmem:[%s18551_s2] sm:$0xff]  }
 0x249   : > { %13897 = vmatprep.mubr.msk.bf16.mxu1 %vm3442_vm3, %v3559_v29  ;;  %13929 = vmatprep.subr.bf16.mxu1 %v16791_v32 }
 0x24f   : > { %13878 = vmatmul.mubr.msk.bf16.gmra.mrb[16].mxu0 %vm361_vm0, %v16523_v44  ;;  %v16797_v44 = vld [vmem:[%s18554_s5] ss:$0 sm:$0xff] }
 0x250   : > { %13881 = vmatprep.mubr.msk.bf16.mxu0 %vm361_vm0, %v16525_v47 }
 0x257   : > { %13882 = vmatmul.mubr.msk.bf16.gmra.mrb[20].mxu0 %vm361_vm0, %v16531_v50  ;;  %v16799_v50 = vstv %s360_s22  ;;  %s16086_s22 = smov [#allocation4]  }
 0x258   : > { %13885 = vmatprep.mubr.msk.bf16.mxu0 %vm361_vm0, %v16533_v61  ;;  %s16025_s28 = sshll.u32 %s16086_s22, 4  ;;  %s16026_s28 = int_to_ptr.vmem [resolvable:$false] %s16025_s28 }
 0x259   : > { %s16027_s29 = scalar_lea.vmem %s16026_s28, 8192  ;;  %p16028_p0 = scmp.lt.s32.totalorder %s18497_s13, %s16026_s28 }
 0x25a   : > { %p16029_p1 = scmp.lt.s32.totalorder %s16027_s29, %s16021_s21 }
 0x25c   : > { %p16030_p2 = por %p16029_p1, %p16028_p0 }
 0x25e   : > { %p16031_p3 = pnand %p16030_p2, %p16024_p13 }
 0x25f   : > { %13886 = vmatmul.mubr.msk.bf16.gmra.mrb[24].mxu0 %vm361_vm0, %v16539_v0 }
 0x260   : > { %13889 = vmatprep.mubr.msk.bf16.mxu0 %vm361_vm0, %v16677_v14 }
 0x267   : > { %13890 = vmatmul.mubr.msk.bf16.gmra.mrb[28].mxu0 %vm361_vm0, %v3031_v56 }
 0x302   : > { %v13863_v47 = vpop.f32.mrb[0].mxu0 }
 0x303   : > { %v3315_v61 = vadd.f32 %v13863_v47, %v16797_v44  ;;  %v3147_v0 = vpop.f32.mrb[1].mxu0 }
 0x304   : > { %v3313_v59 = vadd.f32 %v16797_v44, %v3147_v0  ;;  %v13864_v14 = vpop.f32.mrb[2].mxu0 }
 0x305   : > { %vm3347_vm4 = vcmp.ge.f32.partialorder %v3315_v61, 0.0  ;;  %v3380_v52 = vmul.f32 %v16799_v50, %v3315_v61  ;;  %v3316_v57 = vadd.f32 %v13864_v14, %v16797_v44  ;;  %v3150_v58 = vpop.f32.mrb[3].mxu0 }
 0x306   : > { %vm3345_vm5 = vcmp.ge.f32.partialorder %v3313_v59, 0.0  ;;  %v3378_v3 = vmul.f32 %v16799_v50, %v3313_v59  ;;  %v3314_v4 = vadd.f32 %v16797_v44, %v3150_v58 }
 0x307   : > { %v3412_v11 = vsel %vm3347_vm4, %v3315_v61, %v3380_v52  ;;  %vm3348_vm6 = vcmp.ge.f32.partialorder %v3316_v57, 0.0  ;;  %v3381_v12 = vmul.f32 %v16799_v50, %v3316_v57 }
 0x308   : > { %v3410_v21 = vsel %vm3345_vm5, %v3313_v59, %v3378_v3  ;;  %3445 = vst.msk [vmem:[#allocation2 + $0x31] sm:$0xff] %vm3442_vm3, %v3412_v11  ;;  %vm3346_vm7 = vcmp.ge.f32.partialorder %v3314_v4, 0.0  ;;  %v3379_v22 = vmul.f32 %v16799_v50, %v3314_v4 }
 0x309   : > { %3443 = vst.msk [vmem:[#allocation2 + $0x19] sm:$0xff] %vm3442_vm3, %v3410_v21  ;;  %v3413_v30 = vsel %vm3348_vm6, %v3316_v57, %v3381_v12 }
 0x30a   : > { %3446 = vst.msk [vmem:[#allocation2 + $0x39] sm:$0xff] %vm3442_vm3, %v3413_v30  ;;  %v3411_v40 = vsel %vm3346_vm7, %v3314_v4, %v3379_v22  ;;  %v13867_v28 = vpop.f32.mrb[4].mxu0 }
 0x30b   : > { %3444 = vst.msk [vmem:[#allocation2 + $0x21] sm:$0xff] %vm3442_vm3, %v3411_v40  ;;  %v3319_v34 = vadd.f32 %v13867_v28, %v16797_v44  ;;  %v3163_v36 = vpop.f32.mrb[5].mxu0 }
 0x30c   : > { %v3317_v37 = vadd.f32 %v16797_v44, %v3163_v36  ;;  %v13868_v38 = vpop.f32.mrb[6].mxu0 }
 0x30d   : > { %vm3351_vm8 = vcmp.ge.f32.partialorder %v3319_v34, 0.0  ;;  %v3384_v48 = vmul.f32 %v16799_v50, %v3319_v34  ;;  %v3320_v49 = vadd.f32 %v13868_v38, %v16797_v44  ;;  %v3166_v53 = vpop.f32.mrb[7].mxu0 }
 0x30e   : > { %vm3349_vm9 = vcmp.ge.f32.partialorder %v3317_v37, 0.0  ;;  %v3382_v54 = vmul.f32 %v16799_v50, %v3317_v37  ;;  %v3318_v62 = vadd.f32 %v16797_v44, %v3166_v53 }
 0x30f   : > { %v3416_v63 = vsel %vm3351_vm8, %v3319_v34, %v3384_v48  ;;  %vm3352_vm10 = vcmp.ge.f32.partialorder %v3320_v49, 0.0  ;;  %v3385_v10 = vmul.f32 %v16799_v50, %v3320_v49  ;;  %v3531_v46 = vld [vmem:[#allocation2 + $0x31] sm:$0xff] }
 0x310   : > { %3449 = vst.msk [vmem:[#allocation2 + $0x61] sm:$0xff] %vm3442_vm3, %v3416_v63  ;;  %v3414_v15 = vsel %vm3349_vm9, %v3317_v37, %v3382_v54  ;;  %vm3350_vm11 = vcmp.ge.f32.partialorder %v3318_v62, 0.0  ;;  %v3383_v31 = vmul.f32 %v16799_v50, %v3318_v62  ;;  %v3529_v26 = vld [vmem:[#allocation2 + $0x19] sm:$0xff] }
 0x311   : > { %3447 = vst.msk [vmem:[#allocation2 + $0x49] sm:$0xff] %vm3442_vm3, %v3414_v15  ;;  %v3417_v5 = vsel %vm3352_vm10, %v3320_v49, %v3385_v10  ;;  %v3532_v16 = vld [vmem:[#allocation2 + $0x39] sm:$0xff] }
 0x312   : > { %3450 = vst.msk [vmem:[#allocation2 + $0x69] sm:$0xff] %vm3442_vm3, %v3417_v5  ;;  %v3415_v17 = vsel %vm3350_vm11, %v3318_v62, %v3383_v31  ;;  %v13871_v24 = vpop.f32.mrb[8].mxu0  ;;  %v3530_v27 = vld [vmem:[#allocation2 + $0x21] sm:$0xff]  ;;  %v16832_v7 = vpack.c.bf16 %v3532_v16, %v3531_v46 }
 0x313   : > { %3448 = vst.msk [vmem:[#allocation2 + $0x51] sm:$0xff] %vm3442_vm3, %v3415_v17  ;;  %v3323_v35 = vadd.f32 %v13871_v24, %v16797_v44  ;;  %v3179_v39 = vpop.f32.mrb[9].mxu0  ;;  %v16826_v45 = vpack.c.bf16 %v3530_v27, %v3529_v26 }
 0x314   : > { %v3321_v1 = vadd.f32 %v16797_v44, %v3179_v39  ;;  %v13872_v2 = vpop.f32.mrb[10].mxu0 }
 0x315   : > { %vm3355_vm12 = vcmp.ge.f32.partialorder %v3323_v35, 0.0  ;;  %v3388_v8 = vmul.f32 %v16799_v50, %v3323_v35  ;;  %v3324_v13 = vadd.f32 %v13872_v2, %v16797_v44  ;;  %v3182_v19 = vpop.f32.mrb[11].mxu0  ;;  %13898 = vmatmul.mubr.msk.bf16.vlgmr.msra.gmra.mrb[0].mxu1 %vm3442_vm3, %v16826_v45 }
 0x316   : > { %vm3353_vm13 = vcmp.ge.f32.partialorder %v3321_v1, 0.0  ;;  %v3386_v20 = vmul.f32 %v16799_v50, %v3321_v1  ;;  %v3322_v25 = vadd.f32 %v16797_v44, %v3182_v19  ;;  %13901 = vmatprep.mubr.msk.bf16.mxu1 %vm3442_vm3, %v16832_v7  ;;  %13930 = vmatpush3.bf16.msra.mxu1 %v16791_v32 }
 0x317   : > { %v3420_v33 = vsel %vm3355_vm12, %v3323_v35, %v3388_v8  ;;  %vm3356_vm14 = vcmp.ge.f32.partialorder %v3324_v13, 0.0  ;;  %v3389_v41 = vmul.f32 %v16799_v50, %v3324_v13  ;;  %13931 = vmatprep.subr.bf16.mxu1 %v15970_v60  ;;  %v3535_v61 = vld [vmem:[#allocation2 + $0x61] sm:$0xff] }
 0x318   : > { %3453 = vst.msk [vmem:[#allocation2 + $0x91] sm:$0xff] %vm3442_vm3, %v3420_v33  ;;  %v3418_v51 = vsel %vm3353_vm13, %v3321_v1, %v3386_v20  ;;  %vm3354_vm15 = vcmp.ge.f32.partialorder %v3322_v25, 0.0  ;;  %v3387_v42 = vmul.f32 %v16799_v50, %v3322_v25  ;;  %v3533_v18 = vld [vmem:[#allocation2 + $0x49] sm:$0xff] }
 0x319   : > { %3451 = vst.msk [vmem:[#allocation2 + $0x79] sm:$0xff] %vm3442_vm3, %v3418_v51  ;;  %v3421_v55 = vsel %vm3356_vm14, %v3324_v13, %v3389_v41  ;;  %v3536_v56 = vld [vmem:[#allocation2 + $0x69] sm:$0xff] }
 0x31a   : > { %3454 = vst.msk [vmem:[#allocation2 + $0x99] sm:$0xff] %vm3442_vm3, %v3421_v55  ;;  %v3419_v6 = vsel %vm3354_vm15, %v3322_v25, %v3387_v42  ;;  %v13875_v9 = vpop.f32.mrb[12].mxu0  ;;  %v3534_v23 = vld [vmem:[#allocation2 + $0x51] sm:$0xff]  ;;  %13932 = vmatpush3.bf16.msra.mxu1 %v15970_v60  ;;  %v16859_v14 = vpack.c.bf16 %v3536_v56, %v3535_v61 }
 0x31b   : > { %3452 = vst.msk [vmem:[#allocation2 + $0x81] sm:$0xff] %vm3442_vm3, %v3419_v6  ;;  %v3327_v29 = vadd.f32 %v13875_v9, %v16797_v44  ;;  %v3195_v32 = vpop.f32.mrb[13].mxu0  ;;  %v16855_v47 = vpack.c.bf16 %v3534_v23, %v3533_v18  ;;  %13965 = vmatprep.subr.bf16.mxu1 %v16847_v43 }
 0x31c   : > { %v3325_v0 = vadd.f32 %v16797_v44, %v3195_v32  ;;  %v13876_v59 = vpop.f32.mrb[14].mxu0 }
 0x31d   : > { %vm3359_vm1 = vcmp.ge.f32.partialorder %v3327_v29, 0.0  ;;  %v3392_v52 = vmul.f32 %v16799_v50, %v3327_v29  ;;  %v3328_v57 = vadd.f32 %v13876_v59, %v16797_v44  ;;  %v3198_v58 = vpop.f32.mrb[15].mxu0  ;;  %13902 = vmatmul.mubr.msk.bf16.gmra.mrb[4].mxu1 %vm3442_vm3, %v16855_v47 }
 0x31e   : > { %vm3357_vm2 = vcmp.ge.f32.partialorder %v3325_v0, 0.0  ;;  %v3390_v3 = vmul.f32 %v16799_v50, %v3325_v0  ;;  %v3326_v4 = vadd.f32 %v16797_v44, %v3198_v58  ;;  %13905 = vmatprep.mubr.msk.bf16.mxu1 %vm3442_vm3, %v16859_v14 }
 0x31f   : > { %v3424_v11 = vsel %vm3359_vm1, %v3327_v29, %v3392_v52  ;;  %vm3360_vm4 = vcmp.ge.f32.partialorder %v3328_v57, 0.0  ;;  %v3393_v12 = vmul.f32 %v16799_v50, %v3328_v57  ;;  %v3539_v53 = vld [vmem:[#allocation2 + $0x91] sm:$0xff] }
 0x320   : > { %3457 = vst.msk [vmem:[#allocation2 + $0xc1] sm:$0xff] %vm3442_vm3, %v3424_v11  ;;  %v3422_v21 = vsel %vm3357_vm2, %v3325_v0, %v3390_v3  ;;  %vm3358_vm5 = vcmp.ge.f32.partialorder %v3326_v4, 0.0  ;;  %v3391_v22 = vmul.f32 %v16799_v50, %v3326_v4  ;;  %v3537_v36 = vld [vmem:[#allocation2 + $0x79] sm:$0xff] }
 0x321   : > { %3455 = vst.msk [vmem:[#allocation2 + $0xa9] sm:$0xff] %vm3442_vm3, %v3422_v21  ;;  %v3425_v30 = vsel %vm3360_vm4, %v3328_v57, %v3393_v12  ;;  %v3540_v40 = vld [vmem:[#allocation2 + $0x99] sm:$0xff] }
 0x322   : > { %3458 = vst.msk [vmem:[#allocation2 + $0xc9] sm:$0xff] %vm3442_vm3, %v3425_v30  ;;  %v3423_v28 = vsel %vm3358_vm5, %v3326_v4, %v3391_v22  ;;  %v13879_v34 = vpop.f32.mrb[16].mxu0  ;;  %v3538_v37 = vld [vmem:[#allocation2 + $0x81] sm:$0xff]  ;;  %v16879_v63 = vpack.c.bf16 %v3540_v40, %v3539_v53 }
 0x323   : > { %3456 = vst.msk [vmem:[#allocation2 + $0xb1] sm:$0xff] %vm3442_vm3, %v3423_v28  ;;  %v3331_v38 = vadd.f32 %v13879_v34, %v16797_v44  ;;  %v3211_v48 = vpop.f32.mrb[17].mxu0  ;;  %v16876_v49 = vpack.c.bf16 %v3538_v37, %v3537_v36 }
 0x324   : > { %v3329_v54 = vadd.f32 %v16797_v44, %v3211_v48  ;;  %v13880_v62 = vpop.f32.mrb[18].mxu0 }
 0x325   : > { %vm3363_vm6 = vcmp.ge.f32.partialorder %v3331_v38, 0.0  ;;  %v3396_v10 = vmul.f32 %v16799_v50, %v3331_v38  ;;  %v3332_v15 = vadd.f32 %v13880_v62, %v16797_v44  ;;  %v3214_v31 = vpop.f32.mrb[19].mxu0  ;;  %13906 = vmatmul.mubr.msk.bf16.gmra.mrb[8].mxu1 %vm3442_vm3, %v16876_v49 }
 0x326   : > { %vm3361_vm7 = vcmp.ge.f32.partialorder %v3329_v54, 0.0  ;;  %v3394_v5 = vmul.f32 %v16799_v50, %v3329_v54  ;;  %v3330_v16 = vadd.f32 %v16797_v44, %v3214_v31  ;;  %13909 = vmatprep.mubr.msk.bf16.mxu1 %vm3442_vm3, %v16879_v63 }
 0x327   : > { %v3428_v17 = vsel %vm3363_vm6, %v3331_v38, %v3396_v10  ;;  %vm3364_vm8 = vcmp.ge.f32.partialorder %v3332_v15, 0.0  ;;  %v3397_v24 = vmul.f32 %v16799_v50, %v3332_v15  ;;  %v3543_v20 = vld [vmem:[#allocation2 + $0xc1] sm:$0xff] }
 0x328   : > { %3461 = vst.msk [vmem:[#allocation2 + $0xf1] sm:$0xff] %vm3442_vm3, %v3428_v17  ;;  %v3426_v26 = vsel %vm3361_vm7, %v3329_v54, %v3394_v5  ;;  %vm3362_vm9 = vcmp.ge.f32.partialorder %v3330_v16, 0.0  ;;  %v3395_v27 = vmul.f32 %v16799_v50, %v3330_v16  ;;  %v3541_v1 = vld [vmem:[#allocation2 + $0xa9] sm:$0xff] }
 0x329   : > { %3459 = vst.msk [vmem:[#allocation2 + $0xd9] sm:$0xff] %vm3442_vm3, %v3426_v26  ;;  %v3429_v35 = vsel %vm3364_vm8, %v3332_v15, %v3397_v24  ;;  %v3544_v39 = vld [vmem:[#allocation2 + $0xc9] sm:$0xff] }
 0x32a   : > { %3462 = vst.msk [vmem:[#allocation2 + $0xf9] sm:$0xff] %vm3442_vm3, %v3429_v35  ;;  %v3427_v46 = vsel %vm3362_vm9, %v3330_v16, %v3395_v27  ;;  %v13883_v60 = vpop.f32.mrb[20].mxu0  ;;  %v3542_v2 = vld [vmem:[#allocation2 + $0xb1] sm:$0xff]  ;;  %v16899_v41 = vpack.c.bf16 %v3544_v39, %v3543_v20 }
 0x32b   : > { %3460 = vst.msk [vmem:[#allocation2 + $0xe1] sm:$0xff] %vm3442_vm3, %v3427_v46  ;;  %v3335_v8 = vadd.f32 %v13883_v60, %v16797_v44  ;;  %v3227_v13 = vpop.f32.mrb[21].mxu0  ;;  %v16896_v19 = vpack.c.bf16 %v3542_v2, %v3541_v1 }
 0x32c   : > { %v3333_v25 = vadd.f32 %v16797_v44, %v3227_v13  ;;  %v13884_v33 = vpop.f32.mrb[22].mxu0 }
 0x32d   : > { %vm3367_vm10 = vcmp.ge.f32.partialorder %v3335_v8, 0.0  ;;  %v3400_v51 = vmul.f32 %v16799_v50, %v3335_v8  ;;  %v3336_v42 = vadd.f32 %v13884_v33, %v16797_v44  ;;  %v3230_v55 = vpop.f32.mrb[23].mxu0  ;;  %13910 = vmatmul.mubr.msk.bf16.gmra.mrb[12].mxu1 %vm3442_vm3, %v16896_v19 }
 0x32e   : > { %vm3365_vm11 = vcmp.ge.f32.partialorder %v3333_v25, 0.0  ;;  %v3398_v56 = vmul.f32 %v16799_v50, %v3333_v25  ;;  %v3334_v6 = vadd.f32 %v16797_v44, %v3230_v55  ;;  %13913 = vmatprep.mubr.msk.bf16.mxu1 %vm3442_vm3, %v16899_v41 }
 0x32f   : > { %v3432_v9 = vsel %vm3367_vm10, %v3335_v8, %v3400_v51  ;;  %vm3368_vm12 = vcmp.ge.f32.partialorder %v3336_v42, 0.0  ;;  %v3401_v18 = vmul.f32 %v16799_v50, %v3336_v42  ;;  %v3547_v11 = vld [vmem:[#allocation2 + $0xf1] sm:$0xff] }
 0x330   : > { %3465 = vst.msk [vmem:[#allocation2 + $0x121] sm:$0xff] %vm3442_vm3, %v3432_v9  ;;  %v3430_v23 = vsel %vm3365_vm11, %v3333_v25, %v3398_v56  ;;  %vm3366_vm13 = vcmp.ge.f32.partialorder %v3334_v6, 0.0  ;;  %v3399_v29 = vmul.f32 %v16799_v50, %v3334_v6  ;;  %v3545_v52 = vld [vmem:[#allocation2 + $0xd9] sm:$0xff] }
 0x331   : > { %3463 = vst.msk [vmem:[#allocation2 + $0x109] sm:$0xff] %vm3442_vm3, %v3430_v23  ;;  %v3433_v32 = vsel %vm3368_vm12, %v3336_v42, %v3401_v18  ;;  %v3548_v61 = vld [vmem:[#allocation2 + $0xf9] sm:$0xff] }
 0x332   : > { %3466 = vst.msk [vmem:[#allocation2 + $0x129] sm:$0xff] %vm3442_vm3, %v3433_v32  ;;  %v3431_v0 = vsel %vm3366_vm13, %v3334_v6, %v3399_v29  ;;  %v13887_v59 = vpop.f32.mrb[24].mxu0  ;;  %v3546_v57 = vld [vmem:[#allocation2 + $0xe1] sm:$0xff]  ;;  %v16919_v22 = vpack.c.bf16 %v3548_v61, %v3547_v11  ;;  %v3479_v11 = vld [vmem:[#allocation2 + $0x30] sm:$0xff] }
 0x333   : > { %3464 = vst.msk [vmem:[#allocation2 + $0x111] sm:$0xff] %vm3442_vm3, %v3431_v0  ;;  %v3339_v58 = vadd.f32 %v13887_v59, %v16797_v44  ;;  %v3243_v3 = vpop.f32.mrb[25].mxu0  ;;  %v16916_v4 = vpack.c.bf16 %v3546_v57, %v3545_v52  ;;  %v3475_v23 = vld [vmem:[#allocation2] sm:$0xff]  ;;  %v3476_v29 = vld [vmem:[#allocation2 + $0x8] sm:$0xff]  ;;  %v3480_v57 = vld [vmem:[#allocation2 + $0x38] sm:$0xff] }
 0x334   : > { %v3337_v12 = vadd.f32 %v16797_v44, %v3243_v3  ;;  %v13888_v21 = vpop.f32.mrb[26].mxu0  ;;  %v3507_v0 = vpack.c.bf16 %v3476_v29, %v3475_v23  ;;  %v3478_v52 = vld [vmem:[#allocation2 + $0x20] sm:$0xff] }
 0x335   : > { %vm3371_vm14 = vcmp.ge.f32.partialorder %v3339_v58, 0.0  ;;  %v3404_v30 = vmul.f32 %v16799_v50, %v3339_v58  ;;  %v3340_v40 = vadd.f32 %v13888_v21, %v16797_v44  ;;  %v3246_v28 = vpop.f32.mrb[27].mxu0  ;;  %13914 = vmatmul.mubr.msk.bf16.gmra.mrb[16].mxu1 %vm3442_vm3, %v16916_v4  ;;  %v16973_v21 = vpack.c.bf16 %v3480_v57, %v3479_v11  ;;  %v4022_v29 = vld [vmem:[#allocation2 + $0x2] sm:$0xff] }
 0x336   : > { %vm3369_vm15 = vcmp.ge.f32.partialorder %v3337_v12, 0.0  ;;  %v3402_v34 = vmul.f32 %v16799_v50, %v3337_v12  ;;  %v3338_v36 = vadd.f32 %v16797_v44, %v3246_v28  ;;  %13917 = vmatprep.mubr.msk.bf16.mxu1 %vm3442_vm3, %v16919_v22  ;;  %v3484_v28 = vld [vmem:[#allocation2 + $0x68] sm:$0xff] }
 0x337   : > { %v3436_v37 = vsel %vm3371_vm14, %v3339_v58, %v3404_v30  ;;  %vm3372_vm1 = vcmp.ge.f32.partialorder %v3340_v40, 0.0  ;;  %v3405_v38 = vmul.f32 %v16799_v50, %v3340_v40  ;;  %v3551_v26 = vld [vmem:[#allocation2 + $0x121] sm:$0xff]  ;;  %v3477_v58 = vld [vmem:[#allocation2 + $0x18] sm:$0xff]  ;;  %v16983_v30 = vld [vmem:[%s18551_s2 + $0x30] sm:$0xff]  }
 0x338   : > { %3469 = vst.msk [vmem:[#allocation2 + $0x151] sm:$0xff] %vm3442_vm3, %v3436_v37  ;;  %v3434_v48 = vsel %vm3369_vm15, %v3337_v12, %v3402_v34  ;;  %vm3370_vm2 = vcmp.ge.f32.partialorder %v3338_v36, 0.0  ;;  %v3403_v53 = vmul.f32 %v16799_v50, %v3338_v36  ;;  %v3549_v31 = vld [vmem:[#allocation2 + $0x109] sm:$0xff]  ;;  %v16968_v3 = vpack.c.bf16 %v3478_v52, %v3477_v58  ;;  %v3483_v37 = vld [vmem:[#allocation2 + $0x60] sm:$0xff] }
 0x339   : > { %3467 = vst.msk [vmem:[#allocation2 + $0x139] sm:$0xff] %vm3442_vm3, %v3434_v48  ;;  %v3437_v54 = vsel %vm3372_vm1, %v3340_v40, %v3405_v38  ;;  %v3552_v62 = vld [vmem:[#allocation2 + $0x129] sm:$0xff]  ;;  %v16988_v38 = vpack.c.bf16 %v3484_v28, %v3483_v37  ;;  %v3488_v48 = vld [vmem:[#allocation2 + $0x98] sm:$0xff] }
 0x33a   : > { %3470 = vst.msk [vmem:[#allocation2 + $0x159] sm:$0xff] %vm3442_vm3, %v3437_v54  ;;  %v3435_v10 = vsel %vm3370_vm2, %v3338_v36, %v3403_v53  ;;  %v13891_v15 = vpop.f32.mrb[28].mxu0  ;;  %v3550_v5 = vld [vmem:[#allocation2 + $0x111] sm:$0xff]  ;;  %v16939_v39 = vpack.c.bf16 %v3552_v62, %v3551_v26  ;;  %v15972_v12 = vld [vmem:[%s18551_s2 + $0x28] sm:$0xff]   ;;  %v4024_v58 = vld [vmem:[#allocation2 + $0x1a] sm:$0xff] }
 0x33b   : > { %3468 = vst.msk [vmem:[#allocation2 + $0x141] sm:$0xff] %vm3442_vm3, %v3435_v10  ;;  %v3343_v16 = vadd.f32 %v13891_v15, %v16797_v44  ;;  %v3259_v17 = vpop.f32.mrb[29].mxu0  ;;  %v16936_v24 = vpack.c.bf16 %v3550_v5, %v3549_v31  ;;  %v3482_v40 = vld [vmem:[#allocation2 + $0x50] sm:$0xff]  ;;  %v3481_v34 = vld [vmem:[#allocation2 + $0x48] sm:$0xff]  ;;  %v3485_v53 = vld [vmem:[#allocation2 + $0x78] sm:$0xff] }
 0x33c   : > { %v3341_v27 = vadd.f32 %v16797_v44, %v3259_v17  ;;  %v13892_v35 = vpop.f32.mrb[30].mxu0  ;;  %v16985_v36 = vpack.c.bf16 %v3482_v40, %v3481_v34  ;;  %v3487_v62 = vld [vmem:[#allocation2 + $0x90] sm:$0xff]  ;;  %v3492_v31 = vld [vmem:[#allocation2 + $0xc8] sm:$0xff]  ;;  %v3491_v17 = vld [vmem:[#allocation2 + $0xc0] sm:$0xff] }
 0x33d   : > { %vm3375_vm4 = vcmp.ge.f32.partialorder %v3343_v16, 0.0  ;;  %v3408_v46 = vmul.f32 %v16799_v50, %v3343_v16  ;;  %v3344_v60 = vadd.f32 %v13892_v35, %v16797_v44  ;;  %v3262_v1 = vpop.f32.mrb[31].mxu0  ;;  %13918 = vmatmul.mubr.msk.bf16.gmra.mrb[20].mxu1 %vm3442_vm3, %v16936_v24  ;;  %v16996_v10 = vpack.c.bf16 %v3488_v48, %v3487_v62  ;;  %v3490_v15 = vld [vmem:[#allocation2 + $0xb0] sm:$0xff]  ;;  %v3489_v5 = vld [vmem:[#allocation2 + $0xa8] sm:$0xff]  ;;  %v3496_v35 = vld [vmem:[#allocation2 + $0xf8] sm:$0xff] }
 0x33e   : > { %vm3373_vm5 = vcmp.ge.f32.partialorder %v3341_v27, 0.0  ;;  %v3406_v2 = vmul.f32 %v16799_v50, %v3341_v27  ;;  %v3342_v8 = vadd.f32 %v16797_v44, %v3262_v1  ;;  %13921 = vmatprep.mubr.msk.bf16.mxu1 %vm3442_vm3, %v16939_v39  ;;  %v17004_v26 = vpack.c.bf16 %v3492_v31, %v3491_v17  ;;  %v3495_v1 = vld [vmem:[#allocation2 + $0xf0] sm:$0xff]  ;;  %v4025_v11 = vld [vmem:[#allocation2 + $0x22] sm:$0xff]  ;;  %v4027_v40 = vld [vmem:[#allocation2 + $0x3a] sm:$0xff] }
 0x33f   : > { %v3440_v13 = vsel %vm3375_vm4, %v3343_v16, %v3408_v46  ;;  %vm3376_vm6 = vcmp.ge.f32.partialorder %v3344_v60, 0.0  ;;  %v3409_v20 = vmul.f32 %v16799_v50, %v3344_v60  ;;  %v3555_v9 = vld [vmem:[#allocation2 + $0x151] sm:$0xff]  ;;  %v17002_v16 = vpack.c.bf16 %v3490_v15, %v3489_v5  ;;  %v4030_v62 = vld [vmem:[#allocation2 + $0x62] sm:$0xff] }
 0x340   : > { %3473 = vst.msk [vmem:[#allocation2 + $0x181] sm:$0xff] %vm3442_vm3, %v3440_v13  ;;  %v3438_v25 = vsel %vm3373_vm5, %v3341_v27, %v3406_v2  ;;  %vm3374_vm7 = vcmp.ge.f32.partialorder %v3342_v8, 0.0  ;;  %v3407_v33 = vmul.f32 %v16799_v50, %v3342_v8  ;;  %v3553_v55 = vld [vmem:[#allocation2 + $0x139] sm:$0xff]  ;;  %v17012_v2 = vpack.c.bf16 %v3496_v35, %v3495_v1  ;;  %v3500_v13 = vld [vmem:[#allocation2 + $0x128] sm:$0xff] }
 0x341   : > { %3471 = vst.msk [vmem:[#allocation2 + $0x169] sm:$0xff] %vm3442_vm3, %v3438_v25  ;;  %v3441_v51 = vsel %vm3376_vm6, %v3344_v60, %v3409_v20  ;;  %v3556_v42 = vld [vmem:[#allocation2 + $0x159] sm:$0xff]  ;;  %v3497_v20 = vld [vmem:[#allocation2 + $0x108] sm:$0xff]  ;;  %v17039_v28 = vpack.c.bf16 %v4025_v11, %v4024_v58 }
 0x342   : > { %3474 = vst.msk [vmem:[#allocation2 + $0x189] sm:$0xff] %vm3442_vm3, %v3441_v51  ;;  %v3439_v44 = vsel %vm3374_vm7, %v3342_v8, %v3407_v33  ;;  %v3554_v56 = vld [vmem:[#allocation2 + $0x141] sm:$0xff]  ;;  %v16957_v18 = vpack.c.bf16 %v3556_v42, %v3555_v9  ;;  %v3493_v46 = vld [vmem:[#allocation2 + $0xd8] sm:$0xff]  ;;  %v3498_v8 = vld [vmem:[#allocation2 + $0x110] sm:$0xff] }
 0x343   : > { %3472 = vst.msk [vmem:[#allocation2 + $0x171] sm:$0xff] %vm3442_vm3, %v3439_v44  ;;  %v16955_v6 = vpack.c.bf16 %v3554_v56, %v3553_v55  ;;  %v3494_v27 = vld [vmem:[#allocation2 + $0xe0] sm:$0xff]  ;;  %v17018_v25 = vpack.c.bf16 %v3498_v8, %v3497_v20  ;;  %v3504_v44 = vld [vmem:[#allocation2 + $0x158] sm:$0xff]  ;;  %v3503_v9 = vld [vmem:[#allocation2 + $0x150] sm:$0xff] }
 0x344   : > { %v17010_v60 = vpack.c.bf16 %v3494_v27, %v3493_v46  ;;  %v3499_v33 = vld [vmem:[#allocation2 + $0x120] sm:$0xff]  ;;  %v3501_v55 = vld [vmem:[#allocation2 + $0x138] sm:$0xff]  ;;  %v17028_v23 = vpack.c.bf16 %v3504_v44, %v3503_v9  ;;  %v4028_v48 = vld [vmem:[#allocation2 + $0x4a] sm:$0xff] }
 0x345   : > { %13922 = vmatmul.mubr.msk.bf16.gmra.mrb[24].mxu1 %vm3442_vm3, %v16955_v6  ;;  %v17020_v51 = vpack.c.bf16 %v3500_v13, %v3499_v33  ;;  %v3502_v42 = vld [vmem:[#allocation2 + $0x140] sm:$0xff]  ;;  %v15974_v34 = vld [vmem:[%s18551_s2 + $0x38] sm:$0xff]   ;;  %v4031_v15 = vld [vmem:[#allocation2 + $0x6a] sm:$0xff] }
 0x346   : > { %13925 = vmatprep.mubr.msk.bf16.mxu1 %vm3442_vm3, %v16957_v18  ;;  %v17026_v56 = vpack.c.bf16 %v3502_v42, %v3501_v55  ;;  %v17056_v5 = vpack.c.bf16 %v4031_v15, %v4030_v62  ;;  %v4033_v17 = vld [vmem:[#allocation2 + $0x82] sm:$0xff]  ;;  %v4034_v27 = vld [vmem:[#allocation2 + $0x92] sm:$0xff]  ;;  %v4035_v35 = vld [vmem:[#allocation2 + $0x9a] sm:$0xff] }
 0x347   : > { %v17064_v1 = vpack.c.bf16 %v4035_v35, %v4034_v27  ;;  %v4036_v8 = vld [vmem:[#allocation2 + $0xaa] sm:$0xff]  ;;  %v4037_v13 = vld [vmem:[#allocation2 + $0xb2] sm:$0xff]  ;;  %v4038_v20 = vld [vmem:[#allocation2 + $0xc2] sm:$0xff] }
 0x348   : > { %v3557_v32 = vld [vmem:[#allocation2 + $0x169] sm:$0xff]  ;;  %v17070_v42 = vpack.c.bf16 %v4037_v13, %v4036_v8  ;;  %v4040_v55 = vld [vmem:[#allocation2 + $0xda] sm:$0xff]  ;;  %v4045_v58 = vld [vmem:[#allocation2 + $0x112] sm:$0xff] }
 0x349   : > { %v4039_v33 = vld [vmem:[#allocation2 + $0xca] sm:$0xff]  ;;  %v4041_v9 = vld [vmem:[#allocation2 + $0xe2] sm:$0xff]  ;;  %v4050_v62 = vld [vmem:[#allocation2 + $0x152] sm:$0xff] }
 0x34a   : > { %v3558_v61 = vld [vmem:[#allocation2 + $0x171] sm:$0xff]  ;;  %v17072_v44 = vpack.c.bf16 %v4039_v33, %v4038_v20  ;;  %v4046_v11 = vld [vmem:[#allocation2 + $0x122] sm:$0xff]  ;;  %v4051_v15 = vld [vmem:[#allocation2 + $0x15a] sm:$0xff] }
 0x34b   : > { %v16963_v59 = vpack.c.bf16 %v3558_v61, %v3557_v32  ;;  %v4023_v32 = vld [vmem:[#allocation2 + $0xa] sm:$0xff]  ;;  %v4053_v35 = vld [vmem:[#allocation2 + $0x172] sm:$0xff] }
 0x34c   : > { %v3506_v61 = vld [vmem:[#allocation2 + $0x170] sm:$0xff]  ;;  %v4054_v52 = vpack.c.bf16 %v4023_v32, %v4022_v29  ;;  %v4043_v32 = vld [vmem:[#allocation2 + $0xfa] sm:$0xff]  ;;  %v15976_v13 = vld [vmem:[%s18551_s2 + $0x48] sm:$0xff]  }
 0x34d   : > { %13926 = vmatmul.mubr.msk.bf16.gmra.mrb[28].mxu1 %vm3442_vm3, %v16963_v59  ;;  %v4042_v29 = vld [vmem:[#allocation2 + $0xf2] sm:$0xff]  ;;  %v4052_v27 = vld [vmem:[#allocation2 + $0x16a] sm:$0xff] }
 0x34e   : > { %13933 = vmatprep.mubr.msk.bf16.mxu1 %vm3442_vm3, %v3507_v0  ;;  %v3505_v0 = vld [vmem:[#allocation2 + $0x168] sm:$0xff]  ;;  %v17102_v8 = vpack.c.bf16 %v4053_v35, %v4052_v27  ;;  %v15977_v20 = vld [vmem:[%s18551_s2 + $0x50] sm:$0xff]  }
 0x34f   : > { %v17034_v57 = vpack.c.bf16 %v3506_v61, %v3505_v0  ;;  %v17078_v61 = vpack.c.bf16 %v4041_v9, %v4040_v55  ;;  %v17080_v0 = vpack.c.bf16 %v4043_v32, %v4042_v29  ;;  %v15978_v55 = vld [vmem:[%s18551_s2 + $0x58] sm:$0xff]   ;;  %v15979_v9 = vld [vmem:[%s18551_s2 + $0x60] sm:$0xff]  }
 0x350   : > { %v5561_v29 = vld [vmem:[#allocation2 + $0x99] sm:$0xff]  ;;  %v5567_v35 = vld [vmem:[#allocation2 + $0xe1] sm:$0xff] }
 0x351   : > { %v5558_v32 = vld [vmem:[#allocation2 + $0x79] sm:$0xff] }
 0x355   : > { %13934 = vmatmul.mubr.msk.bf16.vlgmr.msra.gmra.mrb[0].mxu1 %vm3442_vm3, %v16968_v3 }
 0x356   : > { %13937 = vmatprep.mubr.msk.bf16.mxu1 %vm3442_vm3, %v16973_v21  ;;  %13966 = vmatpush3.bf16.msra.mxu1 %v16847_v43  ;;  %v3486_v43 = vld [vmem:[#allocation2 + $0x80] sm:$0xff] }
 0x357   : > { %13967 = vmatprep.subr.bf16.mxu1 %v15972_v12  ;;  %v16994_v54 = vpack.c.bf16 %v3486_v43, %v3485_v53  ;;  %v15975_v43 = vld [vmem:[%s18551_s2 + $0x40] sm:$0xff]   ;;  %v4029_v53 = vld [vmem:[#allocation2 + $0x52] sm:$0xff] }
 0x358   : > { %v17054_v31 = vpack.c.bf16 %v4029_v53, %v4028_v48  ;;  %v4048_v48 = vld [vmem:[#allocation2 + $0x13a] sm:$0xff]  ;;  %v4049_v53 = vld [vmem:[#allocation2 + $0x142] sm:$0xff] }
 0x35a   : > { %13968 = vmatpush3.bf16.msra.mxu1 %v15972_v12  ;;  %v4026_v12 = vld [vmem:[#allocation2 + $0x32] sm:$0xff] }
 0x35b   : > { %14001 = vmatprep.subr.bf16.mxu1 %v16983_v30  ;;  %v17044_v37 = vpack.c.bf16 %v4027_v40, %v4026_v12  ;;  %v4047_v12 = vld [vmem:[#allocation2 + $0x12a] sm:$0xff] }
 0x35d   : > { %13938 = vmatmul.mubr.msk.bf16.gmra.mrb[4].mxu1 %vm3442_vm3, %v16985_v36 }
 0x35e   : > { %13941 = vmatprep.mubr.msk.bf16.mxu1 %vm3442_vm3, %v16988_v38 }
 0x365   : > { %13942 = vmatmul.mubr.msk.bf16.gmra.mrb[8].mxu1 %vm3442_vm3, %v16994_v54 }
 0x366   : > { %13945 = vmatprep.mubr.msk.bf16.mxu1 %vm3442_vm3, %v16996_v10 }
 0x36d   : > { %13946 = vmatmul.mubr.msk.bf16.gmra.mrb[12].mxu1 %vm3442_vm3, %v17002_v16 }
 0x36e   : > { %13949 = vmatprep.mubr.msk.bf16.mxu1 %vm3442_vm3, %v17004_v26 }
 0x375   : > { %13950 = vmatmul.mubr.msk.bf16.gmra.mrb[16].mxu1 %vm3442_vm3, %v17010_v60 }
 0x376   : > { %13953 = vmatprep.mubr.msk.bf16.mxu1 %vm3442_vm3, %v17012_v2 }
 0x37d   : > { %13954 = vmatmul.mubr.msk.bf16.gmra.mrb[20].mxu1 %vm3442_vm3, %v17018_v25 }
 0x37e   : > { %13957 = vmatprep.mubr.msk.bf16.mxu1 %vm3442_vm3, %v17020_v51 }
 0x385   : > { %13958 = vmatmul.mubr.msk.bf16.gmra.mrb[24].mxu1 %vm3442_vm3, %v17026_v56 }
 0x386   : > { %13961 = vmatprep.mubr.msk.bf16.mxu1 %vm3442_vm3, %v17028_v23 }
 0x38d   : > { %13962 = vmatmul.mubr.msk.bf16.gmra.mrb[28].mxu1 %vm3442_vm3, %v17034_v57 }
 0x38e   : > { %13969 = vmatprep.mubr.msk.bf16.mxu1 %vm3442_vm3, %v4054_v52  ;;  %v4044_v52 = vld [vmem:[#allocation2 + $0x10a] sm:$0xff] }
 0x38f   : > { %v17086_v40 = vpack.c.bf16 %v4045_v58, %v4044_v52  ;;  %v5560_v58 = vld [vmem:[#allocation2 + $0x91] sm:$0xff] }
 0x395   : > { %13970 = vmatmul.mubr.msk.bf16.vlgmr.msra.gmra.mrb[0].mxu1 %vm3442_vm3, %v17039_v28 }
 0x396   : > { %13973 = vmatprep.mubr.msk.bf16.mxu1 %vm3442_vm3, %v17044_v37  ;;  %14002 = vmatpush3.bf16.msra.mxu1 %v16983_v30  ;;  %v4032_v30 = vld [vmem:[#allocation2 + $0x7a] sm:$0xff] }
 0x397   : > { %14003 = vmatprep.subr.bf16.mxu1 %v15974_v34  ;;  %v17062_v46 = vpack.c.bf16 %v4033_v17, %v4032_v30  ;;  %v17094_v30 = vpack.c.bf16 %v4049_v53, %v4048_v48  ;;  %v17096_v17 = vpack.c.bf16 %v4051_v15, %v4050_v62  ;;  %v5565_v48 = vld [vmem:[#allocation2 + $0xc9] sm:$0xff]  ;;  %v5564_v15 = vld [vmem:[#allocation2 + $0xc1] sm:$0xff] }
 0x398   : > { %v5562_v53 = vld [vmem:[#allocation2 + $0xa9] sm:$0xff]  ;;  %v5590_v27 = vpack.c.bf16 %v5565_v48, %v5564_v15 }
 0x399   : > { %v15988_v48 = vld [vmem:[%s18552_s3 + $0x8] sm:$0xff]  }
 0x39a   : > { %14004 = vmatpush3.bf16.msra.mxu1 %v15974_v34  ;;  %v17088_v34 = vpack.c.bf16 %v4047_v12, %v4046_v11  ;;  %v5588_v11 = vpack.c.bf16 %v5561_v29, %v5560_v58  ;;  %v5563_v12 = vld [vmem:[#allocation2 + $0xb1] sm:$0xff] }
 0x39b   : > { %14037 = vmatprep.subr.bf16.mxu1 %v15975_v43  ;;  %v5589_v62 = vpack.c.bf16 %v5563_v12, %v5562_v53 }
 0x39d   : > { %13974 = vmatmul.mubr.msk.bf16.gmra.mrb[4].mxu1 %vm3442_vm3, %v17054_v31 }
 0x39e   : > { %13977 = vmatprep.mubr.msk.bf16.mxu1 %vm3442_vm3, %v17056_v5 }
 0x3a5   : > { %13978 = vmatmul.mubr.msk.bf16.gmra.mrb[8].mxu1 %vm3442_vm3, %v17062_v46 }
 0x3a6   : > { %13981 = vmatprep.mubr.msk.bf16.mxu1 %vm3442_vm3, %v17064_v1 }
 0x3ad   : > { %13982 = vmatmul.mubr.msk.bf16.gmra.mrb[12].mxu1 %vm3442_vm3, %v17070_v42 }
 0x3ae   : > { %13985 = vmatprep.mubr.msk.bf16.mxu1 %vm3442_vm3, %v17072_v44 }
 0x3b5   : > { %13986 = vmatmul.mubr.msk.bf16.gmra.mrb[16].mxu1 %vm3442_vm3, %v17078_v61 }
 0x3b6   : > { %13989 = vmatprep.mubr.msk.bf16.mxu1 %vm3442_vm3, %v17080_v0 }
 0x3bd   : > { %13990 = vmatmul.mubr.msk.bf16.gmra.mrb[20].mxu1 %vm3442_vm3, %v17086_v40 }
 0x3be   : > { %13993 = vmatprep.mubr.msk.bf16.mxu1 %vm3442_vm3, %v17088_v34 }
 0x3c5   : > { %13994 = vmatmul.mubr.msk.bf16.gmra.mrb[24].mxu1 %vm3442_vm3, %v17094_v30 }
 0x3c6   : > { %13997 = vmatprep.mubr.msk.bf16.mxu1 %vm3442_vm3, %v17096_v17 }
 0x3cd   : > { %13998 = vmatmul.mubr.msk.bf16.gmra.mrb[28].mxu1 %vm3442_vm3, %v17102_v8 }
 0x3ce   : > { %14005 = vmatprep.mubr.msk.bf16.mxu1 %vm3442_vm3, %v16968_v3  ;;  %v4359_v3 = vld [vmem:[#allocation2 + $0x188] sm:$0xff] }
 0x3d5   : > { %14006 = vmatmul.mubr.msk.bf16.vlgmr.msra.gmra.mrb[0].mxu1 %vm3442_vm3, %v16973_v21 }
 0x3d6   : > { %14009 = vmatprep.mubr.msk.bf16.mxu1 %vm3442_vm3, %v16985_v36  ;;  %14038 = vmatpush3.bf16.msra.mxu1 %v15975_v43  ;;  %v4358_v43 = vld [vmem:[#allocation2 + $0x180] sm:$0xff] }
 0x3d7   : > { %14039 = vmatprep.subr.bf16.mxu1 %v15976_v13  ;;  %v17142_v33 = vpack.c.bf16 %v4359_v3, %v4358_v43  ;;  %v5568_v43 = vld [vmem:[#allocation2 + $0xf1] sm:$0xff] }
 0x3da   : > { %14040 = vmatpush3.bf16.msra.mxu1 %v15976_v13  ;;  %v5569_v13 = vld [vmem:[#allocation2 + $0xf9] sm:$0xff] }
 0x3db   : > { %14073 = vmatprep.subr.bf16.mxu1 %v15977_v20 }
 0x3dd   : > { %14010 = vmatmul.mubr.msk.bf16.gmra.mrb[4].mxu1 %vm3442_vm3, %v16988_v38 }
 0x3de   : > { %14013 = vmatprep.mubr.msk.bf16.mxu1 %vm3442_vm3, %v16994_v54 }
 0x3e5   : > { %14014 = vmatmul.mubr.msk.bf16.gmra.mrb[8].mxu1 %vm3442_vm3, %v16996_v10 }
 0x3e6   : > { %14017 = vmatprep.mubr.msk.bf16.mxu1 %vm3442_vm3, %v17002_v16 }
 0x3ed   : > { %14018 = vmatmul.mubr.msk.bf16.gmra.mrb[12].mxu1 %vm3442_vm3, %v17004_v26 }
 0x3ee   : > { %14021 = vmatprep.mubr.msk.bf16.mxu1 %vm3442_vm3, %v17010_v60 }
 0x3f5   : > { %14022 = vmatmul.mubr.msk.bf16.gmra.mrb[16].mxu1 %vm3442_vm3, %v17012_v2 }
 0x3f6   : > { %14025 = vmatprep.mubr.msk.bf16.mxu1 %vm3442_vm3, %v17018_v25 }
 0x3fd   : > { %14026 = vmatmul.mubr.msk.bf16.gmra.mrb[20].mxu1 %vm3442_vm3, %v17020_v51 }
 0x3fe   : > { %14029 = vmatprep.mubr.msk.bf16.mxu1 %vm3442_vm3, %v17026_v56 }
 0x405   : > { %14030 = vmatmul.mubr.msk.bf16.gmra.mrb[24].mxu1 %vm3442_vm3, %v17028_v23 }
 0x406   : > { %14033 = vmatprep.mubr.msk.bf16.mxu1 %vm3442_vm3, %v17034_v57 }
 0x40d   : > { %14034 = vmatmul.mubr.msk.bf16.gmra.mrb[28].mxu1 %vm3442_vm3, %v17142_v33 }
 0x40e   : > { %14041 = vmatprep.mubr.msk.bf16.mxu1 %vm3442_vm3, %v16826_v45  ;;  %v4665_v45 = vld [vmem:[#allocation2 + $0x189] sm:$0xff] }
 0x415   : > { %14042 = vmatmul.mubr.msk.bf16.vlgmr.msra.gmra.mrb[0].mxu1 %vm3442_vm3, %v16832_v7  ;;  %v4664_v7 = vld [vmem:[#allocation2 + $0x181] sm:$0xff] }
 0x416   : > { %14045 = vmatprep.mubr.msk.bf16.mxu1 %vm3442_vm3, %v16855_v47  ;;  %14074 = vmatpush3.bf16.msra.mxu1 %v15977_v20  ;;  %v17182_v47 = vpack.c.bf16 %v4665_v45, %v4664_v7  ;;  %v5566_v20 = vld [vmem:[#allocation2 + $0xd9] sm:$0xff] }
 0x417   : > { %14075 = vmatprep.subr.bf16.mxu1 %v15978_v55  ;;  %v5591_v3 = vpack.c.bf16 %v5567_v35, %v5566_v20 }
 0x41a   : > { %14076 = vmatpush3.bf16.msra.mxu1 %v15978_v55  ;;  %v5582_v55 = vld [vmem:[#allocation2 + $0x199] sm:$0xff] }
 0x41b   : > { %14109 = vmatprep.subr.bf16.mxu1 %v15979_v9 }
 0x41d   : > { %14046 = vmatmul.mubr.msk.bf16.gmra.mrb[4].mxu1 %vm3442_vm3, %v16859_v14  ;;  %v15980_v14 = vld [vmem:[%s18551_s2 + $0x68] sm:$0xff]  }
 0x41e   : > { %14049 = vmatprep.mubr.msk.bf16.mxu1 %vm3442_vm3, %v16876_v49  ;;  %v15981_v49 = vld [vmem:[%s18551_s2 + $0x70] sm:$0xff]  }
 0x425   : > { %14050 = vmatmul.mubr.msk.bf16.gmra.mrb[8].mxu1 %vm3442_vm3, %v16879_v63  ;;  %v4970_v63 = vld [vmem:[#allocation2 + $0x182] sm:$0xff] }
 0x426   : > { %14053 = vmatprep.mubr.msk.bf16.mxu1 %vm3442_vm3, %v16896_v19  ;;  %v4971_v19 = vld [vmem:[#allocation2 + $0x18a] sm:$0xff] }
 0x42d   : > { %14054 = vmatmul.mubr.msk.bf16.gmra.mrb[12].mxu1 %vm3442_vm3, %v16899_v41  ;;  %v17222_v41 = vpack.c.bf16 %v4971_v19, %v4970_v63 }
 0x42e   : > { %14057 = vmatprep.mubr.msk.bf16.mxu1 %vm3442_vm3, %v16916_v4  ;;  %v15982_v4 = vld [vmem:[%s18551_s2 + $0x78] sm:$0xff]  }
 0x435   : > { %14058 = vmatmul.mubr.msk.bf16.gmra.mrb[16].mxu1 %vm3442_vm3, %v16919_v22  ;;  %v15983_v22 = vld [vmem:[%s18551_s2 + $0x80] sm:$0xff]  }
 0x436   : > { %14061 = vmatprep.mubr.msk.bf16.mxu1 %vm3442_vm3, %v16936_v24 }
 0x43d   : > { %14062 = vmatmul.mubr.msk.bf16.gmra.mrb[20].mxu1 %vm3442_vm3, %v16939_v39 }
 0x43e   : > { %14065 = vmatprep.mubr.msk.bf16.mxu1 %vm3442_vm3, %v16955_v6 }
 0x445   : > { %14066 = vmatmul.mubr.msk.bf16.gmra.mrb[24].mxu1 %vm3442_vm3, %v16957_v18 }
 0x446   : > { %14069 = vmatprep.mubr.msk.bf16.mxu1 %vm3442_vm3, %v16963_v59 }
 0x44d   : > { %14070 = vmatmul.mubr.msk.bf16.gmra.mrb[28].mxu1 %vm3442_vm3, %v17182_v47 }
 0x44e   : > { %14077 = vmatprep.mubr.msk.bf16.mxu1 %vm3442_vm3, %v17039_v28  ;;  %v5559_v28 = vld [vmem:[#allocation2 + $0x81] sm:$0xff] }
 0x44f   : > { %v5587_v52 = vpack.c.bf16 %v5559_v28, %v5558_v32 }
 0x455   : > { %14078 = vmatmul.mubr.msk.bf16.vlgmr.msra.gmra.mrb[0].mxu1 %vm3442_vm3, %v17044_v37 }
 0x456   : > { %14081 = vmatprep.mubr.msk.bf16.mxu1 %vm3442_vm3, %v17054_v31  ;;  %14110 = vmatpush3.bf16.msra.mxu1 %v15979_v9  ;;  %v5583_v9 = vld [vmem:[#allocation2 + $0x1a1] sm:$0xff] }
 0x457   : > { %14111 = vmatprep.subr.bf16.mxu1 %v15980_v14  ;;  %v5599_v45 = vpack.c.bf16 %v5583_v9, %v5582_v55  ;;  %v17383_v55 = vld [vmem:[%s18552_s3 + $0x20] sm:$0xff]  }
 0x45a   : > { %14112 = vmatpush3.bf16.msra.mxu1 %v15980_v14 }
 0x45b   : > { %14145 = vmatprep.subr.bf16.mxu1 %v15981_v49 }
 0x45d   : > { %14082 = vmatmul.mubr.msk.bf16.gmra.mrb[4].mxu1 %vm3442_vm3, %v17056_v5 }
 0x45e   : > { %14085 = vmatprep.mubr.msk.bf16.mxu1 %vm3442_vm3, %v17062_v46 }
 0x465   : > { %14086 = vmatmul.mubr.msk.bf16.gmra.mrb[8].mxu1 %vm3442_vm3, %v17064_v1 }
 0x466   : > { %14089 = vmatprep.mubr.msk.bf16.mxu1 %vm3442_vm3, %v17070_v42 }
 0x46d   : > { %14090 = vmatmul.mubr.msk.bf16.gmra.mrb[12].mxu1 %vm3442_vm3, %v17072_v44 }
 0x46e   : > { %14093 = vmatprep.mubr.msk.bf16.mxu1 %vm3442_vm3, %v17078_v61 }
 0x475   : > { %14094 = vmatmul.mubr.msk.bf16.gmra.mrb[16].mxu1 %vm3442_vm3, %v17080_v0 }
 0x476   : > { %14097 = vmatprep.mubr.msk.bf16.mxu1 %vm3442_vm3, %v17086_v40 }
 0x47d   : > { %14098 = vmatmul.mubr.msk.bf16.gmra.mrb[20].mxu1 %vm3442_vm3, %v17088_v34 }
 0x47e   : > { %14101 = vmatprep.mubr.msk.bf16.mxu1 %vm3442_vm3, %v17094_v30 }
 0x485   : > { %14102 = vmatmul.mubr.msk.bf16.gmra.mrb[24].mxu1 %vm3442_vm3, %v17096_v17 }
 0x486   : > { %14105 = vmatprep.mubr.msk.bf16.mxu1 %vm3442_vm3, %v17102_v8 }
 0x48d   : > { %14106 = vmatmul.mubr.msk.bf16.gmra.mrb[28].mxu1 %vm3442_vm3, %v17222_v41 }
 0x48e   : > { %14113 = vmatprep.mubr.msk.bf16.mxu1 %vm3442_vm3, %v16973_v21  ;;  %v5276_v21 = vld [vmem:[#allocation2 + $0x198] sm:$0xff] }
 0x495   : > { %14114 = vmatmul.mubr.msk.bf16.vlgmr.msra.gmra.mrb[0].mxu1 %vm3442_vm3, %v16985_v36  ;;  %v5277_v36 = vld [vmem:[#allocation2 + $0x1a0] sm:$0xff] }
 0x496   : > { %14117 = vmatprep.mubr.msk.bf16.mxu1 %vm3442_vm3, %v16988_v38  ;;  %14146 = vmatpush3.bf16.msra.mxu1 %v15981_v49  ;;  %v5293_v38 = vpack.c.bf16 %v5277_v36, %v5276_v21 }
 0x497   : > { %14147 = vmatprep.subr.bf16.mxu1 %v15982_v4 }
 0x49a   : > { %14148 = vmatpush3.bf16.msra.mxu1 %v15982_v4 }
 0x49b   : > { %14181 = vmatprep.subr.bf16.mxu1 %v15983_v22 }
 0x49d   : > { %14118 = vmatmul.mubr.msk.bf16.gmra.mrb[4].mxu1 %vm3442_vm3, %v16994_v54  ;;  %v5553_v54 = vld [vmem:[#allocation2 + $0x39] sm:$0xff] }
 0x49e   : > { %14121 = vmatprep.mubr.msk.bf16.mxu1 %vm3442_vm3, %v16996_v10  ;;  %v5552_v10 = vld [vmem:[#allocation2 + $0x31] sm:$0xff] }
 0x4a5   : > { %14122 = vmatmul.mubr.msk.bf16.gmra.mrb[8].mxu1 %vm3442_vm3, %v17002_v16  ;;  %v5584_v16 = vpack.c.bf16 %v5553_v54, %v5552_v10 }
 0x4a6   : > { %14125 = vmatprep.mubr.msk.bf16.mxu1 %vm3442_vm3, %v17004_v26  ;;  %v5555_v26 = vld [vmem:[#allocation2 + $0x51] sm:$0xff] }
 0x4ad   : > { %14126 = vmatmul.mubr.msk.bf16.gmra.mrb[12].mxu1 %vm3442_vm3, %v17010_v60  ;;  %v5557_v60 = vld [vmem:[#allocation2 + $0x69] sm:$0xff] }
 0x4ae   : > { %14129 = vmatprep.mubr.msk.bf16.mxu1 %vm3442_vm3, %v17012_v2  ;;  %v5554_v2 = vld [vmem:[#allocation2 + $0x49] sm:$0xff] }
 0x4b5   : > { %14130 = vmatmul.mubr.msk.bf16.gmra.mrb[16].mxu1 %vm3442_vm3, %v17018_v25  ;;  %v5585_v25 = vpack.c.bf16 %v5555_v26, %v5554_v2 }
 0x4b6   : > { %14133 = vmatprep.mubr.msk.bf16.mxu1 %vm3442_vm3, %v17020_v51  ;;  %v5556_v51 = vld [vmem:[#allocation2 + $0x61] sm:$0xff] }
 0x4bd   : > { %14134 = vmatmul.mubr.msk.bf16.gmra.mrb[20].mxu1 %vm3442_vm3, %v17026_v56  ;;  %v15984_v56 = vld [vmem:[%s18551_s2 + $0x88] sm:$0xff]  }
 0x4be   : > { %14137 = vmatprep.mubr.msk.bf16.mxu1 %vm3442_vm3, %v17028_v23  ;;  %v5586_v23 = vpack.c.bf16 %v5557_v60, %v5556_v51 }
 0x4c5   : > { %14138 = vmatmul.mubr.msk.bf16.gmra.mrb[24].mxu1 %vm3442_vm3, %v17034_v57  ;;  %v15985_v57 = vld [vmem:[%s18552_s3 + $0x10] sm:$0xff]  }
 0x4c6   : > { %14141 = vmatprep.mubr.msk.bf16.mxu1 %vm3442_vm3, %v17142_v33  ;;  %v5592_v33 = vpack.c.bf16 %v5569_v13, %v5568_v43 }
 0x4cd   : > { %14142 = vmatmul.mubr.msk.bf16.gmra.mrb[28].mxu1 %vm3442_vm3, %v5293_v38 }
 0x4ce   : > { %14149 = vmatprep.mubr.msk.bf16.mxu1 %vm3442_vm3, %v5584_v16 }
 0x4d5   : > { %14150 = vmatmul.mubr.msk.bf16.vlgmr.msra.gmra.mrb[0].mxu1 %vm3442_vm3, %v5585_v25 }
 0x4d6   : > { %14153 = vmatprep.mubr.msk.bf16.mxu1 %vm3442_vm3, %v5586_v23  ;;  %14182 = vmatpush3.bf16.msra.mxu1 %v15983_v22 }
 0x4d7   : > { %14183 = vmatprep.subr.bf16.mxu1 %v15984_v56 }
 0x4da   : > { %14184 = vmatpush3.bf16.msra.mxu1 %v15984_v56 }
 0x4db   : > { %14217 = vmatprep.subr.bf16.mxu1 %v15985_v57 }
 0x4dd   : > { %14154 = vmatmul.mubr.msk.bf16.gmra.mrb[4].mxu1 %vm3442_vm3, %v5587_v52 }
 0x4de   : > { %14157 = vmatprep.mubr.msk.bf16.mxu1 %vm3442_vm3, %v5588_v11 }
 0x4e5   : > { %14158 = vmatmul.mubr.msk.bf16.gmra.mrb[8].mxu1 %vm3442_vm3, %v5589_v62 }
 0x4e6   : > { %14161 = vmatprep.mubr.msk.bf16.mxu1 %vm3442_vm3, %v5590_v27 }
 0x4ed   : > { %14162 = vmatmul.mubr.msk.bf16.gmra.mrb[12].mxu1 %vm3442_vm3, %v5591_v3 }
 0x4ee   : > { %14165 = vmatprep.mubr.msk.bf16.mxu1 %vm3442_vm3, %v5592_v33 }
 0x4f5   : > { %14166 = vmatmul.mubr.msk.bf16.gmra.mrb[16].mxu1 %vm3442_vm3, %v16936_v24  ;;  %v15986_v24 = vld [vmem:[%s18552_s3 + $0x18] sm:$0xff]  }
 0x4f6   : > { %14169 = vmatprep.mubr.msk.bf16.mxu1 %vm3442_vm3, %v16939_v39  ;;  %v5888_v39 = vld [vmem:[#allocation2 + $0x19a] sm:$0xff] }
 0x4fd   : > { %14170 = vmatmul.mubr.msk.bf16.gmra.mrb[20].mxu1 %vm3442_vm3, %v16955_v6  ;;  %v5889_v6 = vld [vmem:[#allocation2 + $0x1a2] sm:$0xff] }
 0x4fe   : > { %14173 = vmatprep.mubr.msk.bf16.mxu1 %vm3442_vm3, %v16957_v18  ;;  %v5905_v18 = vpack.c.bf16 %v5889_v6, %v5888_v39 }
 0x505   : > { %14174 = vmatmul.mubr.msk.bf16.gmra.mrb[24].mxu1 %vm3442_vm3, %v16963_v59  ;;  %v6383_v59 = vld [vmem:[#allocation2 + $0x1] sm:$0xff] }
 0x506   : > { %14177 = vmatprep.mubr.msk.bf16.mxu1 %vm3442_vm3, %v17182_v47 }
 0x50d   : > { %14178 = vmatmul.mubr.msk.bf16.gmra.mrb[28].mxu1 %vm3442_vm3, %v5599_v45 }
 0x50e   : > { %14185 = vmatprep.mubr.msk.bf16.mxu1 %vm3442_vm3, %v17044_v37  ;;  %v6384_v37 = vld [vmem:[#allocation2 + $0x9] sm:$0xff] }
 0x515   : > { %14186 = vmatmul.mubr.msk.bf16.vlgmr.msra.gmra.mrb[0].mxu1 %vm3442_vm3, %v17054_v31  ;;  %v6415_v31 = vpack.c.bf16 %v6384_v37, %v6383_v59 }
 0x516   : > { %14189 = vmatprep.mubr.msk.bf16.mxu1 %vm3442_vm3, %v17056_v5  ;;  %14218 = vmatpush3.bf16.msra.mxu1 %v15985_v57  ;;  %v17329_v5 = vld [vmem:[%s18552_s3] sm:$0xff]  }
 0x517   : > { %14219 = vmatprep.subr.bf16.mxu1 %v15986_v24 }
 0x51a   : > { %14220 = vmatpush3.bf16.msra.mxu1 %v15986_v24 }
 0x51b   : > { %14253 = vmatprep.subr.bf16.mxu1 %v17329_v5 }
 0x51d   : > { %14190 = vmatmul.mubr.msk.bf16.gmra.mrb[4].mxu1 %vm3442_vm3, %v17062_v46  ;;  %v17335_v46 = vld [vmem:[%s18555_s6] ss:$0 sm:$0xff] }
 0x51e   : > { %14193 = vmatprep.mubr.msk.bf16.mxu1 %vm3442_vm3, %v17064_v1 }
 0x525   : > { %14194 = vmatmul.mubr.msk.bf16.gmra.mrb[8].mxu1 %vm3442_vm3, %v17070_v42 }
 0x526   : > { %14197 = vmatprep.mubr.msk.bf16.mxu1 %vm3442_vm3, %v17072_v44 }
 0x52d   : > { %14198 = vmatmul.mubr.msk.bf16.gmra.mrb[12].mxu1 %vm3442_vm3, %v17078_v61 }
 0x52e   : > { %14201 = vmatprep.mubr.msk.bf16.mxu1 %vm3442_vm3, %v17080_v0 }
 0x535   : > { %14202 = vmatmul.mubr.msk.bf16.gmra.mrb[16].mxu1 %vm3442_vm3, %v17086_v40 }
 0x536   : > { %14205 = vmatprep.mubr.msk.bf16.mxu1 %vm3442_vm3, %v17088_v34 }
 0x53d   : > { %14206 = vmatmul.mubr.msk.bf16.gmra.mrb[20].mxu1 %vm3442_vm3, %v17094_v30 }
 0x53e   : > { %14209 = vmatprep.mubr.msk.bf16.mxu1 %vm3442_vm3, %v17096_v17 }
 0x545   : > { %14210 = vmatmul.mubr.msk.bf16.gmra.mrb[24].mxu1 %vm3442_vm3, %v17102_v8 }
 0x546   : > { %14213 = vmatprep.mubr.msk.bf16.mxu1 %vm3442_vm3, %v17222_v41 }
 0x54d   : > { %14214 = vmatmul.mubr.msk.bf16.gmra.mrb[28].mxu1 %vm3442_vm3, %v5905_v18 }
 0x54e   : > { %14221 = vmatprep.mubr.msk.bf16.mxu1 %vm3442_vm3, %v6415_v31 }
 0x5e8   : > { %v14187_v1 = vpop.f32.mrb[0].mxu1 }
 0x5e9   : > { %v6173_v42 = vadd.f32 %v14187_v1, %v17335_v46  ;;  %v6005_v44 = vpop.f32.mrb[1].mxu1 }
 0x5ea   : > { %v6171_v61 = vadd.f32 %v17335_v46, %v6005_v44  ;;  %v14188_v0 = vpop.f32.mrb[2].mxu1 }
 0x5eb   : > { %vm6205_vm8 = vcmp.ge.f32.partialorder %v6173_v42, 0.0  ;;  %v6237_v40 = vmul.f32 %v6173_v42, %v16799_v50  ;;  %v6174_v34 = vadd.f32 %v14188_v0, %v17335_v46  ;;  %v6008_v30 = vpop.f32.mrb[3].mxu1 }
 0x5ec   : > { %vm6203_vm9 = vcmp.ge.f32.partialorder %v6171_v61, 0.0  ;;  %v6235_v17 = vmul.f32 %v6171_v61, %v16799_v50  ;;  %v6172_v8 = vadd.f32 %v17335_v46, %v6008_v30 }
 0x5ed   : > { %v6269_v7 = vsel %vm6205_vm8, %v6173_v42, %v6237_v40  ;;  %vm6206_vm10 = vcmp.ge.f32.partialorder %v6174_v34, 0.0  ;;  %v6238_v47 = vmul.f32 %v6174_v34, %v16799_v50 }
 0x5ee   : > { %6301 = vst.msk [vmem:[#allocation2 + $0x31] sm:$0xff] %vm3442_vm3, %v6269_v7  ;;  %v6267_v14 = vsel %vm6203_vm9, %v6171_v61, %v6235_v17  ;;  %vm6204_vm11 = vcmp.ge.f32.partialorder %v6172_v8, 0.0  ;;  %v6236_v49 = vmul.f32 %v6172_v8, %v16799_v50 }
 0x5ef   : > { %6299 = vst.msk [vmem:[#allocation2 + $0x19] sm:$0xff] %vm3442_vm3, %v6267_v14  ;;  %v6270_v63 = vsel %vm6206_vm10, %v6174_v34, %v6238_v47 }
 0x5f0   : > { %6302 = vst.msk [vmem:[#allocation2 + $0x39] sm:$0xff] %vm3442_vm3, %v6270_v63  ;;  %v6268_v19 = vsel %vm6204_vm11, %v6172_v8, %v6236_v49  ;;  %v14191_v41 = vpop.f32.mrb[4].mxu1 }
 0x5f1   : > { %6300 = vst.msk [vmem:[#allocation2 + $0x21] sm:$0xff] %vm3442_vm3, %v6268_v19  ;;  %v6177_v4 = vadd.f32 %v14191_v41, %v17335_v46  ;;  %v6021_v22 = vpop.f32.mrb[5].mxu1 }
 0x5f2   : > { %v6175_v21 = vadd.f32 %v17335_v46, %v6021_v22  ;;  %v14192_v36 = vpop.f32.mrb[6].mxu1 }
 0x5f3   : > { %vm6209_vm12 = vcmp.ge.f32.partialorder %v6177_v4, 0.0  ;;  %v6241_v38 = vmul.f32 %v6177_v4, %v16799_v50  ;;  %v6178_v54 = vadd.f32 %v14192_v36, %v17335_v46  ;;  %v6024_v10 = vpop.f32.mrb[7].mxu1 }
 0x5f4   : > { %vm6207_vm13 = vcmp.ge.f32.partialorder %v6175_v21, 0.0  ;;  %v6239_v16 = vmul.f32 %v6175_v21, %v16799_v50  ;;  %v6176_v26 = vadd.f32 %v17335_v46, %v6024_v10 }
 0x5f5   : > { %v6273_v60 = vsel %vm6209_vm12, %v6177_v4, %v6241_v38  ;;  %vm6210_vm14 = vcmp.ge.f32.partialorder %v6178_v54, 0.0  ;;  %v6242_v2 = vmul.f32 %v6178_v54, %v16799_v50  ;;  %v6387_v12 = vld [vmem:[#allocation2 + $0x31] sm:$0xff] }
 0x5f6   : > { %6305 = vst.msk [vmem:[#allocation2 + $0x61] sm:$0xff] %vm3442_vm3, %v6273_v60  ;;  %v6271_v25 = vsel %vm6207_vm13, %v6175_v21, %v6239_v16  ;;  %vm6208_vm15 = vcmp.ge.f32.partialorder %v6176_v26, 0.0  ;;  %v6240_v51 = vmul.f32 %v6176_v26, %v16799_v50  ;;  %v6385_v29 = vld [vmem:[#allocation2 + $0x19] sm:$0xff] }
 0x5f7   : > { %6303 = vst.msk [vmem:[#allocation2 + $0x49] sm:$0xff] %vm3442_vm3, %v6271_v25  ;;  %v6274_v56 = vsel %vm6210_vm14, %v6178_v54, %v6242_v2  ;;  %v6388_v23 = vld [vmem:[#allocation2 + $0x39] sm:$0xff] }
 0x5f8   : > { %6306 = vst.msk [vmem:[#allocation2 + $0x69] sm:$0xff] %vm3442_vm3, %v6274_v56  ;;  %v6272_v57 = vsel %vm6208_vm15, %v6176_v26, %v6240_v51  ;;  %v14195_v28 = vpop.f32.mrb[8].mxu1  ;;  %v6386_v32 = vld [vmem:[#allocation2 + $0x21] sm:$0xff]  ;;  %v17368_v15 = vpack.c.bf16 %v6388_v23, %v6387_v12 }
 0x5f9   : > { %6304 = vst.msk [vmem:[#allocation2 + $0x51] sm:$0xff] %vm3442_vm3, %v6272_v57  ;;  %v6181_v52 = vadd.f32 %v14195_v28, %v17335_v46  ;;  %v6037_v58 = vpop.f32.mrb[9].mxu1  ;;  %v17362_v11 = vpack.c.bf16 %v6386_v32, %v6385_v29 }
 0x5fa   : > { %v6179_v53 = vadd.f32 %v17335_v46, %v6037_v58  ;;  %v14196_v62 = vpop.f32.mrb[10].mxu1 }
 0x5fb   : > { %vm6213_vm1 = vcmp.ge.f32.partialorder %v6181_v52, 0.0  ;;  %v6245_v27 = vmul.f32 %v6181_v52, %v16799_v50  ;;  %v6182_v35 = vadd.f32 %v14196_v62, %v17335_v46  ;;  %v6040_v13 = vpop.f32.mrb[11].mxu1  ;;  %14222 = vmatmul.mubr.msk.bf16.vlgmr.msra.gmra.mrb[32].mxu1 %vm3442_vm3, %v17362_v11 }
 0x5fc   : > { %vm6211_vm2 = vcmp.ge.f32.partialorder %v6179_v53, 0.0  ;;  %v6243_v20 = vmul.f32 %v6179_v53, %v16799_v50  ;;  %v6180_v3 = vadd.f32 %v17335_v46, %v6040_v13  ;;  %14225 = vmatprep.mubr.msk.bf16.mxu1 %vm3442_vm3, %v17368_v15  ;;  %14254 = vmatpush3.bf16.msra.mxu1 %v17329_v5 }
 0x5fd   : > { %v6277_v43 = vsel %vm6213_vm1, %v6181_v52, %v6245_v27  ;;  %vm6214_vm4 = vcmp.ge.f32.partialorder %v6182_v35, 0.0  ;;  %v6246_v33 = vmul.f32 %v6182_v35, %v16799_v50  ;;  %14255 = vmatprep.subr.bf16.mxu1 %v15988_v48  ;;  %v6391_v42 = vld [vmem:[#allocation2 + $0x61] sm:$0xff] }
 0x5fe   : > { %6309 = vst.msk [vmem:[#allocation2 + $0x91] sm:$0xff] %vm3442_vm3, %v6277_v43  ;;  %v6275_v9 = vsel %vm6211_vm2, %v6179_v53, %v6243_v20  ;;  %vm6212_vm5 = vcmp.ge.f32.partialorder %v6180_v3, 0.0  ;;  %v6244_v45 = vmul.f32 %v6180_v3, %v16799_v50  ;;  %v6389_v59 = vld [vmem:[#allocation2 + $0x49] sm:$0xff] }
 0x5ff   : > { %6307 = vst.msk [vmem:[#allocation2 + $0x79] sm:$0xff] %vm3442_vm3, %v6275_v9  ;;  %v6278_v24 = vsel %vm6214_vm4, %v6182_v35, %v6246_v33  ;;  %v6392_v39 = vld [vmem:[#allocation2 + $0x69] sm:$0xff] }
 0x600   : > { %6310 = vst.msk [vmem:[#allocation2 + $0x99] sm:$0xff] %vm3442_vm3, %v6278_v24  ;;  %v6276_v6 = vsel %vm6212_vm5, %v6180_v3, %v6244_v45  ;;  %v14199_v18 = vpop.f32.mrb[12].mxu1  ;;  %v6390_v37 = vld [vmem:[#allocation2 + $0x51] sm:$0xff]  ;;  %14256 = vmatpush3.bf16.msra.mxu1 %v15988_v48  ;;  %v17395_v0 = vpack.c.bf16 %v6392_v39, %v6391_v42 }
 0x601   : > { %6308 = vst.msk [vmem:[#allocation2 + $0x81] sm:$0xff] %vm3442_vm3, %v6276_v6  ;;  %v6185_v31 = vadd.f32 %v14199_v18, %v17335_v46  ;;  %v6053_v5 = vpop.f32.mrb[13].mxu1  ;;  %v17391_v1 = vpack.c.bf16 %v6390_v37, %v6389_v59  ;;  %14289 = vmatprep.subr.bf16.mxu1 %v17383_v55 }
 0x602   : > { %v6183_v44 = vadd.f32 %v17335_v46, %v6053_v5  ;;  %v14200_v61 = vpop.f32.mrb[14].mxu1 }
 0x603   : > { %vm6217_vm6 = vcmp.ge.f32.partialorder %v6185_v31, 0.0  ;;  %v6249_v40 = vmul.f32 %v6185_v31, %v16799_v50  ;;  %v6186_v34 = vadd.f32 %v14200_v61, %v17335_v46  ;;  %v6056_v30 = vpop.f32.mrb[15].mxu1  ;;  %14226 = vmatmul.mubr.msk.bf16.gmra.mrb[36].mxu1 %vm3442_vm3, %v17391_v1 }
 0x604   : > { %vm6215_vm7 = vcmp.ge.f32.partialorder %v6183_v44, 0.0  ;;  %v6247_v17 = vmul.f32 %v6183_v44, %v16799_v50  ;;  %v6184_v8 = vadd.f32 %v17335_v46, %v6056_v30  ;;  %14229 = vmatprep.mubr.msk.bf16.mxu1 %vm3442_vm3, %v17395_v0 }
 0x605   : > { %v6281_v7 = vsel %vm6217_vm6, %v6185_v31, %v6249_v40  ;;  %vm6218_vm8 = vcmp.ge.f32.partialorder %v6186_v34, 0.0  ;;  %v6250_v47 = vmul.f32 %v6186_v34, %v16799_v50  ;;  %v6395_v10 = vld [vmem:[#allocation2 + $0x91] sm:$0xff] }
 0x606   : > { %6313 = vst.msk [vmem:[#allocation2 + $0xc1] sm:$0xff] %vm3442_vm3, %v6281_v7  ;;  %v6279_v14 = vsel %vm6215_vm7, %v6183_v44, %v6247_v17  ;;  %vm6216_vm9 = vcmp.ge.f32.partialorder %v6184_v8, 0.0  ;;  %v6248_v49 = vmul.f32 %v6184_v8, %v16799_v50  ;;  %v6393_v22 = vld [vmem:[#allocation2 + $0x79] sm:$0xff] }
 0x607   : > { %6311 = vst.msk [vmem:[#allocation2 + $0xa9] sm:$0xff] %vm3442_vm3, %v6279_v14  ;;  %v6282_v63 = vsel %vm6218_vm8, %v6186_v34, %v6250_v47  ;;  %v6396_v19 = vld [vmem:[#allocation2 + $0x99] sm:$0xff] }
 0x608   : > { %6314 = vst.msk [vmem:[#allocation2 + $0xc9] sm:$0xff] %vm3442_vm3, %v6282_v63  ;;  %v6280_v41 = vsel %vm6216_vm9, %v6184_v8, %v6248_v49  ;;  %v14203_v4 = vpop.f32.mrb[16].mxu1  ;;  %v6394_v21 = vld [vmem:[#allocation2 + $0x81] sm:$0xff]  ;;  %v17415_v60 = vpack.c.bf16 %v6396_v19, %v6395_v10 }
 0x609   : > { %6312 = vst.msk [vmem:[#allocation2 + $0xb1] sm:$0xff] %vm3442_vm3, %v6280_v41  ;;  %v6189_v36 = vadd.f32 %v14203_v4, %v17335_v46  ;;  %v6069_v38 = vpop.f32.mrb[17].mxu1  ;;  %v17412_v54 = vpack.c.bf16 %v6394_v21, %v6393_v22 }
 0x60a   : > { %v6187_v16 = vadd.f32 %v17335_v46, %v6069_v38  ;;  %v14204_v26 = vpop.f32.mrb[18].mxu1 }
 0x60b   : > { %vm6221_vm10 = vcmp.ge.f32.partialorder %v6189_v36, 0.0  ;;  %v6253_v2 = vmul.f32 %v6189_v36, %v16799_v50  ;;  %v6190_v25 = vadd.f32 %v14204_v26, %v17335_v46  ;;  %v6072_v51 = vpop.f32.mrb[19].mxu1  ;;  %14230 = vmatmul.mubr.msk.bf16.gmra.mrb[40].mxu1 %vm3442_vm3, %v17412_v54 }
 0x60c   : > { %vm6219_vm11 = vcmp.ge.f32.partialorder %v6187_v16, 0.0  ;;  %v6251_v56 = vmul.f32 %v6187_v16, %v16799_v50  ;;  %v6188_v23 = vadd.f32 %v17335_v46, %v6072_v51  ;;  %14233 = vmatprep.mubr.msk.bf16.mxu1 %vm3442_vm3, %v17415_v60 }
 0x60d   : > { %v6285_v57 = vsel %vm6221_vm10, %v6189_v36, %v6253_v2  ;;  %vm6222_vm12 = vcmp.ge.f32.partialorder %v6190_v25, 0.0  ;;  %v6254_v28 = vmul.f32 %v6190_v25, %v16799_v50  ;;  %v6399_v20 = vld [vmem:[#allocation2 + $0xc1] sm:$0xff] }
 0x60e   : > { %6317 = vst.msk [vmem:[#allocation2 + $0xf1] sm:$0xff] %vm3442_vm3, %v6285_v57  ;;  %v6283_v29 = vsel %vm6219_vm11, %v6187_v16, %v6251_v56  ;;  %vm6220_vm13 = vcmp.ge.f32.partialorder %v6188_v23, 0.0  ;;  %v6252_v32 = vmul.f32 %v6188_v23, %v16799_v50  ;;  %v6397_v53 = vld [vmem:[#allocation2 + $0xa9] sm:$0xff] }
 0x60f   : > { %6315 = vst.msk [vmem:[#allocation2 + $0xd9] sm:$0xff] %vm3442_vm3, %v6283_v29  ;;  %v6286_v52 = vsel %vm6222_vm12, %v6190_v25, %v6254_v28  ;;  %v6400_v58 = vld [vmem:[#allocation2 + $0xc9] sm:$0xff] }
 0x610   : > { %6318 = vst.msk [vmem:[#allocation2 + $0xf9] sm:$0xff] %vm3442_vm3, %v6286_v52  ;;  %v6284_v12 = vsel %vm6220_vm13, %v6188_v23, %v6252_v32  ;;  %v14207_v48 = vpop.f32.mrb[20].mxu1  ;;  %v6398_v62 = vld [vmem:[#allocation2 + $0xb1] sm:$0xff]  ;;  %v17435_v33 = vpack.c.bf16 %v6400_v58, %v6399_v20 }
 0x611   : > { %6316 = vst.msk [vmem:[#allocation2 + $0xe1] sm:$0xff] %vm3442_vm3, %v6284_v12  ;;  %v6193_v27 = vadd.f32 %v14207_v48, %v17335_v46  ;;  %v6085_v35 = vpop.f32.mrb[21].mxu1  ;;  %v17432_v13 = vpack.c.bf16 %v6398_v62, %v6397_v53 }
 0x612   : > { %v6191_v3 = vadd.f32 %v17335_v46, %v6085_v35  ;;  %v14208_v43 = vpop.f32.mrb[22].mxu1 }
 0x613   : > { %vm6225_vm14 = vcmp.ge.f32.partialorder %v6193_v27, 0.0  ;;  %v6257_v9 = vmul.f32 %v6193_v27, %v16799_v50  ;;  %v6194_v45 = vadd.f32 %v14208_v43, %v17335_v46  ;;  %v6088_v24 = vpop.f32.mrb[23].mxu1  ;;  %14234 = vmatmul.mubr.msk.bf16.gmra.mrb[44].mxu1 %vm3442_vm3, %v17432_v13 }
 0x614   : > { %vm6223_vm15 = vcmp.ge.f32.partialorder %v6191_v3, 0.0  ;;  %v6255_v39 = vmul.f32 %v6191_v3, %v16799_v50  ;;  %v6192_v6 = vadd.f32 %v17335_v46, %v6088_v24  ;;  %14237 = vmatprep.mubr.msk.bf16.mxu1 %vm3442_vm3, %v17435_v33 }
 0x615   : > { %v6289_v18 = vsel %vm6225_vm14, %v6193_v27, %v6257_v9  ;;  %vm6226_vm1 = vcmp.ge.f32.partialorder %v6194_v45, 0.0  ;;  %v6258_v59 = vmul.f32 %v6194_v45, %v16799_v50  ;;  %v6403_v7 = vld [vmem:[#allocation2 + $0xf1] sm:$0xff] }
 0x616   : > { %6321 = vst.msk [vmem:[#allocation2 + $0x121] sm:$0xff] %vm3442_vm3, %v6289_v18  ;;  %v6287_v37 = vsel %vm6223_vm15, %v6191_v3, %v6255_v39  ;;  %vm6224_vm2 = vcmp.ge.f32.partialorder %v6192_v6, 0.0  ;;  %v6256_v31 = vmul.f32 %v6192_v6, %v16799_v50  ;;  %v6401_v40 = vld [vmem:[#allocation2 + $0xd9] sm:$0xff] }
 0x617   : > { %6319 = vst.msk [vmem:[#allocation2 + $0x109] sm:$0xff] %vm3442_vm3, %v6287_v37  ;;  %v6290_v5 = vsel %vm6226_vm1, %v6194_v45, %v6258_v59  ;;  %v6404_v42 = vld [vmem:[#allocation2 + $0xf9] sm:$0xff] }
 0x618   : > { %6322 = vst.msk [vmem:[#allocation2 + $0x129] sm:$0xff] %vm3442_vm3, %v6290_v5  ;;  %v6288_v44 = vsel %vm6224_vm2, %v6192_v6, %v6256_v31  ;;  %v14211_v61 = vpop.f32.mrb[24].mxu1  ;;  %v6402_v34 = vld [vmem:[#allocation2 + $0xe1] sm:$0xff]  ;;  %v17455_v49 = vpack.c.bf16 %v6404_v42, %v6403_v7  ;;  %v6335_v7 = vld [vmem:[#allocation2 + $0x30] sm:$0xff] }
 0x619   : > { %6320 = vst.msk [vmem:[#allocation2 + $0x111] sm:$0xff] %vm3442_vm3, %v6288_v44  ;;  %v6197_v30 = vadd.f32 %v14211_v61, %v17335_v46  ;;  %v6101_v17 = vpop.f32.mrb[25].mxu1  ;;  %v17452_v8 = vpack.c.bf16 %v6402_v34, %v6401_v40  ;;  %v6331_v37 = vld [vmem:[#allocation2] sm:$0xff]  ;;  %v6332_v31 = vld [vmem:[#allocation2 + $0x8] sm:$0xff]  ;;  %v6336_v34 = vld [vmem:[#allocation2 + $0x38] sm:$0xff] }
 0x61a   : > { %v6195_v47 = vadd.f32 %v17335_v46, %v6101_v17  ;;  %v14212_v14 = vpop.f32.mrb[26].mxu1  ;;  %v6363_v44 = vpack.c.bf16 %v6332_v31, %v6331_v37  ;;  %v6334_v40 = vld [vmem:[#allocation2 + $0x20] sm:$0xff] }
 0x61b   : > { %vm6229_vm4 = vcmp.ge.f32.partialorder %v6197_v30, 0.0  ;;  %v6261_v63 = vmul.f32 %v6197_v30, %v16799_v50  ;;  %v6198_v19 = vadd.f32 %v14212_v14, %v17335_v46  ;;  %v6104_v41 = vpop.f32.mrb[27].mxu1  ;;  %14238 = vmatmul.mubr.msk.bf16.gmra.mrb[48].mxu1 %vm3442_vm3, %v17452_v8  ;;  %v17509_v14 = vpack.c.bf16 %v6336_v34, %v6335_v7  ;;  %v6878_v31 = vld [vmem:[#allocation2 + $0x2] sm:$0xff] }
 0x61c   : > { %vm6227_vm5 = vcmp.ge.f32.partialorder %v6195_v47, 0.0  ;;  %v6259_v4 = vmul.f32 %v6195_v47, %v16799_v50  ;;  %v6196_v22 = vadd.f32 %v17335_v46, %v6104_v41  ;;  %14241 = vmatprep.mubr.msk.bf16.mxu1 %vm3442_vm3, %v17455_v49  ;;  %v6340_v41 = vld [vmem:[#allocation2 + $0x68] sm:$0xff] }
 0x61d   : > { %v6293_v21 = vsel %vm6229_vm4, %v6197_v30, %v6261_v63  ;;  %vm6230_vm6 = vcmp.ge.f32.partialorder %v6198_v19, 0.0  ;;  %v6262_v36 = vmul.f32 %v6198_v19, %v16799_v50  ;;  %v6407_v29 = vld [vmem:[#allocation2 + $0x121] sm:$0xff]  ;;  %v6333_v30 = vld [vmem:[#allocation2 + $0x18] sm:$0xff]  ;;  %v17519_v63 = vld [vmem:[%s18552_s3 + $0x30] sm:$0xff]  }
 0x61e   : > { %6325 = vst.msk [vmem:[#allocation2 + $0x151] sm:$0xff] %vm3442_vm3, %v6293_v21  ;;  %v6291_v38 = vsel %vm6227_vm5, %v6195_v47, %v6259_v4  ;;  %vm6228_vm7 = vcmp.ge.f32.partialorder %v6196_v22, 0.0  ;;  %v6260_v10 = vmul.f32 %v6196_v22, %v16799_v50  ;;  %v6405_v51 = vld [vmem:[#allocation2 + $0x109] sm:$0xff]  ;;  %v17504_v17 = vpack.c.bf16 %v6334_v40, %v6333_v30  ;;  %v6339_v21 = vld [vmem:[#allocation2 + $0x60] sm:$0xff] }
 0x61f   : > { %6323 = vst.msk [vmem:[#allocation2 + $0x139] sm:$0xff] %vm3442_vm3, %v6291_v38  ;;  %v6294_v16 = vsel %vm6230_vm6, %v6198_v19, %v6262_v36  ;;  %v6408_v26 = vld [vmem:[#allocation2 + $0x129] sm:$0xff]  ;;  %v17524_v36 = vpack.c.bf16 %v6340_v41, %v6339_v21  ;;  %v6344_v38 = vld [vmem:[#allocation2 + $0x98] sm:$0xff] }
 0x620   : > { %6326 = vst.msk [vmem:[#allocation2 + $0x159] sm:$0xff] %vm3442_vm3, %v6294_v16  ;;  %v6292_v2 = vsel %vm6228_vm7, %v6196_v22, %v6260_v10  ;;  %v14215_v25 = vpop.f32.mrb[28].mxu1  ;;  %v6406_v56 = vld [vmem:[#allocation2 + $0x111] sm:$0xff]  ;;  %v17475_v58 = vpack.c.bf16 %v6408_v26, %v6407_v29  ;;  %v15990_v47 = vld [vmem:[%s18552_s3 + $0x28] sm:$0xff]   ;;  %v6880_v30 = vld [vmem:[#allocation2 + $0x1a] sm:$0xff] }
 0x621   : > { %6324 = vst.msk [vmem:[#allocation2 + $0x141] sm:$0xff] %vm3442_vm3, %v6292_v2  ;;  %v6201_v23 = vadd.f32 %v14215_v25, %v17335_v46  ;;  %v6117_v57 = vpop.f32.mrb[29].mxu1  ;;  %v17472_v28 = vpack.c.bf16 %v6406_v56, %v6405_v51  ;;  %v6338_v19 = vld [vmem:[#allocation2 + $0x50] sm:$0xff]  ;;  %v6337_v4 = vld [vmem:[#allocation2 + $0x48] sm:$0xff]  ;;  %v6341_v10 = vld [vmem:[#allocation2 + $0x78] sm:$0xff] }
 0x622   : > { %v6199_v32 = vadd.f32 %v17335_v46, %v6117_v57  ;;  %v14216_v52 = vpop.f32.mrb[30].mxu1  ;;  %v17521_v22 = vpack.c.bf16 %v6338_v19, %v6337_v4  ;;  %v6343_v26 = vld [vmem:[#allocation2 + $0x90] sm:$0xff]  ;;  %v6348_v51 = vld [vmem:[#allocation2 + $0xc8] sm:$0xff]  ;;  %v6347_v57 = vld [vmem:[#allocation2 + $0xc0] sm:$0xff] }
 0x623   : > { %vm6233_vm8 = vcmp.ge.f32.partialorder %v6201_v23, 0.0  ;;  %v6265_v12 = vmul.f32 %v6201_v23, %v16799_v50  ;;  %v6202_v48 = vadd.f32 %v14216_v52, %v17335_v46  ;;  %v6120_v53 = vpop.f32.mrb[31].mxu1  ;;  %14242 = vmatmul.mubr.msk.bf16.gmra.mrb[52].mxu1 %vm3442_vm3, %v17472_v28  ;;  %v17532_v2 = vpack.c.bf16 %v6344_v38, %v6343_v26  ;;  %v6346_v25 = vld [vmem:[#allocation2 + $0xb0] sm:$0xff]  ;;  %v6345_v56 = vld [vmem:[#allocation2 + $0xa8] sm:$0xff]  ;;  %v6352_v52 = vld [vmem:[#allocation2 + $0xf8] sm:$0xff] }
 0x624   : > { %vm6231_vm9 = vcmp.ge.f32.partialorder %v6199_v32, 0.0  ;;  %v6263_v62 = vmul.f32 %v6199_v32, %v16799_v50  ;;  %v6200_v27 = vadd.f32 %v17335_v46, %v6120_v53  ;;  %14245 = vmatprep.mubr.msk.bf16.mxu1 %vm3442_vm3, %v17475_v58  ;;  %v17540_v29 = vpack.c.bf16 %v6348_v51, %v6347_v57  ;;  %v6351_v53 = vld [vmem:[#allocation2 + $0xf0] sm:$0xff]  ;;  %v6881_v7 = vld [vmem:[#allocation2 + $0x22] sm:$0xff]  ;;  %v6883_v19 = vld [vmem:[#allocation2 + $0x3a] sm:$0xff] }
 0x625   : > { %v6297_v35 = vsel %vm6233_vm8, %v6201_v23, %v6265_v12  ;;  %vm6234_vm10 = vcmp.ge.f32.partialorder %v6202_v48, 0.0  ;;  %v6266_v20 = vmul.f32 %v6202_v48, %v16799_v50  ;;  %v6411_v18 = vld [vmem:[#allocation2 + $0x151] sm:$0xff]  ;;  %v17538_v23 = vpack.c.bf16 %v6346_v25, %v6345_v56  ;;  %v6886_v26 = vld [vmem:[#allocation2 + $0x62] sm:$0xff] }
 0x626   : > { %6329 = vst.msk [vmem:[#allocation2 + $0x181] sm:$0xff] %vm3442_vm3, %v6297_v35  ;;  %v6295_v3 = vsel %vm6231_vm9, %v6199_v32, %v6263_v62  ;;  %vm6232_vm11 = vcmp.ge.f32.partialorder %v6200_v27, 0.0  ;;  %v6264_v43 = vmul.f32 %v6200_v27, %v16799_v50  ;;  %v6409_v24 = vld [vmem:[#allocation2 + $0x139] sm:$0xff]  ;;  %v17548_v62 = vpack.c.bf16 %v6352_v52, %v6351_v53  ;;  %v6356_v35 = vld [vmem:[#allocation2 + $0x128] sm:$0xff] }
 0x627   : > { %6327 = vst.msk [vmem:[#allocation2 + $0x169] sm:$0xff] %vm3442_vm3, %v6295_v3  ;;  %v6298_v9 = vsel %vm6234_vm10, %v6202_v48, %v6266_v20  ;;  %v6412_v45 = vld [vmem:[#allocation2 + $0x159] sm:$0xff]  ;;  %v6353_v20 = vld [vmem:[#allocation2 + $0x108] sm:$0xff]  ;;  %v17575_v41 = vpack.c.bf16 %v6881_v7, %v6880_v30 }
 0x628   : > { %6330 = vst.msk [vmem:[#allocation2 + $0x189] sm:$0xff] %vm3442_vm3, %v6298_v9  ;;  %v6296_v46 = vsel %vm6232_vm11, %v6200_v27, %v6264_v43  ;;  %v6410_v39 = vld [vmem:[#allocation2 + $0x141] sm:$0xff]  ;;  %v17493_v59 = vpack.c.bf16 %v6412_v45, %v6411_v18  ;;  %v6349_v12 = vld [vmem:[#allocation2 + $0xd8] sm:$0xff]  ;;  %v6354_v27 = vld [vmem:[#allocation2 + $0x110] sm:$0xff] }
 0x629   : > { %6328 = vst.msk [vmem:[#allocation2 + $0x171] sm:$0xff] %vm3442_vm3, %v6296_v46  ;;  %v17491_v6 = vpack.c.bf16 %v6410_v39, %v6409_v24  ;;  %v6350_v32 = vld [vmem:[#allocation2 + $0xe0] sm:$0xff]  ;;  %v17554_v3 = vpack.c.bf16 %v6354_v27, %v6353_v20  ;;  %v6360_v46 = vld [vmem:[#allocation2 + $0x158] sm:$0xff]  ;;  %v6359_v18 = vld [vmem:[#allocation2 + $0x150] sm:$0xff] }
 0x62a   : > { %v17546_v48 = vpack.c.bf16 %v6350_v32, %v6349_v12  ;;  %v6355_v43 = vld [vmem:[#allocation2 + $0x120] sm:$0xff]  ;;  %v6357_v24 = vld [vmem:[#allocation2 + $0x138] sm:$0xff]  ;;  %v17564_v37 = vpack.c.bf16 %v6360_v46, %v6359_v18  ;;  %v6884_v38 = vld [vmem:[#allocation2 + $0x4a] sm:$0xff] }
 0x62b   : > { %14246 = vmatmul.mubr.msk.bf16.gmra.mrb[56].mxu1 %vm3442_vm3, %v17491_v6  ;;  %v17556_v9 = vpack.c.bf16 %v6356_v35, %v6355_v43  ;;  %v6358_v45 = vld [vmem:[#allocation2 + $0x140] sm:$0xff]  ;;  %v15992_v4 = vld [vmem:[%s18552_s3 + $0x38] sm:$0xff]   ;;  %v6887_v25 = vld [vmem:[#allocation2 + $0x6a] sm:$0xff] }
 0x62c   : > { %14249 = vmatprep.mubr.msk.bf16.mxu1 %vm3442_vm3, %v17493_v59  ;;  %v17562_v39 = vpack.c.bf16 %v6358_v45, %v6357_v24  ;;  %v17592_v56 = vpack.c.bf16 %v6887_v25, %v6886_v26  ;;  %v6889_v57 = vld [vmem:[#allocation2 + $0x82] sm:$0xff]  ;;  %v6890_v32 = vld [vmem:[#allocation2 + $0x92] sm:$0xff]  ;;  %v6891_v52 = vld [vmem:[#allocation2 + $0x9a] sm:$0xff] }
 0x62d   : > { %v17600_v53 = vpack.c.bf16 %v6891_v52, %v6890_v32  ;;  %v6892_v27 = vld [vmem:[#allocation2 + $0xaa] sm:$0xff]  ;;  %v6893_v35 = vld [vmem:[#allocation2 + $0xb2] sm:$0xff]  ;;  %v6894_v20 = vld [vmem:[#allocation2 + $0xc2] sm:$0xff] }
 0x62e   : > { %v6413_v5 = vld [vmem:[#allocation2 + $0x169] sm:$0xff]  ;;  %v17606_v45 = vpack.c.bf16 %v6893_v35, %v6892_v27  ;;  %v6896_v24 = vld [vmem:[#allocation2 + $0xda] sm:$0xff]  ;;  %v6901_v30 = vld [vmem:[#allocation2 + $0x112] sm:$0xff] }
 0x62f   : > { %v6895_v43 = vld [vmem:[#allocation2 + $0xca] sm:$0xff]  ;;  %v6897_v18 = vld [vmem:[#allocation2 + $0xe2] sm:$0xff]  ;;  %v6906_v26 = vld [vmem:[#allocation2 + $0x152] sm:$0xff] }
 0x630   : > { %v6414_v42 = vld [vmem:[#allocation2 + $0x171] sm:$0xff]  ;;  %v17608_v46 = vpack.c.bf16 %v6895_v43, %v6894_v20  ;;  %v6902_v7 = vld [vmem:[#allocation2 + $0x122] sm:$0xff]  ;;  %v6907_v25 = vld [vmem:[#allocation2 + $0x15a] sm:$0xff] }
 0x631   : > { %v17499_v61 = vpack.c.bf16 %v6414_v42, %v6413_v5  ;;  %v6879_v5 = vld [vmem:[#allocation2 + $0xa] sm:$0xff]  ;;  %v6909_v52 = vld [vmem:[#allocation2 + $0x172] sm:$0xff] }
 0x632   : > { %v6362_v42 = vld [vmem:[#allocation2 + $0x170] sm:$0xff]  ;;  %v6910_v40 = vpack.c.bf16 %v6879_v5, %v6878_v31  ;;  %v6899_v5 = vld [vmem:[#allocation2 + $0xfa] sm:$0xff]  ;;  %v15994_v35 = vld [vmem:[%s18552_s3 + $0x48] sm:$0xff]  }
 0x633   : > { %14250 = vmatmul.mubr.msk.bf16.gmra.mrb[60].mxu1 %vm3442_vm3, %v17499_v61  ;;  %v6898_v31 = vld [vmem:[#allocation2 + $0xf2] sm:$0xff]  ;;  %v6908_v32 = vld [vmem:[#allocation2 + $0x16a] sm:$0xff] }
 0x634   : > { %14257 = vmatprep.mubr.msk.bf16.mxu1 %vm3442_vm3, %v6363_v44  ;;  %v6361_v44 = vld [vmem:[#allocation2 + $0x168] sm:$0xff]  ;;  %v17638_v27 = vpack.c.bf16 %v6909_v52, %v6908_v32  ;;  %v15995_v20 = vld [vmem:[%s18552_s3 + $0x50] sm:$0xff]  }
 0x635   : > { %v17570_v34 = vpack.c.bf16 %v6362_v42, %v6361_v44  ;;  %v17614_v42 = vpack.c.bf16 %v6897_v18, %v6896_v24  ;;  %v17616_v44 = vpack.c.bf16 %v6899_v5, %v6898_v31  ;;  %v15996_v24 = vld [vmem:[%s18552_s3 + $0x58] sm:$0xff]   ;;  %v15997_v18 = vld [vmem:[%s18552_s3 + $0x60] sm:$0xff]  }
 0x636   : > { %v8415_v31 = vld [vmem:[#allocation2 + $0x81] sm:$0xff]  ;;  %v8417_v5 = vld [vmem:[#allocation2 + $0x99] sm:$0xff] }
 0x637   : > { %v8420_v32 = vld [vmem:[#allocation2 + $0xc1] sm:$0xff] }
 0x63b   : > { %14258 = vmatmul.mubr.msk.bf16.vlgmr.msra.gmra.mrb[32].mxu1 %vm3442_vm3, %v17504_v17 }
 0x63c   : > { %14261 = vmatprep.mubr.msk.bf16.mxu1 %vm3442_vm3, %v17509_v14  ;;  %14290 = vmatpush3.bf16.msra.mxu1 %v17383_v55  ;;  %v6342_v55 = vld [vmem:[#allocation2 + $0x80] sm:$0xff] }
 0x63d   : > { %14291 = vmatprep.subr.bf16.mxu1 %v15990_v47  ;;  %v17530_v16 = vpack.c.bf16 %v6342_v55, %v6341_v10  ;;  %v15993_v55 = vld [vmem:[%s18552_s3 + $0x40] sm:$0xff]   ;;  %v6885_v10 = vld [vmem:[#allocation2 + $0x52] sm:$0xff] }
 0x63e   : > { %v17590_v51 = vpack.c.bf16 %v6885_v10, %v6884_v38  ;;  %v6904_v38 = vld [vmem:[#allocation2 + $0x13a] sm:$0xff]  ;;  %v6905_v10 = vld [vmem:[#allocation2 + $0x142] sm:$0xff] }
 0x640   : > { %14292 = vmatpush3.bf16.msra.mxu1 %v15990_v47  ;;  %v6882_v47 = vld [vmem:[#allocation2 + $0x32] sm:$0xff] }
 0x641   : > { %14325 = vmatprep.subr.bf16.mxu1 %v17519_v63  ;;  %v17580_v21 = vpack.c.bf16 %v6883_v19, %v6882_v47  ;;  %v6903_v47 = vld [vmem:[#allocation2 + $0x12a] sm:$0xff] }
 0x643   : > { %14262 = vmatmul.mubr.msk.bf16.gmra.mrb[36].mxu1 %vm3442_vm3, %v17521_v22 }
 0x644   : > { %14265 = vmatprep.mubr.msk.bf16.mxu1 %vm3442_vm3, %v17524_v36 }
 0x64b   : > { %14266 = vmatmul.mubr.msk.bf16.gmra.mrb[40].mxu1 %vm3442_vm3, %v17530_v16 }
 0x64c   : > { %14269 = vmatprep.mubr.msk.bf16.mxu1 %vm3442_vm3, %v17532_v2 }
 0x653   : > { %14270 = vmatmul.mubr.msk.bf16.gmra.mrb[44].mxu1 %vm3442_vm3, %v17538_v23 }
 0x654   : > { %14273 = vmatprep.mubr.msk.bf16.mxu1 %vm3442_vm3, %v17540_v29 }
 0x65b   : > { %14274 = vmatmul.mubr.msk.bf16.gmra.mrb[48].mxu1 %vm3442_vm3, %v17546_v48 }
 0x65c   : > { %14277 = vmatprep.mubr.msk.bf16.mxu1 %vm3442_vm3, %v17548_v62 }
 0x663   : > { %14278 = vmatmul.mubr.msk.bf16.gmra.mrb[52].mxu1 %vm3442_vm3, %v17554_v3 }
 0x664   : > { %14281 = vmatprep.mubr.msk.bf16.mxu1 %vm3442_vm3, %v17556_v9 }
 0x66b   : > { %14282 = vmatmul.mubr.msk.bf16.gmra.mrb[56].mxu1 %vm3442_vm3, %v17562_v39 }
 0x66c   : > { %14285 = vmatprep.mubr.msk.bf16.mxu1 %vm3442_vm3, %v17564_v37 }
 0x673   : > { %14286 = vmatmul.mubr.msk.bf16.gmra.mrb[60].mxu1 %vm3442_vm3, %v17570_v34 }
 0x674   : > { %14293 = vmatprep.mubr.msk.bf16.mxu1 %vm3442_vm3, %v6910_v40  ;;  %v6900_v40 = vld [vmem:[#allocation2 + $0x10a] sm:$0xff] }
 0x675   : > { %v17622_v19 = vpack.c.bf16 %v6901_v30, %v6900_v40  ;;  %v8414_v40 = vld [vmem:[#allocation2 + $0x79] sm:$0xff] }
 0x676   : > { %v8443_v30 = vpack.c.bf16 %v8415_v31, %v8414_v40 }
 0x67b   : > { %14294 = vmatmul.mubr.msk.bf16.vlgmr.msra.gmra.mrb[32].mxu1 %vm3442_vm3, %v17575_v41 }
 0x67c   : > { %14297 = vmatprep.mubr.msk.bf16.mxu1 %vm3442_vm3, %v17580_v21  ;;  %14326 = vmatpush3.bf16.msra.mxu1 %v17519_v63  ;;  %v6888_v63 = vld [vmem:[#allocation2 + $0x7a] sm:$0xff] }
 0x67d   : > { %14327 = vmatprep.subr.bf16.mxu1 %v15992_v4  ;;  %v17598_v12 = vpack.c.bf16 %v6889_v57, %v6888_v63  ;;  %v17630_v63 = vpack.c.bf16 %v6905_v10, %v6904_v38  ;;  %v17632_v57 = vpack.c.bf16 %v6907_v25, %v6906_v26  ;;  %v8419_v38 = vld [vmem:[#allocation2 + $0xb1] sm:$0xff]  ;;  %v8421_v10 = vld [vmem:[#allocation2 + $0xc9] sm:$0xff] }
 0x67e   : > { %v8418_v26 = vld [vmem:[#allocation2 + $0xa9] sm:$0xff]  ;;  %v8446_v52 = vpack.c.bf16 %v8421_v10, %v8420_v32 }
 0x67f   : > { %v8445_v25 = vpack.c.bf16 %v8419_v38, %v8418_v26  ;;  %v16006_v38 = vld [vmem:[%s18553_s4 + $0x8] sm:$0xff]  }
 0x680   : > { %14328 = vmatpush3.bf16.msra.mxu1 %v15992_v4  ;;  %v17624_v4 = vpack.c.bf16 %v6903_v47, %v6902_v7  ;;  %v8416_v7 = vld [vmem:[#allocation2 + $0x91] sm:$0xff] }
 0x681   : > { %14361 = vmatprep.subr.bf16.mxu1 %v15993_v55  ;;  %v8444_v47 = vpack.c.bf16 %v8417_v5, %v8416_v7 }
 0x683   : > { %14298 = vmatmul.mubr.msk.bf16.gmra.mrb[36].mxu1 %vm3442_vm3, %v17590_v51 }
 0x684   : > { %14301 = vmatprep.mubr.msk.bf16.mxu1 %vm3442_vm3, %v17592_v56 }
 0x68b   : > { %14302 = vmatmul.mubr.msk.bf16.gmra.mrb[40].mxu1 %vm3442_vm3, %v17598_v12 }
 0x68c   : > { %14305 = vmatprep.mubr.msk.bf16.mxu1 %vm3442_vm3, %v17600_v53 }
 0x693   : > { %14306 = vmatmul.mubr.msk.bf16.gmra.mrb[44].mxu1 %vm3442_vm3, %v17606_v45 }
 0x694   : > { %14309 = vmatprep.mubr.msk.bf16.mxu1 %vm3442_vm3, %v17608_v46 }
 0x69b   : > { %14310 = vmatmul.mubr.msk.bf16.gmra.mrb[48].mxu1 %vm3442_vm3, %v17614_v42 }
 0x69c   : > { %14313 = vmatprep.mubr.msk.bf16.mxu1 %vm3442_vm3, %v17616_v44 }
 0x6a3   : > { %14314 = vmatmul.mubr.msk.bf16.gmra.mrb[52].mxu1 %vm3442_vm3, %v17622_v19 }
 0x6a4   : > { %14317 = vmatprep.mubr.msk.bf16.mxu1 %vm3442_vm3, %v17624_v4 }
 0x6ab   : > { %14318 = vmatmul.mubr.msk.bf16.gmra.mrb[56].mxu1 %vm3442_vm3, %v17630_v63 }
 0x6ac   : > { %14321 = vmatprep.mubr.msk.bf16.mxu1 %vm3442_vm3, %v17632_v57 }
 0x6b3   : > { %14322 = vmatmul.mubr.msk.bf16.gmra.mrb[60].mxu1 %vm3442_vm3, %v17638_v27 }
 0x6b4   : > { %14329 = vmatprep.mubr.msk.bf16.mxu1 %vm3442_vm3, %v17504_v17  ;;  %v7215_v17 = vld [vmem:[#allocation2 + $0x188] sm:$0xff] }
 0x6bb   : > { %14330 = vmatmul.mubr.msk.bf16.vlgmr.msra.gmra.mrb[32].mxu1 %vm3442_vm3, %v17509_v14 }
 0x6bc   : > { %14333 = vmatprep.mubr.msk.bf16.mxu1 %vm3442_vm3, %v17521_v22  ;;  %14362 = vmatpush3.bf16.msra.mxu1 %v15993_v55  ;;  %v7214_v55 = vld [vmem:[#allocation2 + $0x180] sm:$0xff] }
 0x6bd   : > { %14363 = vmatprep.subr.bf16.mxu1 %v15994_v35  ;;  %v17678_v43 = vpack.c.bf16 %v7215_v17, %v7214_v55  ;;  %v8422_v17 = vld [vmem:[#allocation2 + $0xd9] sm:$0xff] }
 0x6c0   : > { %14364 = vmatpush3.bf16.msra.mxu1 %v15994_v35  ;;  %v8423_v35 = vld [vmem:[#allocation2 + $0xe1] sm:$0xff] }
 0x6c1   : > { %14397 = vmatprep.subr.bf16.mxu1 %v15995_v20  ;;  %v8447_v55 = vpack.c.bf16 %v8423_v35, %v8422_v17 }
 0x6c3   : > { %14334 = vmatmul.mubr.msk.bf16.gmra.mrb[36].mxu1 %vm3442_vm3, %v17524_v36 }
 0x6c4   : > { %14337 = vmatprep.mubr.msk.bf16.mxu1 %vm3442_vm3, %v17530_v16 }
 0x6cb   : > { %14338 = vmatmul.mubr.msk.bf16.gmra.mrb[40].mxu1 %vm3442_vm3, %v17532_v2 }
 0x6cc   : > { %14341 = vmatprep.mubr.msk.bf16.mxu1 %vm3442_vm3, %v17538_v23 }
 0x6d3   : > { %14342 = vmatmul.mubr.msk.bf16.gmra.mrb[44].mxu1 %vm3442_vm3, %v17540_v29 }
 0x6d4   : > { %14345 = vmatprep.mubr.msk.bf16.mxu1 %vm3442_vm3, %v17546_v48 }
 0x6db   : > { %14346 = vmatmul.mubr.msk.bf16.gmra.mrb[48].mxu1 %vm3442_vm3, %v17548_v62 }
 0x6dc   : > { %14349 = vmatprep.mubr.msk.bf16.mxu1 %vm3442_vm3, %v17554_v3 }
 0x6e3   : > { %14350 = vmatmul.mubr.msk.bf16.gmra.mrb[52].mxu1 %vm3442_vm3, %v17556_v9 }
 0x6e4   : > { %14353 = vmatprep.mubr.msk.bf16.mxu1 %vm3442_vm3, %v17562_v39 }
 0x6eb   : > { %14354 = vmatmul.mubr.msk.bf16.gmra.mrb[56].mxu1 %vm3442_vm3, %v17564_v37 }
 0x6ec   : > { %14357 = vmatprep.mubr.msk.bf16.mxu1 %vm3442_vm3, %v17570_v34 }
 0x6f3   : > { %14358 = vmatmul.mubr.msk.bf16.gmra.mrb[60].mxu1 %vm3442_vm3, %v17678_v43 }
 0x6f4   : > { %14365 = vmatprep.mubr.msk.bf16.mxu1 %vm3442_vm3, %v17362_v11  ;;  %v7521_v11 = vld [vmem:[#allocation2 + $0x189] sm:$0xff] }
 0x6fb   : > { %14366 = vmatmul.mubr.msk.bf16.vlgmr.msra.gmra.mrb[32].mxu1 %vm3442_vm3, %v17368_v15  ;;  %v7520_v15 = vld [vmem:[#allocation2 + $0x181] sm:$0xff] }
 0x6fc   : > { %14369 = vmatprep.mubr.msk.bf16.mxu1 %vm3442_vm3, %v17391_v1  ;;  %14398 = vmatpush3.bf16.msra.mxu1 %v15995_v20  ;;  %v17718_v1 = vpack.c.bf16 %v7521_v11, %v7520_v15  ;;  %v8425_v20 = vld [vmem:[#allocation2 + $0xf9] sm:$0xff]  ;;  %v8439_v11 = vld [vmem:[#allocation2 + $0x1a1] sm:$0xff] }
 0x6fd   : > { %14399 = vmatprep.subr.bf16.mxu1 %v15996_v24 }
 0x700   : > { %14400 = vmatpush3.bf16.msra.mxu1 %v15996_v24 }
 0x701   : > { %14433 = vmatprep.subr.bf16.mxu1 %v15997_v18 }
 0x703   : > { %14370 = vmatmul.mubr.msk.bf16.gmra.mrb[36].mxu1 %vm3442_vm3, %v17395_v0  ;;  %v15998_v0 = vld [vmem:[%s18552_s3 + $0x68] sm:$0xff]  }
 0x704   : > { %14373 = vmatprep.mubr.msk.bf16.mxu1 %vm3442_vm3, %v17412_v54  ;;  %v15999_v54 = vld [vmem:[%s18552_s3 + $0x70] sm:$0xff]  }
 0x70b   : > { %14374 = vmatmul.mubr.msk.bf16.gmra.mrb[40].mxu1 %vm3442_vm3, %v17415_v60  ;;  %v7826_v60 = vld [vmem:[#allocation2 + $0x182] sm:$0xff] }
 0x70c   : > { %14377 = vmatprep.mubr.msk.bf16.mxu1 %vm3442_vm3, %v17432_v13  ;;  %v7827_v13 = vld [vmem:[#allocation2 + $0x18a] sm:$0xff] }
 0x713   : > { %14378 = vmatmul.mubr.msk.bf16.gmra.mrb[44].mxu1 %vm3442_vm3, %v17435_v33  ;;  %v17758_v33 = vpack.c.bf16 %v7827_v13, %v7826_v60 }
 0x714   : > { %14381 = vmatprep.mubr.msk.bf16.mxu1 %vm3442_vm3, %v17452_v8  ;;  %v16000_v8 = vld [vmem:[%s18552_s3 + $0x78] sm:$0xff]  }
 0x71b   : > { %14382 = vmatmul.mubr.msk.bf16.gmra.mrb[48].mxu1 %vm3442_vm3, %v17455_v49  ;;  %v16001_v49 = vld [vmem:[%s18552_s3 + $0x80] sm:$0xff]  }
 0x71c   : > { %14385 = vmatprep.mubr.msk.bf16.mxu1 %vm3442_vm3, %v17472_v28 }
 0x723   : > { %14386 = vmatmul.mubr.msk.bf16.gmra.mrb[52].mxu1 %vm3442_vm3, %v17475_v58 }
 0x724   : > { %14389 = vmatprep.mubr.msk.bf16.mxu1 %vm3442_vm3, %v17491_v6 }
 0x72b   : > { %14390 = vmatmul.mubr.msk.bf16.gmra.mrb[56].mxu1 %vm3442_vm3, %v17493_v59 }
 0x72c   : > { %14393 = vmatprep.mubr.msk.bf16.mxu1 %vm3442_vm3, %v17499_v61 }
 0x733   : > { %14394 = vmatmul.mubr.msk.bf16.gmra.mrb[60].mxu1 %vm3442_vm3, %v17718_v1 }
 0x734   : > { %14401 = vmatprep.mubr.msk.bf16.mxu1 %vm3442_vm3, %v17575_v41 }
 0x73b   : > { %14402 = vmatmul.mubr.msk.bf16.vlgmr.msra.gmra.mrb[32].mxu1 %vm3442_vm3, %v17580_v21 }
 0x73c   : > { %14405 = vmatprep.mubr.msk.bf16.mxu1 %vm3442_vm3, %v17590_v51  ;;  %14434 = vmatpush3.bf16.msra.mxu1 %v15997_v18  ;;  %v8438_v18 = vld [vmem:[#allocation2 + $0x199] sm:$0xff] }
 0x73d   : > { %14435 = vmatprep.subr.bf16.mxu1 %v15998_v0  ;;  %v8455_v15 = vpack.c.bf16 %v8439_v11, %v8438_v18 }
 0x740   : > { %14436 = vmatpush3.bf16.msra.mxu1 %v15998_v0 }
 0x741   : > { %14469 = vmatprep.subr.bf16.mxu1 %v15999_v54 }
 0x743   : > { %14406 = vmatmul.mubr.msk.bf16.gmra.mrb[36].mxu1 %vm3442_vm3, %v17592_v56 }
 0x744   : > { %14409 = vmatprep.mubr.msk.bf16.mxu1 %vm3442_vm3, %v17598_v12 }
 0x74b   : > { %14410 = vmatmul.mubr.msk.bf16.gmra.mrb[40].mxu1 %vm3442_vm3, %v17600_v53 }
 0x74c   : > { %14413 = vmatprep.mubr.msk.bf16.mxu1 %vm3442_vm3, %v17606_v45 }
 0x753   : > { %14414 = vmatmul.mubr.msk.bf16.gmra.mrb[44].mxu1 %vm3442_vm3, %v17608_v46 }
 0x754   : > { %14417 = vmatprep.mubr.msk.bf16.mxu1 %vm3442_vm3, %v17614_v42 }
 0x75b   : > { %14418 = vmatmul.mubr.msk.bf16.gmra.mrb[48].mxu1 %vm3442_vm3, %v17616_v44 }
 0x75c   : > { %14421 = vmatprep.mubr.msk.bf16.mxu1 %vm3442_vm3, %v17622_v19 }
 0x763   : > { %14422 = vmatmul.mubr.msk.bf16.gmra.mrb[52].mxu1 %vm3442_vm3, %v17624_v4 }
 0x764   : > { %14425 = vmatprep.mubr.msk.bf16.mxu1 %vm3442_vm3, %v17630_v63 }
 0x76b   : > { %14426 = vmatmul.mubr.msk.bf16.gmra.mrb[56].mxu1 %vm3442_vm3, %v17632_v57 }
 0x76c   : > { %14429 = vmatprep.mubr.msk.bf16.mxu1 %vm3442_vm3, %v17638_v27 }
 0x773   : > { %14430 = vmatmul.mubr.msk.bf16.gmra.mrb[60].mxu1 %vm3442_vm3, %v17758_v33 }
 0x774   : > { %14437 = vmatprep.mubr.msk.bf16.mxu1 %vm3442_vm3, %v17509_v14  ;;  %v8132_v14 = vld [vmem:[#allocation2 + $0x198] sm:$0xff] }
 0x77b   : > { %14438 = vmatmul.mubr.msk.bf16.vlgmr.msra.gmra.mrb[32].mxu1 %vm3442_vm3, %v17521_v22  ;;  %v8133_v22 = vld [vmem:[#allocation2 + $0x1a0] sm:$0xff] }
 0x77c   : > { %14441 = vmatprep.mubr.msk.bf16.mxu1 %vm3442_vm3, %v17524_v36  ;;  %14470 = vmatpush3.bf16.msra.mxu1 %v15999_v54  ;;  %v8149_v36 = vpack.c.bf16 %v8133_v22, %v8132_v14 }
 0x77d   : > { %14471 = vmatprep.subr.bf16.mxu1 %v16000_v8 }
 0x780   : > { %14472 = vmatpush3.bf16.msra.mxu1 %v16000_v8 }
 0x781   : > { %14505 = vmatprep.subr.bf16.mxu1 %v16001_v49 }
 0x783   : > { %14442 = vmatmul.mubr.msk.bf16.gmra.mrb[36].mxu1 %vm3442_vm3, %v17530_v16  ;;  %v8409_v16 = vld [vmem:[#allocation2 + $0x39] sm:$0xff] }
 0x784   : > { %14445 = vmatprep.mubr.msk.bf16.mxu1 %vm3442_vm3, %v17532_v2  ;;  %v8408_v2 = vld [vmem:[#allocation2 + $0x31] sm:$0xff] }
 0x78b   : > { %14446 = vmatmul.mubr.msk.bf16.gmra.mrb[40].mxu1 %vm3442_vm3, %v17538_v23  ;;  %v8440_v23 = vpack.c.bf16 %v8409_v16, %v8408_v2 }
 0x78c   : > { %14449 = vmatprep.mubr.msk.bf16.mxu1 %vm3442_vm3, %v17540_v29  ;;  %v16003_v29 = vld [vmem:[%s18553_s4 + $0x10] sm:$0xff]  }
 0x78d   : > { %14541 = vmatprep.subr.bf16.mxu0 %v16003_v29 }
 0x78e   : > { %14542 = vmatpush3.bf16.msra.mxu0 %v16003_v29 }
 0x793   : > { %14450 = vmatmul.mubr.msk.bf16.gmra.mrb[44].mxu1 %vm3442_vm3, %v17546_v48  ;;  %v16004_v48 = vld [vmem:[%s18553_s4 + $0x18] sm:$0xff]  }
 0x794   : > { %14453 = vmatprep.mubr.msk.bf16.mxu1 %vm3442_vm3, %v17548_v62  ;;  %v8411_v62 = vld [vmem:[#allocation2 + $0x51] sm:$0xff]  ;;  %14543 = vmatprep.subr.bf16.mxu0 %v16004_v48 }
 0x795   : > { %14544 = vmatpush3.bf16.msra.mxu0 %v16004_v48 }
 0x79b   : > { %14454 = vmatmul.mubr.msk.bf16.gmra.mrb[48].mxu1 %vm3442_vm3, %v17554_v3  ;;  %v8413_v3 = vld [vmem:[#allocation2 + $0x69] sm:$0xff] }
 0x79c   : > { %14457 = vmatprep.mubr.msk.bf16.mxu1 %vm3442_vm3, %v17556_v9  ;;  %v8410_v9 = vld [vmem:[#allocation2 + $0x49] sm:$0xff] }
 0x7a3   : > { %14458 = vmatmul.mubr.msk.bf16.gmra.mrb[52].mxu1 %vm3442_vm3, %v17562_v39  ;;  %v8441_v39 = vpack.c.bf16 %v8411_v62, %v8410_v9 }
 0x7a4   : > { %14461 = vmatprep.mubr.msk.bf16.mxu1 %vm3442_vm3, %v17564_v37  ;;  %v8412_v37 = vld [vmem:[#allocation2 + $0x61] sm:$0xff] }
 0x7a5   : > { %v8442_v41 = vpack.c.bf16 %v8413_v3, %v8412_v37 }
 0x7ab   : > { %14462 = vmatmul.mubr.msk.bf16.gmra.mrb[56].mxu1 %vm3442_vm3, %v17570_v34  ;;  %v16002_v34 = vld [vmem:[%s18552_s3 + $0x88] sm:$0xff]  }
 0x7ac   : > { %14465 = vmatprep.mubr.msk.bf16.mxu1 %vm3442_vm3, %v17678_v43  ;;  %v8424_v43 = vld [vmem:[#allocation2 + $0xf1] sm:$0xff] }
 0x7ad   : > { %v8448_v24 = vpack.c.bf16 %v8425_v20, %v8424_v43 }
 0x7b3   : > { %14466 = vmatmul.mubr.msk.bf16.gmra.mrb[60].mxu1 %vm3442_vm3, %v8149_v36 }
 0x7b4   : > { %14473 = vmatprep.mubr.msk.bf16.mxu1 %vm3442_vm3, %v8440_v23 }
 0x7bb   : > { %14474 = vmatmul.mubr.msk.bf16.vlgmr.msra.gmra.mrb[32].mxu1 %vm3442_vm3, %v8441_v39 }
 0x7bc   : > { %14477 = vmatprep.mubr.msk.bf16.mxu1 %vm3442_vm3, %v8442_v41  ;;  %14506 = vmatpush3.bf16.msra.mxu1 %v16001_v49 }
 0x7bd   : > { %14507 = vmatprep.subr.bf16.mxu1 %v16002_v34 }
 0x7c0   : > { %14508 = vmatpush3.bf16.msra.mxu1 %v16002_v34 }
 0x7c3   : > { %14478 = vmatmul.mubr.msk.bf16.gmra.mrb[36].mxu1 %vm3442_vm3, %v8443_v30 }
 0x7c4   : > { %14481 = vmatprep.mubr.msk.bf16.mxu1 %vm3442_vm3, %v8444_v47 }
 0x7cb   : > { %14482 = vmatmul.mubr.msk.bf16.gmra.mrb[40].mxu1 %vm3442_vm3, %v8445_v25 }
 0x7cc   : > { %14485 = vmatprep.mubr.msk.bf16.mxu1 %vm3442_vm3, %v8446_v52 }
 0x7d3   : > { %14486 = vmatmul.mubr.msk.bf16.gmra.mrb[44].mxu1 %vm3442_vm3, %v8447_v55 }
 0x7d4   : > { %14489 = vmatprep.mubr.msk.bf16.mxu1 %vm3442_vm3, %v8448_v24  ;;  %v17919_v24 = vld [vmem:[%s18553_s4 + $0x20] sm:$0xff]  }
 0x7db   : > { %14490 = vmatmul.mubr.msk.bf16.gmra.mrb[48].mxu1 %vm3442_vm3, %v17472_v28  ;;  %v8744_v28 = vld [vmem:[#allocation2 + $0x19a] sm:$0xff] }
 0x7dc   : > { %14493 = vmatprep.mubr.msk.bf16.mxu1 %vm3442_vm3, %v17475_v58  ;;  %v8745_v58 = vld [vmem:[#allocation2 + $0x1a2] sm:$0xff] }
 0x7e3   : > { %14494 = vmatmul.mubr.msk.bf16.gmra.mrb[52].mxu1 %vm3442_vm3, %v17491_v6  ;;  %v8761_v6 = vpack.c.bf16 %v8745_v58, %v8744_v28 }
 0x7e4   : > { %14497 = vmatprep.mubr.msk.bf16.mxu1 %vm3442_vm3, %v17493_v59  ;;  %v9239_v59 = vld [vmem:[#allocation2 + $0x1] sm:$0xff] }
 0x7eb   : > { %14498 = vmatmul.mubr.msk.bf16.gmra.mrb[56].mxu1 %vm3442_vm3, %v17499_v61  ;;  %v9240_v61 = vld [vmem:[#allocation2 + $0x9] sm:$0xff] }
 0x7ec   : > { %14501 = vmatprep.mubr.msk.bf16.mxu1 %vm3442_vm3, %v17718_v1 }
 0x7f3   : > { %14502 = vmatmul.mubr.msk.bf16.gmra.mrb[60].mxu1 %vm3442_vm3, %v8455_v15 }
 0x7f4   : > { %14509 = vmatprep.mubr.msk.bf16.mxu1 %vm3442_vm3, %v17580_v21  ;;  %v9271_v21 = vpack.c.bf16 %v9240_v61, %v9239_v59 }
 0x7f6   : > { %14545 = vmatprep.mubr.msk.bf16.mxu0 %vm3442_vm3, %v9271_v21 }
 0x7fb   : > { %14510 = vmatmul.mubr.msk.bf16.vlgmr.msra.gmra.mrb[32].mxu1 %vm3442_vm3, %v17590_v51  ;;  %v17865_v51 = vld [vmem:[%s18553_s4] sm:$0xff]  }
 0x7fc   : > { %14513 = vmatprep.mubr.msk.bf16.mxu1 %vm3442_vm3, %v17592_v56  ;;  %14577 = vmatprep.subr.bf16.mxu0 %v17865_v51  ;;  %v17871_v56 = vld [vmem:[%s18556_s7] ss:$0 sm:$0xff] }
 0x803   : > { %14514 = vmatmul.mubr.msk.bf16.gmra.mrb[36].mxu1 %vm3442_vm3, %v17598_v12 }
 0x804   : > { %14517 = vmatprep.mubr.msk.bf16.mxu1 %vm3442_vm3, %v17600_v53 }
 0x80b   : > { %14518 = vmatmul.mubr.msk.bf16.gmra.mrb[40].mxu1 %vm3442_vm3, %v17606_v45 }
 0x80c   : > { %14521 = vmatprep.mubr.msk.bf16.mxu1 %vm3442_vm3, %v17608_v46 }
 0x813   : > { %14522 = vmatmul.mubr.msk.bf16.gmra.mrb[44].mxu1 %vm3442_vm3, %v17614_v42 }
 0x814   : > { %14525 = vmatprep.mubr.msk.bf16.mxu1 %vm3442_vm3, %v17616_v44 }
 0x81b   : > { %14526 = vmatmul.mubr.msk.bf16.gmra.mrb[48].mxu1 %vm3442_vm3, %v17622_v19 }
 0x81c   : > { %14529 = vmatprep.mubr.msk.bf16.mxu1 %vm3442_vm3, %v17624_v4 }
 0x823   : > { %14530 = vmatmul.mubr.msk.bf16.gmra.mrb[52].mxu1 %vm3442_vm3, %v17630_v63 }
 0x824   : > { %14533 = vmatprep.mubr.msk.bf16.mxu1 %vm3442_vm3, %v17632_v57 }
 0x82b   : > { %14534 = vmatmul.mubr.msk.bf16.gmra.mrb[56].mxu1 %vm3442_vm3, %v17638_v27 }
 0x82c   : > { %14537 = vmatprep.mubr.msk.bf16.mxu1 %vm3442_vm3, %v17758_v33 }
 0x833   : > { %14538 = vmatmul.mubr.msk.bf16.gmra.mrb[60].mxu1 %vm3442_vm3, %v8761_v6 }
 0x8ce   : > { %v14511_v12 = vpop.f32.mrb[32].mxu1 }
 0x8cf   : > { %v9029_v53 = vadd.f32 %v14511_v12, %v17871_v56  ;;  %v8861_v45 = vpop.f32.mrb[33].mxu1 }
 0x8d0   : > { %v9027_v46 = vadd.f32 %v17871_v56, %v8861_v45  ;;  %v14512_v42 = vpop.f32.mrb[34].mxu1 }
 0x8d1   : > { %vm9061_vm12 = vcmp.ge.f32.partialorder %v9029_v53, 0.0  ;;  %v9093_v44 = vmul.f32 %v9029_v53, %v16799_v50  ;;  %v9030_v19 = vadd.f32 %v14512_v42, %v17871_v56  ;;  %v8864_v4 = vpop.f32.mrb[35].mxu1 }
 0x8d2   : > { %vm9059_vm13 = vcmp.ge.f32.partialorder %v9027_v46, 0.0  ;;  %v9091_v63 = vmul.f32 %v9027_v46, %v16799_v50  ;;  %v9028_v57 = vadd.f32 %v17871_v56, %v8864_v4 }
 0x8d3   : > { %v9125_v27 = vsel %vm9061_vm12, %v9029_v53, %v9093_v44  ;;  %vm9062_vm14 = vcmp.ge.f32.partialorder %v9030_v19, 0.0  ;;  %v9094_v1 = vmul.f32 %v9030_v19, %v16799_v50 }
 0x8d4   : > { %9157 = vst.msk [vmem:[#allocation2 + $0x31] sm:$0xff] %vm3442_vm3, %v9125_v27  ;;  %v9123_v0 = vsel %vm9059_vm13, %v9027_v46, %v9091_v63  ;;  %vm9060_vm15 = vcmp.ge.f32.partialorder %v9028_v57, 0.0  ;;  %v9092_v54 = vmul.f32 %v9028_v57, %v16799_v50 }
 0x8d5   : > { %9155 = vst.msk [vmem:[#allocation2 + $0x19] sm:$0xff] %vm3442_vm3, %v9123_v0  ;;  %v9126_v60 = vsel %vm9062_vm14, %v9030_v19, %v9094_v1 }
 0x8d6   : > { %9158 = vst.msk [vmem:[#allocation2 + $0x39] sm:$0xff] %vm3442_vm3, %v9126_v60  ;;  %v9124_v13 = vsel %vm9060_vm15, %v9028_v57, %v9092_v54  ;;  %v14515_v33 = vpop.f32.mrb[36].mxu1 }
 0x8d7   : > { %9156 = vst.msk [vmem:[#allocation2 + $0x21] sm:$0xff] %vm3442_vm3, %v9124_v13  ;;  %v9033_v8 = vadd.f32 %v14515_v33, %v17871_v56  ;;  %v8877_v49 = vpop.f32.mrb[37].mxu1 }
 0x8d8   : > { %v9031_v14 = vadd.f32 %v17871_v56, %v8877_v49  ;;  %v14516_v22 = vpop.f32.mrb[38].mxu1 }
 0x8d9   : > { %vm9065_vm1 = vcmp.ge.f32.partialorder %v9033_v8, 0.0  ;;  %v9097_v36 = vmul.f32 %v9033_v8, %v16799_v50  ;;  %v9034_v16 = vadd.f32 %v14516_v22, %v17871_v56  ;;  %v8880_v2 = vpop.f32.mrb[39].mxu1 }
 0x8da   : > { %vm9063_vm2 = vcmp.ge.f32.partialorder %v9031_v14, 0.0  ;;  %v9095_v23 = vmul.f32 %v9031_v14, %v16799_v50  ;;  %v9032_v29 = vadd.f32 %v17871_v56, %v8880_v2 }
 0x8db   : > { %v9129_v48 = vsel %vm9065_vm1, %v9033_v8, %v9097_v36  ;;  %vm9066_vm4 = vcmp.ge.f32.partialorder %v9034_v16, 0.0  ;;  %v9098_v62 = vmul.f32 %v9034_v16, %v16799_v50  ;;  %v9243_v47 = vld [vmem:[#allocation2 + $0x31] sm:$0xff] }
 0x8dc   : > { %9161 = vst.msk [vmem:[#allocation2 + $0x61] sm:$0xff] %vm3442_vm3, %v9129_v48  ;;  %v9127_v3 = vsel %vm9063_vm2, %v9031_v14, %v9095_v23  ;;  %vm9064_vm5 = vcmp.ge.f32.partialorder %v9032_v29, 0.0  ;;  %v9096_v9 = vmul.f32 %v9032_v29, %v16799_v50  ;;  %v9241_v31 = vld [vmem:[#allocation2 + $0x19] sm:$0xff] }
 0x8dd   : > { %9159 = vst.msk [vmem:[#allocation2 + $0x49] sm:$0xff] %vm3442_vm3, %v9127_v3  ;;  %v9130_v39 = vsel %vm9066_vm4, %v9034_v16, %v9098_v62  ;;  %v9244_v37 = vld [vmem:[#allocation2 + $0x39] sm:$0xff] }
 0x8de   : > { %9162 = vst.msk [vmem:[#allocation2 + $0x69] sm:$0xff] %vm3442_vm3, %v9130_v39  ;;  %v9128_v34 = vsel %vm9064_vm5, %v9032_v29, %v9096_v9  ;;  %v14519_v41 = vpop.f32.mrb[40].mxu1  ;;  %v9242_v5 = vld [vmem:[#allocation2 + $0x21] sm:$0xff]  ;;  %v17904_v25 = vpack.c.bf16 %v9244_v37, %v9243_v47 }
 0x8df   : > { %9160 = vst.msk [vmem:[#allocation2 + $0x51] sm:$0xff] %vm3442_vm3, %v9128_v34  ;;  %v9037_v40 = vadd.f32 %v14519_v41, %v17871_v56  ;;  %v8893_v30 = vpop.f32.mrb[41].mxu1  ;;  %v17898_v7 = vpack.c.bf16 %v9242_v5, %v9241_v31 }
 0x8e0   : > { %v9035_v10 = vadd.f32 %v17871_v56, %v8893_v30  ;;  %v14520_v26 = vpop.f32.mrb[42].mxu1 }
 0x8e1   : > { %vm9069_vm6 = vcmp.ge.f32.partialorder %v9037_v40, 0.0  ;;  %v9101_v32 = vmul.f32 %v9037_v40, %v16799_v50  ;;  %v9038_v52 = vadd.f32 %v14520_v26, %v17871_v56  ;;  %v8896_v35 = vpop.f32.mrb[43].mxu1  ;;  %14546 = vmatmul.mubr.msk.bf16.vlgmr.msra.gmra.mrb[32].mxu0 %vm3442_vm3, %v17898_v7 }
 0x8e2   : > { %vm9067_vm7 = vcmp.ge.f32.partialorder %v9035_v10, 0.0  ;;  %v9099_v20 = vmul.f32 %v9035_v10, %v16799_v50  ;;  %v9036_v17 = vadd.f32 %v17871_v56, %v8896_v35  ;;  %14549 = vmatprep.mubr.msk.bf16.mxu0 %vm3442_vm3, %v17904_v25  ;;  %14578 = vmatpush3.bf16.msra.mxu0 %v17865_v51 }
 0x8e3   : > { %v9133_v55 = vsel %vm9069_vm6, %v9037_v40, %v9101_v32  ;;  %vm9070_vm8 = vcmp.ge.f32.partialorder %v9038_v52, 0.0  ;;  %v9102_v43 = vmul.f32 %v9038_v52, %v16799_v50  ;;  %14579 = vmatprep.subr.bf16.mxu0 %v16006_v38  ;;  %v9247_v53 = vld [vmem:[#allocation2 + $0x61] sm:$0xff] }
 0x8e4   : > { %9165 = vst.msk [vmem:[#allocation2 + $0x91] sm:$0xff] %vm3442_vm3, %v9133_v55  ;;  %v9131_v18 = vsel %vm9067_vm7, %v9035_v10, %v9099_v20  ;;  %vm9068_vm9 = vcmp.ge.f32.partialorder %v9036_v17, 0.0  ;;  %v9100_v11 = vmul.f32 %v9036_v17, %v16799_v50  ;;  %v9245_v59 = vld [vmem:[#allocation2 + $0x49] sm:$0xff] }
 0x8e5   : > { %9163 = vst.msk [vmem:[#allocation2 + $0x79] sm:$0xff] %vm3442_vm3, %v9131_v18  ;;  %v9134_v15 = vsel %vm9070_vm8, %v9038_v52, %v9102_v43  ;;  %v9248_v28 = vld [vmem:[#allocation2 + $0x69] sm:$0xff] }
 0x8e6   : > { %9166 = vst.msk [vmem:[#allocation2 + $0x99] sm:$0xff] %vm3442_vm3, %v9134_v15  ;;  %v9132_v58 = vsel %vm9068_vm9, %v9036_v17, %v9100_v11  ;;  %v14523_v6 = vpop.f32.mrb[44].mxu1  ;;  %v9246_v61 = vld [vmem:[#allocation2 + $0x51] sm:$0xff]  ;;  %14580 = vmatpush3.bf16.msra.mxu0 %v16006_v38  ;;  %v17931_v42 = vpack.c.bf16 %v9248_v28, %v9247_v53 }
 0x8e7   : > { %9164 = vst.msk [vmem:[#allocation2 + $0x81] sm:$0xff] %vm3442_vm3, %v9132_v58  ;;  %v9041_v21 = vadd.f32 %v14523_v6, %v17871_v56  ;;  %v8909_v51 = vpop.f32.mrb[45].mxu1  ;;  %v17927_v12 = vpack.c.bf16 %v9246_v61, %v9245_v59  ;;  %14613 = vmatprep.subr.bf16.mxu0 %v17919_v24 }
 0x8e8   : > { %v9039_v45 = vadd.f32 %v17871_v56, %v8909_v51  ;;  %v14524_v46 = vpop.f32.mrb[46].mxu1 }
 0x8e9   : > { %vm9073_vm10 = vcmp.ge.f32.partialorder %v9041_v21, 0.0  ;;  %v9105_v44 = vmul.f32 %v9041_v21, %v16799_v50  ;;  %v9042_v19 = vadd.f32 %v14524_v46, %v17871_v56  ;;  %v8912_v4 = vpop.f32.mrb[47].mxu1  ;;  %14550 = vmatmul.mubr.msk.bf16.gmra.mrb[36].mxu0 %vm3442_vm3, %v17927_v12 }
 0x8ea   : > { %vm9071_vm11 = vcmp.ge.f32.partialorder %v9039_v45, 0.0  ;;  %v9103_v63 = vmul.f32 %v9039_v45, %v16799_v50  ;;  %v9040_v57 = vadd.f32 %v17871_v56, %v8912_v4  ;;  %14553 = vmatprep.mubr.msk.bf16.mxu0 %vm3442_vm3, %v17931_v42 }
 0x8eb   : > { %v9137_v27 = vsel %vm9073_vm10, %v9041_v21, %v9105_v44  ;;  %vm9074_vm12 = vcmp.ge.f32.partialorder %v9042_v19, 0.0  ;;  %v9106_v1 = vmul.f32 %v9042_v19, %v16799_v50  ;;  %v9251_v2 = vld [vmem:[#allocation2 + $0x91] sm:$0xff] }
 0x8ec   : > { %9169 = vst.msk [vmem:[#allocation2 + $0xc1] sm:$0xff] %vm3442_vm3, %v9137_v27  ;;  %v9135_v0 = vsel %vm9071_vm11, %v9039_v45, %v9103_v63  ;;  %vm9072_vm13 = vcmp.ge.f32.partialorder %v9040_v57, 0.0  ;;  %v9104_v54 = vmul.f32 %v9040_v57, %v16799_v50  ;;  %v9249_v49 = vld [vmem:[#allocation2 + $0x79] sm:$0xff] }
 0x8ed   : > { %9167 = vst.msk [vmem:[#allocation2 + $0xa9] sm:$0xff] %vm3442_vm3, %v9135_v0  ;;  %v9138_v60 = vsel %vm9074_vm12, %v9042_v19, %v9106_v1  ;;  %v9252_v13 = vld [vmem:[#allocation2 + $0x99] sm:$0xff] }
 0x8ee   : > { %9170 = vst.msk [vmem:[#allocation2 + $0xc9] sm:$0xff] %vm3442_vm3, %v9138_v60  ;;  %v9136_v33 = vsel %vm9072_vm13, %v9040_v57, %v9104_v54  ;;  %v14527_v8 = vpop.f32.mrb[48].mxu1  ;;  %v9250_v14 = vld [vmem:[#allocation2 + $0x81] sm:$0xff]  ;;  %v17951_v48 = vpack.c.bf16 %v9252_v13, %v9251_v2 }
 0x8ef   : > { %9168 = vst.msk [vmem:[#allocation2 + $0xb1] sm:$0xff] %vm3442_vm3, %v9136_v33  ;;  %v9045_v22 = vadd.f32 %v14527_v8, %v17871_v56  ;;  %v8925_v36 = vpop.f32.mrb[49].mxu1  ;;  %v17948_v16 = vpack.c.bf16 %v9250_v14, %v9249_v49 }
 0x8f0   : > { %v9043_v23 = vadd.f32 %v17871_v56, %v8925_v36  ;;  %v14528_v29 = vpop.f32.mrb[50].mxu1 }
 0x8f1   : > { %vm9077_vm14 = vcmp.ge.f32.partialorder %v9045_v22, 0.0  ;;  %v9109_v62 = vmul.f32 %v9045_v22, %v16799_v50  ;;  %v9046_v3 = vadd.f32 %v14528_v29, %v17871_v56  ;;  %v8928_v9 = vpop.f32.mrb[51].mxu1  ;;  %14554 = vmatmul.mubr.msk.bf16.gmra.mrb[40].mxu0 %vm3442_vm3, %v17948_v16 }
 0x8f2   : > { %vm9075_vm15 = vcmp.ge.f32.partialorder %v9043_v23, 0.0  ;;  %v9107_v39 = vmul.f32 %v9043_v23, %v16799_v50  ;;  %v9044_v37 = vadd.f32 %v17871_v56, %v8928_v9  ;;  %14557 = vmatprep.mubr.msk.bf16.mxu0 %vm3442_vm3, %v17951_v48 }
 0x8f3   : > { %v9141_v34 = vsel %vm9077_vm14, %v9045_v22, %v9109_v62  ;;  %vm9078_vm1 = vcmp.ge.f32.partialorder %v9046_v3, 0.0  ;;  %v9110_v41 = vmul.f32 %v9046_v3, %v16799_v50  ;;  %v9255_v20 = vld [vmem:[#allocation2 + $0xc1] sm:$0xff] }
 0x8f4   : > { %9173 = vst.msk [vmem:[#allocation2 + $0xf1] sm:$0xff] %vm3442_vm3, %v9141_v34  ;;  %v9139_v31 = vsel %vm9075_vm15, %v9043_v23, %v9107_v39  ;;  %vm9076_vm2 = vcmp.ge.f32.partialorder %v9044_v37, 0.0  ;;  %v9108_v5 = vmul.f32 %v9044_v37, %v16799_v50  ;;  %v9253_v10 = vld [vmem:[#allocation2 + $0xa9] sm:$0xff] }
 0x8f5   : > { %9171 = vst.msk [vmem:[#allocation2 + $0xd9] sm:$0xff] %vm3442_vm3, %v9139_v31  ;;  %v9142_v40 = vsel %vm9078_vm1, %v9046_v3, %v9110_v41  ;;  %v9256_v30 = vld [vmem:[#allocation2 + $0xc9] sm:$0xff] }
 0x8f6   : > { %9174 = vst.msk [vmem:[#allocation2 + $0xf9] sm:$0xff] %vm3442_vm3, %v9142_v40  ;;  %v9140_v47 = vsel %vm9076_vm2, %v9044_v37, %v9108_v5  ;;  %v14531_v38 = vpop.f32.mrb[52].mxu1  ;;  %v9254_v26 = vld [vmem:[#allocation2 + $0xb1] sm:$0xff]  ;;  %v17971_v43 = vpack.c.bf16 %v9256_v30, %v9255_v20 }
 0x8f7   : > { %9172 = vst.msk [vmem:[#allocation2 + $0xe1] sm:$0xff] %vm3442_vm3, %v9140_v47  ;;  %v9049_v32 = vadd.f32 %v14531_v38, %v17871_v56  ;;  %v8941_v52 = vpop.f32.mrb[53].mxu1  ;;  %v17968_v35 = vpack.c.bf16 %v9254_v26, %v9253_v10 }
 0x8f8   : > { %v9047_v17 = vadd.f32 %v17871_v56, %v8941_v52  ;;  %v14532_v55 = vpop.f32.mrb[54].mxu1 }
 0x8f9   : > { %vm9081_vm4 = vcmp.ge.f32.partialorder %v9049_v32, 0.0  ;;  %v9113_v18 = vmul.f32 %v9049_v32, %v16799_v50  ;;  %v9050_v11 = vadd.f32 %v14532_v55, %v17871_v56  ;;  %v8944_v15 = vpop.f32.mrb[55].mxu1  ;;  %14558 = vmatmul.mubr.msk.bf16.gmra.mrb[44].mxu0 %vm3442_vm3, %v17968_v35 }
 0x8fa   : > { %vm9079_vm5 = vcmp.ge.f32.partialorder %v9047_v17, 0.0  ;;  %v9111_v28 = vmul.f32 %v9047_v17, %v16799_v50  ;;  %v9048_v58 = vadd.f32 %v17871_v56, %v8944_v15  ;;  %14561 = vmatprep.mubr.msk.bf16.mxu0 %vm3442_vm3, %v17971_v43 }
 0x8fb   : > { %v9145_v6 = vsel %vm9081_vm4, %v9049_v32, %v9113_v18  ;;  %vm9082_vm6 = vcmp.ge.f32.partialorder %v9050_v11, 0.0  ;;  %v9114_v59 = vmul.f32 %v9050_v11, %v16799_v50  ;;  %v9259_v27 = vld [vmem:[#allocation2 + $0xf1] sm:$0xff] }
 0x8fc   : > { %9177 = vst.msk [vmem:[#allocation2 + $0x121] sm:$0xff] %vm3442_vm3, %v9145_v6  ;;  %v9143_v61 = vsel %vm9079_vm5, %v9047_v17, %v9111_v28  ;;  %vm9080_vm7 = vcmp.ge.f32.partialorder %v9048_v58, 0.0  ;;  %v9112_v21 = vmul.f32 %v9048_v58, %v16799_v50  ;;  %v9257_v44 = vld [vmem:[#allocation2 + $0xd9] sm:$0xff] }
 0x8fd   : > { %9175 = vst.msk [vmem:[#allocation2 + $0x109] sm:$0xff] %vm3442_vm3, %v9143_v61  ;;  %v9146_v51 = vsel %vm9082_vm6, %v9050_v11, %v9114_v59  ;;  %v9260_v53 = vld [vmem:[#allocation2 + $0xf9] sm:$0xff]  ;;  %v9188_v61 = vld [vmem:[#allocation2 + $0x8] sm:$0xff] }
 0x8fe   : > { %9178 = vst.msk [vmem:[#allocation2 + $0x129] sm:$0xff] %vm3442_vm3, %v9146_v51  ;;  %v9144_v45 = vsel %vm9080_vm7, %v9048_v58, %v9112_v21  ;;  %v14535_v46 = vpop.f32.mrb[56].mxu1  ;;  %v9258_v19 = vld [vmem:[#allocation2 + $0xe1] sm:$0xff]  ;;  %v17991_v54 = vpack.c.bf16 %v9260_v53, %v9259_v27 }
 0x8ff   : > { %9176 = vst.msk [vmem:[#allocation2 + $0x111] sm:$0xff] %vm3442_vm3, %v9144_v45  ;;  %v9053_v4 = vadd.f32 %v14535_v46, %v17871_v56  ;;  %v8957_v63 = vpop.f32.mrb[57].mxu1  ;;  %v17988_v57 = vpack.c.bf16 %v9258_v19, %v9257_v44  ;;  %v9190_v46 = vld [vmem:[#allocation2 + $0x20] sm:$0xff]  ;;  %v9192_v44 = vld [vmem:[#allocation2 + $0x38] sm:$0xff]  ;;  %v16008_v27 = vld [vmem:[%s18553_s4 + $0x28] sm:$0xff]  }
 0x900   : > { %v9051_v1 = vadd.f32 %v17871_v56, %v8957_v63  ;;  %v14536_v0 = vpop.f32.mrb[58].mxu1  ;;  %v9189_v19 = vld [vmem:[#allocation2 + $0x18] sm:$0xff]  ;;  %v9191_v63 = vld [vmem:[#allocation2 + $0x30] sm:$0xff] }
 0x901   : > { %vm9085_vm8 = vcmp.ge.f32.partialorder %v9053_v4, 0.0  ;;  %v9117_v60 = vmul.f32 %v9053_v4, %v16799_v50  ;;  %v9054_v13 = vadd.f32 %v14536_v0, %v17871_v56  ;;  %v8960_v33 = vpop.f32.mrb[59].mxu1  ;;  %14562 = vmatmul.mubr.msk.bf16.gmra.mrb[48].mxu0 %vm3442_vm3, %v17988_v57  ;;  %v18055_v0 = vld [vmem:[%s18553_s4 + $0x30] sm:$0xff]  }
 0x902   : > { %vm9083_vm9 = vcmp.ge.f32.partialorder %v9051_v1, 0.0  ;;  %v9115_v8 = vmul.f32 %v9051_v1, %v16799_v50  ;;  %v9052_v49 = vadd.f32 %v17871_v56, %v8960_v33  ;;  %14565 = vmatprep.mubr.msk.bf16.mxu0 %vm3442_vm3, %v17991_v54  ;;  %v9193_v33 = vld [vmem:[#allocation2 + $0x48] sm:$0xff] }
 0x903   : > { %v9149_v14 = vsel %vm9085_vm8, %v9053_v4, %v9117_v60  ;;  %vm9086_vm10 = vcmp.ge.f32.partialorder %v9054_v13, 0.0  ;;  %v9118_v22 = vmul.f32 %v9054_v13, %v16799_v50  ;;  %v9263_v31 = vld [vmem:[#allocation2 + $0x121] sm:$0xff]  ;;  %v18040_v4 = vpack.c.bf16 %v9190_v46, %v9189_v19  ;;  %v9194_v60 = vld [vmem:[#allocation2 + $0x50] sm:$0xff] }
 0x904   : > { %9181 = vst.msk [vmem:[#allocation2 + $0x151] sm:$0xff] %vm3442_vm3, %v9149_v14  ;;  %v9147_v36 = vsel %vm9083_vm9, %v9051_v1, %v9115_v8  ;;  %vm9084_vm11 = vcmp.ge.f32.partialorder %v9052_v49, 0.0  ;;  %v9116_v2 = vmul.f32 %v9052_v49, %v16799_v50  ;;  %v9261_v9 = vld [vmem:[#allocation2 + $0x109] sm:$0xff]  ;;  %v18045_v1 = vpack.c.bf16 %v9192_v44, %v9191_v63  ;;  %v9736_v44 = vld [vmem:[#allocation2 + $0x1a] sm:$0xff]  ;;  %v9738_v63 = vld [vmem:[#allocation2 + $0x32] sm:$0xff] }
 0x905   : > { %9179 = vst.msk [vmem:[#allocation2 + $0x139] sm:$0xff] %vm3442_vm3, %v9147_v36  ;;  %v9150_v23 = vsel %vm9086_vm10, %v9054_v13, %v9118_v22  ;;  %v9264_v29 = vld [vmem:[#allocation2 + $0x129] sm:$0xff]  ;;  %v18057_v8 = vpack.c.bf16 %v9194_v60, %v9193_v33  ;;  %v9200_v22 = vld [vmem:[#allocation2 + $0x98] sm:$0xff] }
 0x906   : > { %9182 = vst.msk [vmem:[#allocation2 + $0x159] sm:$0xff] %vm3442_vm3, %v9150_v23  ;;  %v9148_v62 = vsel %vm9084_vm11, %v9052_v49, %v9116_v2  ;;  %v14539_v3 = vpop.f32.mrb[60].mxu1  ;;  %v9262_v39 = vld [vmem:[#allocation2 + $0x111] sm:$0xff]  ;;  %v18011_v30 = vpack.c.bf16 %v9264_v29, %v9263_v31  ;;  %v9196_v13 = vld [vmem:[#allocation2 + $0x68] sm:$0xff]  ;;  %v9195_v49 = vld [vmem:[#allocation2 + $0x60] sm:$0xff] }
 0x907   : > { %9180 = vst.msk [vmem:[#allocation2 + $0x141] sm:$0xff] %vm3442_vm3, %v9148_v62  ;;  %v9057_v37 = vadd.f32 %v14539_v3, %v17871_v56  ;;  %v8973_v34 = vpop.f32.mrb[61].mxu1  ;;  %v18008_v41 = vpack.c.bf16 %v9262_v39, %v9261_v9  ;;  %v18060_v14 = vpack.c.bf16 %v9196_v13, %v9195_v49  ;;  %v9197_v36 = vld [vmem:[#allocation2 + $0x78] sm:$0xff]  ;;  %v9199_v23 = vld [vmem:[#allocation2 + $0x90] sm:$0xff]  ;;  %v9204_v3 = vld [vmem:[#allocation2 + $0xc8] sm:$0xff] }
 0x908   : > { %v9055_v5 = vadd.f32 %v17871_v56, %v8973_v34  ;;  %v14540_v40 = vpop.f32.mrb[62].mxu1  ;;  %v18068_v29 = vpack.c.bf16 %v9200_v22, %v9199_v23  ;;  %v9202_v62 = vld [vmem:[#allocation2 + $0xb0] sm:$0xff]  ;;  %v9201_v9 = vld [vmem:[#allocation2 + $0xa8] sm:$0xff]  ;;  %v9206_v31 = vld [vmem:[#allocation2 + $0xe0] sm:$0xff] }
 0x909   : > { %vm9089_vm12 = vcmp.ge.f32.partialorder %v9057_v37, 0.0  ;;  %v9121_v47 = vmul.f32 %v9057_v37, %v16799_v50  ;;  %v9058_v38 = vadd.f32 %v14540_v40, %v17871_v56  ;;  %v8976_v10 = vpop.f32.mrb[63].mxu1  ;;  %14566 = vmatmul.mubr.msk.bf16.gmra.mrb[52].mxu0 %vm3442_vm3, %v18008_v41  ;;  %v18074_v39 = vpack.c.bf16 %v9202_v62, %v9201_v9  ;;  %v9205_v40 = vld [vmem:[#allocation2 + $0xd8] sm:$0xff]  ;;  %v9737_v19 = vld [vmem:[#allocation2 + $0x22] sm:$0xff]  ;;  %v9743_v23 = vld [vmem:[#allocation2 + $0x6a] sm:$0xff] }
 0x90a   : > { %vm9087_vm13 = vcmp.ge.f32.partialorder %v9055_v5, 0.0  ;;  %v9119_v26 = vmul.f32 %v9055_v5, %v16799_v50  ;;  %v9056_v32 = vadd.f32 %v17871_v56, %v8976_v10  ;;  %14569 = vmatprep.mubr.msk.bf16.mxu0 %vm3442_vm3, %v18011_v30  ;;  %v18111_v60 = vpack.c.bf16 %v9737_v19, %v9736_v44  ;;  %v16010_v13 = vld [vmem:[%s18553_s4 + $0x38] sm:$0xff]   ;;  %v16011_v49 = vld [vmem:[%s18553_s4 + $0x40] sm:$0xff]   ;;  %v9759_v19 = vld [vmem:[#allocation2 + $0x12a] sm:$0xff] }
 0x90b   : > { %v9153_v52 = vsel %vm9089_vm12, %v9057_v37, %v9121_v47  ;;  %vm9090_vm14 = vcmp.ge.f32.partialorder %v9058_v38, 0.0  ;;  %v9122_v20 = vmul.f32 %v9058_v38, %v16799_v50  ;;  %v9267_v6 = vld [vmem:[#allocation2 + $0x151] sm:$0xff]  ;;  %v9203_v37 = vld [vmem:[#allocation2 + $0xc0] sm:$0xff]  ;;  %v18082_v47 = vpack.c.bf16 %v9206_v31, %v9205_v40 }
 0x90c   : > { %9185 = vst.msk [vmem:[#allocation2 + $0x181] sm:$0xff] %vm3442_vm3, %v9153_v52  ;;  %v9151_v17 = vsel %vm9087_vm13, %v9055_v5, %v9119_v26  ;;  %vm9088_vm15 = vcmp.ge.f32.partialorder %v9056_v32, 0.0  ;;  %v9120_v55 = vmul.f32 %v9056_v32, %v16799_v50  ;;  %v9265_v15 = vld [vmem:[#allocation2 + $0x139] sm:$0xff]  ;;  %v18076_v34 = vpack.c.bf16 %v9204_v3, %v9203_v37  ;;  %v9210_v26 = vld [vmem:[#allocation2 + $0x110] sm:$0xff]  ;;  %v9209_v52 = vld [vmem:[#allocation2 + $0x108] sm:$0xff] }
 0x90d   : > { %9183 = vst.msk [vmem:[#allocation2 + $0x169] sm:$0xff] %vm3442_vm3, %v9151_v17  ;;  %v9154_v18 = vsel %vm9090_vm14, %v9058_v38, %v9122_v20  ;;  %v9268_v11 = vld [vmem:[#allocation2 + $0x159] sm:$0xff]  ;;  %v9207_v38 = vld [vmem:[#allocation2 + $0xf0] sm:$0xff]  ;;  %v18090_v20 = vpack.c.bf16 %v9210_v26, %v9209_v52  ;;  %v9745_v9 = vld [vmem:[#allocation2 + $0x82] sm:$0xff] }
 0x90e   : > { %9186 = vst.msk [vmem:[#allocation2 + $0x189] sm:$0xff] %vm3442_vm3, %v9154_v18  ;;  %v9152_v56 = vsel %vm9088_vm15, %v9056_v32, %v9120_v55  ;;  %v9266_v28 = vld [vmem:[#allocation2 + $0x141] sm:$0xff]  ;;  %v18029_v59 = vpack.c.bf16 %v9268_v11, %v9267_v6  ;;  %v9208_v5 = vld [vmem:[#allocation2 + $0xf8] sm:$0xff]  ;;  %v9751_v52 = vld [vmem:[#allocation2 + $0xca] sm:$0xff] }
 0x90f   : > { %9184 = vst.msk [vmem:[#allocation2 + $0x171] sm:$0xff] %vm3442_vm3, %v9152_v56  ;;  %v18027_v58 = vpack.c.bf16 %v9266_v28, %v9265_v15  ;;  %v9187_v50 = vld [vmem:[#allocation2] sm:$0xff]  ;;  %v18084_v10 = vpack.c.bf16 %v9208_v5, %v9207_v38  ;;  %v9212_v32 = vld [vmem:[#allocation2 + $0x128] sm:$0xff]  ;;  %v9216_v11 = vld [vmem:[#allocation2 + $0x158] sm:$0xff] }
 0x910   : > { %v9219_v53 = vpack.c.bf16 %v9188_v61, %v9187_v50  ;;  %v9211_v17 = vld [vmem:[#allocation2 + $0x120] sm:$0xff]  ;;  %v9213_v56 = vld [vmem:[#allocation2 + $0x138] sm:$0xff]  ;;  %v9215_v28 = vld [vmem:[#allocation2 + $0x150] sm:$0xff] }
 0x911   : > { %14570 = vmatmul.mubr.msk.bf16.gmra.mrb[56].mxu0 %vm3442_vm3, %v18027_v58  ;;  %v18092_v55 = vpack.c.bf16 %v9212_v32, %v9211_v17  ;;  %v9214_v18 = vld [vmem:[#allocation2 + $0x140] sm:$0xff]  ;;  %v18100_v6 = vpack.c.bf16 %v9216_v11, %v9215_v28  ;;  %v9735_v61 = vld [vmem:[#allocation2 + $0xa] sm:$0xff]  ;;  %v9741_v22 = vld [vmem:[#allocation2 + $0x52] sm:$0xff] }
 0x912   : > { %14573 = vmatprep.mubr.msk.bf16.mxu0 %vm3442_vm3, %v18029_v59  ;;  %v18098_v15 = vpack.c.bf16 %v9214_v18, %v9213_v56  ;;  %v9734_v50 = vld [vmem:[#allocation2 + $0x2] sm:$0xff]  ;;  %v9746_v37 = vld [vmem:[#allocation2 + $0x92] sm:$0xff]  ;;  %v9747_v31 = vld [vmem:[#allocation2 + $0x9a] sm:$0xff] }
 0x913   : > { %v18136_v40 = vpack.c.bf16 %v9747_v31, %v9746_v37  ;;  %v9748_v38 = vld [vmem:[#allocation2 + $0xaa] sm:$0xff]  ;;  %v9749_v26 = vld [vmem:[#allocation2 + $0xb2] sm:$0xff]  ;;  %v9750_v32 = vld [vmem:[#allocation2 + $0xc2] sm:$0xff] }
 0x914   : > { %v9269_v21 = vld [vmem:[#allocation2 + $0x169] sm:$0xff]  ;;  %v18142_v17 = vpack.c.bf16 %v9749_v26, %v9748_v38  ;;  %v18144_v18 = vpack.c.bf16 %v9751_v52, %v9750_v32  ;;  %v9752_v11 = vld [vmem:[#allocation2 + $0xda] sm:$0xff]  ;;  %v9754_v28 = vld [vmem:[#allocation2 + $0xf2] sm:$0xff] }
 0x915   : > { %v9753_v56 = vld [vmem:[#allocation2 + $0xe2] sm:$0xff]  ;;  %v16013_v26 = vld [vmem:[%s18553_s4 + $0x50] sm:$0xff]   ;;  %v16014_v52 = vld [vmem:[%s18553_s4 + $0x58] sm:$0xff]  }
 0x916   : > { %v9270_v51 = vld [vmem:[#allocation2 + $0x171] sm:$0xff]  ;;  %v9758_v44 = vld [vmem:[#allocation2 + $0x122] sm:$0xff] }
 0x917   : > { %v18035_v45 = vpack.c.bf16 %v9270_v51, %v9269_v21  ;;  %v9218_v21 = vld [vmem:[#allocation2 + $0x170] sm:$0xff]  ;;  %v9217_v51 = vld [vmem:[#allocation2 + $0x168] sm:$0xff] }
 0x918   : > { %v18106_v46 = vpack.c.bf16 %v9218_v21, %v9217_v51  ;;  %v9756_v51 = vld [vmem:[#allocation2 + $0x10a] sm:$0xff]  ;;  %v9765_v37 = vld [vmem:[#allocation2 + $0x172] sm:$0xff] }
 0x919   : > { %14574 = vmatmul.mubr.msk.bf16.gmra.mrb[60].mxu0 %vm3442_vm3, %v18035_v45  ;;  %v16012_v38 = vld [vmem:[%s18553_s4 + $0x48] sm:$0xff]  }
 0x91a   : > { %14581 = vmatprep.mubr.msk.bf16.mxu0 %vm3442_vm3, %v9219_v53  ;;  %v9766_v53 = vpack.c.bf16 %v9735_v61, %v9734_v50  ;;  %v9755_v50 = vld [vmem:[#allocation2 + $0xfa] sm:$0xff]  ;;  %v18150_v61 = vpack.c.bf16 %v9753_v56, %v9752_v11 }
 0x91b   : > { %v18152_v21 = vpack.c.bf16 %v9755_v50, %v9754_v28  ;;  %v16015_v11 = vld [vmem:[%s18553_s4 + $0x60] sm:$0xff]   ;;  %v11272_v50 = vld [vmem:[#allocation2 + $0x91] sm:$0xff] }
 0x91c   : > { %v11270_v56 = vld [vmem:[#allocation2 + $0x79] sm:$0xff] }
 0x921   : > { %14582 = vmatmul.mubr.msk.bf16.vlgmr.msra.gmra.mrb[32].mxu0 %vm3442_vm3, %v18040_v4 }
 0x922   : > { %14585 = vmatprep.mubr.msk.bf16.mxu0 %vm3442_vm3, %v18045_v1  ;;  %14614 = vmatpush3.bf16.msra.mxu0 %v17919_v24  ;;  %v9198_v24 = vld [vmem:[#allocation2 + $0x80] sm:$0xff] }
 0x923   : > { %14615 = vmatprep.subr.bf16.mxu0 %v16008_v27  ;;  %v18066_v2 = vpack.c.bf16 %v9198_v24, %v9197_v36  ;;  %v9740_v24 = vld [vmem:[#allocation2 + $0x4a] sm:$0xff]  ;;  %v9742_v36 = vld [vmem:[#allocation2 + $0x62] sm:$0xff] }
 0x924   : > { %v18126_v62 = vpack.c.bf16 %v9741_v22, %v9740_v24  ;;  %v18128_v3 = vpack.c.bf16 %v9743_v23, %v9742_v36  ;;  %v9761_v24 = vld [vmem:[#allocation2 + $0x142] sm:$0xff]  ;;  %v9762_v22 = vld [vmem:[#allocation2 + $0x152] sm:$0xff]  ;;  %v9763_v36 = vld [vmem:[#allocation2 + $0x15a] sm:$0xff] }
 0x926   : > { %14616 = vmatpush3.bf16.msra.mxu0 %v16008_v27  ;;  %v9739_v27 = vld [vmem:[#allocation2 + $0x3a] sm:$0xff] }
 0x927   : > { %14649 = vmatprep.subr.bf16.mxu0 %v18055_v0  ;;  %v18116_v33 = vpack.c.bf16 %v9739_v27, %v9738_v63  ;;  %v18160_v27 = vpack.c.bf16 %v9759_v19, %v9758_v44  ;;  %v11277_v44 = vld [vmem:[#allocation2 + $0xc9] sm:$0xff] }
 0x928   : > { %v11274_v19 = vld [vmem:[#allocation2 + $0xa9] sm:$0xff] }
 0x929   : > { %14586 = vmatmul.mubr.msk.bf16.gmra.mrb[36].mxu0 %vm3442_vm3, %v18057_v8 }
 0x92a   : > { %14589 = vmatprep.mubr.msk.bf16.mxu0 %vm3442_vm3, %v18060_v14 }
 0x931   : > { %14590 = vmatmul.mubr.msk.bf16.gmra.mrb[40].mxu0 %vm3442_vm3, %v18066_v2 }
 0x932   : > { %14593 = vmatprep.mubr.msk.bf16.mxu0 %vm3442_vm3, %v18068_v29 }
 0x939   : > { %14594 = vmatmul.mubr.msk.bf16.gmra.mrb[44].mxu0 %vm3442_vm3, %v18074_v39 }
 0x93a   : > { %14597 = vmatprep.mubr.msk.bf16.mxu0 %vm3442_vm3, %v18076_v34 }
 0x941   : > { %14598 = vmatmul.mubr.msk.bf16.gmra.mrb[48].mxu0 %vm3442_vm3, %v18082_v47 }
 0x942   : > { %14601 = vmatprep.mubr.msk.bf16.mxu0 %vm3442_vm3, %v18084_v10 }
 0x949   : > { %14602 = vmatmul.mubr.msk.bf16.gmra.mrb[52].mxu0 %vm3442_vm3, %v18090_v20 }
 0x94a   : > { %14605 = vmatprep.mubr.msk.bf16.mxu0 %vm3442_vm3, %v18092_v55 }
 0x951   : > { %14606 = vmatmul.mubr.msk.bf16.gmra.mrb[56].mxu0 %vm3442_vm3, %v18098_v15 }
 0x952   : > { %14609 = vmatprep.mubr.msk.bf16.mxu0 %vm3442_vm3, %v18100_v6 }
 0x959   : > { %14610 = vmatmul.mubr.msk.bf16.gmra.mrb[60].mxu0 %vm3442_vm3, %v18106_v46 }
 0x95a   : > { %14617 = vmatprep.mubr.msk.bf16.mxu0 %vm3442_vm3, %v9766_v53  ;;  %v9757_v53 = vld [vmem:[#allocation2 + $0x112] sm:$0xff] }
 0x95b   : > { %v18158_v63 = vpack.c.bf16 %v9757_v53, %v9756_v51  ;;  %v11275_v53 = vld [vmem:[#allocation2 + $0xb1] sm:$0xff] }
 0x961   : > { %14618 = vmatmul.mubr.msk.bf16.vlgmr.msra.gmra.mrb[32].mxu0 %vm3442_vm3, %v18111_v60 }
 0x962   : > { %14621 = vmatprep.mubr.msk.bf16.mxu0 %vm3442_vm3, %v18116_v33  ;;  %14650 = vmatpush3.bf16.msra.mxu0 %v18055_v0  ;;  %v9744_v0 = vld [vmem:[#allocation2 + $0x7a] sm:$0xff] }
 0x963   : > { %14651 = vmatprep.subr.bf16.mxu0 %v16010_v13  ;;  %v18134_v5 = vpack.c.bf16 %v9745_v9, %v9744_v0  ;;  %v18168_v0 = vpack.c.bf16 %v9763_v36, %v9762_v22  ;;  %v9764_v9 = vld [vmem:[#allocation2 + $0x16a] sm:$0xff]  ;;  %v11279_v36 = vld [vmem:[#allocation2 + $0xe1] sm:$0xff] }
 0x964   : > { %v18174_v31 = vpack.c.bf16 %v9765_v37, %v9764_v9  ;;  %v11281_v9 = vld [vmem:[#allocation2 + $0xf9] sm:$0xff] }
 0x965   : > { %v11278_v37 = vld [vmem:[#allocation2 + $0xd9] sm:$0xff] }
 0x966   : > { %14652 = vmatpush3.bf16.msra.mxu0 %v16010_v13  ;;  %v9760_v13 = vld [vmem:[#allocation2 + $0x13a] sm:$0xff] }
 0x967   : > { %14685 = vmatprep.subr.bf16.mxu0 %v16011_v49  ;;  %v18166_v23 = vpack.c.bf16 %v9761_v24, %v9760_v13  ;;  %v11301_v13 = vpack.c.bf16 %v11275_v53, %v11274_v19  ;;  %v11276_v24 = vld [vmem:[#allocation2 + $0xc1] sm:$0xff] }
 0x968   : > { %v11302_v22 = vpack.c.bf16 %v11277_v44, %v11276_v24 }
 0x969   : > { %14622 = vmatmul.mubr.msk.bf16.gmra.mrb[36].mxu0 %vm3442_vm3, %v18126_v62 }
 0x96a   : > { %14625 = vmatprep.mubr.msk.bf16.mxu0 %vm3442_vm3, %v18128_v3 }
 0x971   : > { %14626 = vmatmul.mubr.msk.bf16.gmra.mrb[40].mxu0 %vm3442_vm3, %v18134_v5 }
 0x972   : > { %14629 = vmatprep.mubr.msk.bf16.mxu0 %vm3442_vm3, %v18136_v40 }
 0x979   : > { %14630 = vmatmul.mubr.msk.bf16.gmra.mrb[44].mxu0 %vm3442_vm3, %v18142_v17 }
 0x97a   : > { %14633 = vmatprep.mubr.msk.bf16.mxu0 %vm3442_vm3, %v18144_v18 }
 0x981   : > { %14634 = vmatmul.mubr.msk.bf16.gmra.mrb[48].mxu0 %vm3442_vm3, %v18150_v61 }
 0x982   : > { %14637 = vmatprep.mubr.msk.bf16.mxu0 %vm3442_vm3, %v18152_v21 }
 0x989   : > { %14638 = vmatmul.mubr.msk.bf16.gmra.mrb[52].mxu0 %vm3442_vm3, %v18158_v63 }
 0x98a   : > { %14641 = vmatprep.mubr.msk.bf16.mxu0 %vm3442_vm3, %v18160_v27 }
 0x991   : > { %14642 = vmatmul.mubr.msk.bf16.gmra.mrb[56].mxu0 %vm3442_vm3, %v18166_v23 }
 0x992   : > { %14645 = vmatprep.mubr.msk.bf16.mxu0 %vm3442_vm3, %v18168_v0 }
 0x999   : > { %14646 = vmatmul.mubr.msk.bf16.gmra.mrb[60].mxu0 %vm3442_vm3, %v18174_v31 }
 0x99a   : > { %14653 = vmatprep.mubr.msk.bf16.mxu0 %vm3442_vm3, %v18040_v4  ;;  %v10071_v4 = vld [vmem:[#allocation2 + $0x188] sm:$0xff] }
 0x9a1   : > { %14654 = vmatmul.mubr.msk.bf16.vlgmr.msra.gmra.mrb[32].mxu0 %vm3442_vm3, %v18045_v1 }
 0x9a2   : > { %14657 = vmatprep.mubr.msk.bf16.mxu0 %vm3442_vm3, %v18057_v8  ;;  %14686 = vmatpush3.bf16.msra.mxu0 %v16011_v49  ;;  %v10070_v49 = vld [vmem:[#allocation2 + $0x180] sm:$0xff] }
 0x9a3   : > { %14687 = vmatprep.subr.bf16.mxu0 %v16012_v38  ;;  %v18214_v32 = vpack.c.bf16 %v10071_v4, %v10070_v49  ;;  %v11294_v49 = vld [vmem:[#allocation2 + $0x199] sm:$0xff] }
 0x9a6   : > { %14688 = vmatpush3.bf16.msra.mxu0 %v16012_v38  ;;  %v11303_v38 = vpack.c.bf16 %v11279_v36, %v11278_v37 }
 0x9a7   : > { %14721 = vmatprep.subr.bf16.mxu0 %v16013_v26 }
 0x9a9   : > { %14658 = vmatmul.mubr.msk.bf16.gmra.mrb[36].mxu0 %vm3442_vm3, %v18060_v14 }
 0x9aa   : > { %14661 = vmatprep.mubr.msk.bf16.mxu0 %vm3442_vm3, %v18066_v2 }
 0x9b1   : > { %14662 = vmatmul.mubr.msk.bf16.gmra.mrb[40].mxu0 %vm3442_vm3, %v18068_v29 }
 0x9b2   : > { %14665 = vmatprep.mubr.msk.bf16.mxu0 %vm3442_vm3, %v18074_v39 }
 0x9b9   : > { %14666 = vmatmul.mubr.msk.bf16.gmra.mrb[44].mxu0 %vm3442_vm3, %v18076_v34 }
 0x9ba   : > { %14669 = vmatprep.mubr.msk.bf16.mxu0 %vm3442_vm3, %v18082_v47 }
 0x9c1   : > { %14670 = vmatmul.mubr.msk.bf16.gmra.mrb[48].mxu0 %vm3442_vm3, %v18084_v10 }
 0x9c2   : > { %14673 = vmatprep.mubr.msk.bf16.mxu0 %vm3442_vm3, %v18090_v20 }
 0x9c9   : > { %14674 = vmatmul.mubr.msk.bf16.gmra.mrb[52].mxu0 %vm3442_vm3, %v18092_v55 }
 0x9ca   : > { %14677 = vmatprep.mubr.msk.bf16.mxu0 %vm3442_vm3, %v18098_v15 }
 0x9d1   : > { %14678 = vmatmul.mubr.msk.bf16.gmra.mrb[56].mxu0 %vm3442_vm3, %v18100_v6 }
 0x9d2   : > { %14681 = vmatprep.mubr.msk.bf16.mxu0 %vm3442_vm3, %v18106_v46 }
 0x9d9   : > { %14682 = vmatmul.mubr.msk.bf16.gmra.mrb[60].mxu0 %vm3442_vm3, %v18214_v32 }
 0x9da   : > { %14689 = vmatprep.mubr.msk.bf16.mxu0 %vm3442_vm3, %v17898_v7  ;;  %v10377_v7 = vld [vmem:[#allocation2 + $0x189] sm:$0xff] }
 0x9e1   : > { %14690 = vmatmul.mubr.msk.bf16.vlgmr.msra.gmra.mrb[32].mxu0 %vm3442_vm3, %v17904_v25  ;;  %v10376_v25 = vld [vmem:[#allocation2 + $0x181] sm:$0xff] }
 0x9e2   : > { %14693 = vmatprep.mubr.msk.bf16.mxu0 %vm3442_vm3, %v17927_v12  ;;  %14722 = vmatpush3.bf16.msra.mxu0 %v16013_v26  ;;  %v18254_v12 = vpack.c.bf16 %v10377_v7, %v10376_v25  ;;  %v11280_v26 = vld [vmem:[#allocation2 + $0xf1] sm:$0xff] }
 0x9e3   : > { %14723 = vmatprep.subr.bf16.mxu0 %v16014_v52  ;;  %v11304_v4 = vpack.c.bf16 %v11281_v9, %v11280_v26 }
 0x9e6   : > { %14724 = vmatpush3.bf16.msra.mxu0 %v16014_v52 }
 0x9e7   : > { %14757 = vmatprep.subr.bf16.mxu0 %v16015_v11 }
 0x9e9   : > { %14694 = vmatmul.mubr.msk.bf16.gmra.mrb[36].mxu0 %vm3442_vm3, %v17931_v42  ;;  %v16016_v42 = vld [vmem:[%s18553_s4 + $0x68] sm:$0xff]  }
 0x9ea   : > { %14697 = vmatprep.mubr.msk.bf16.mxu0 %vm3442_vm3, %v17948_v16  ;;  %v16017_v16 = vld [vmem:[%s18553_s4 + $0x70] sm:$0xff]  }
 0x9f1   : > { %14698 = vmatmul.mubr.msk.bf16.gmra.mrb[40].mxu0 %vm3442_vm3, %v17951_v48  ;;  %v10682_v48 = vld [vmem:[#allocation2 + $0x182] sm:$0xff] }
 0x9f2   : > { %14701 = vmatprep.mubr.msk.bf16.mxu0 %vm3442_vm3, %v17968_v35  ;;  %v10683_v35 = vld [vmem:[#allocation2 + $0x18a] sm:$0xff] }
 0x9f9   : > { %14702 = vmatmul.mubr.msk.bf16.gmra.mrb[44].mxu0 %vm3442_vm3, %v17971_v43  ;;  %v18294_v43 = vpack.c.bf16 %v10683_v35, %v10682_v48 }
 0x9fa   : > { %14705 = vmatprep.mubr.msk.bf16.mxu0 %vm3442_vm3, %v17988_v57  ;;  %v16018_v57 = vld [vmem:[%s18553_s4 + $0x78] sm:$0xff]  }
 0xa01   : > { %14706 = vmatmul.mubr.msk.bf16.gmra.mrb[48].mxu0 %vm3442_vm3, %v17991_v54  ;;  %v16019_v54 = vld [vmem:[%s18553_s4 + $0x80] sm:$0xff]  }
 0xa02   : > { %14709 = vmatprep.mubr.msk.bf16.mxu0 %vm3442_vm3, %v18008_v41 }
 0xa09   : > { %14710 = vmatmul.mubr.msk.bf16.gmra.mrb[52].mxu0 %vm3442_vm3, %v18011_v30 }
 0xa0a   : > { %14713 = vmatprep.mubr.msk.bf16.mxu0 %vm3442_vm3, %v18027_v58 }
 0xa11   : > { %14714 = vmatmul.mubr.msk.bf16.gmra.mrb[56].mxu0 %vm3442_vm3, %v18029_v59 }
 0xa12   : > { %14717 = vmatprep.mubr.msk.bf16.mxu0 %vm3442_vm3, %v18035_v45 }
 0xa19   : > { %14718 = vmatmul.mubr.msk.bf16.gmra.mrb[60].mxu0 %vm3442_vm3, %v18254_v12 }
 0xa1a   : > { %14725 = vmatprep.mubr.msk.bf16.mxu0 %vm3442_vm3, %v18111_v60  ;;  %v11273_v60 = vld [vmem:[#allocation2 + $0x99] sm:$0xff] }
 0xa1b   : > { %v11300_v51 = vpack.c.bf16 %v11273_v60, %v11272_v50 }
 0xa21   : > { %14726 = vmatmul.mubr.msk.bf16.vlgmr.msra.gmra.mrb[32].mxu0 %vm3442_vm3, %v18116_v33 }
 0xa22   : > { %14729 = vmatprep.mubr.msk.bf16.mxu0 %vm3442_vm3, %v18126_v62  ;;  %14758 = vmatpush3.bf16.msra.mxu0 %v16015_v11 }
 0xa23   : > { %14759 = vmatprep.subr.bf16.mxu0 %v16016_v42 }
 0xa26   : > { %14760 = vmatpush3.bf16.msra.mxu0 %v16016_v42 }
 0xa27   : > { %14793 = vmatprep.subr.bf16.mxu0 %v16017_v16 }
 0xa29   : > { %14730 = vmatmul.mubr.msk.bf16.gmra.mrb[36].mxu0 %vm3442_vm3, %v18128_v3 }
 0xa2a   : > { %14733 = vmatprep.mubr.msk.bf16.mxu0 %vm3442_vm3, %v18134_v5 }
 0xa31   : > { %14734 = vmatmul.mubr.msk.bf16.gmra.mrb[40].mxu0 %vm3442_vm3, %v18136_v40 }
 0xa32   : > { %14737 = vmatprep.mubr.msk.bf16.mxu0 %vm3442_vm3, %v18142_v17 }
 0xa39   : > { %14738 = vmatmul.mubr.msk.bf16.gmra.mrb[44].mxu0 %vm3442_vm3, %v18144_v18 }
 0xa3a   : > { %14741 = vmatprep.mubr.msk.bf16.mxu0 %vm3442_vm3, %v18150_v61 }
 0xa41   : > { %14742 = vmatmul.mubr.msk.bf16.gmra.mrb[48].mxu0 %vm3442_vm3, %v18152_v21 }
 0xa42   : > { %14745 = vmatprep.mubr.msk.bf16.mxu0 %vm3442_vm3, %v18158_v63 }
 0xa49   : > { %14746 = vmatmul.mubr.msk.bf16.gmra.mrb[52].mxu0 %vm3442_vm3, %v18160_v27 }
 0xa4a   : > { %14749 = vmatprep.mubr.msk.bf16.mxu0 %vm3442_vm3, %v18166_v23 }
 0xa51   : > { %14750 = vmatmul.mubr.msk.bf16.gmra.mrb[56].mxu0 %vm3442_vm3, %v18168_v0 }
 0xa52   : > { %14753 = vmatprep.mubr.msk.bf16.mxu0 %vm3442_vm3, %v18174_v31 }
 0xa59   : > { %14754 = vmatmul.mubr.msk.bf16.gmra.mrb[60].mxu0 %vm3442_vm3, %v18294_v43 }
 0xa5a   : > { %14761 = vmatprep.mubr.msk.bf16.mxu0 %vm3442_vm3, %v18045_v1  ;;  %v10988_v1 = vld [vmem:[#allocation2 + $0x198] sm:$0xff] }
 0xa61   : > { %14762 = vmatmul.mubr.msk.bf16.vlgmr.msra.gmra.mrb[32].mxu0 %vm3442_vm3, %v18057_v8  ;;  %v10989_v8 = vld [vmem:[#allocation2 + $0x1a0] sm:$0xff] }
 0xa62   : > { %14765 = vmatprep.mubr.msk.bf16.mxu0 %vm3442_vm3, %v18060_v14  ;;  %14794 = vmatpush3.bf16.msra.mxu0 %v16017_v16  ;;  %v11005_v14 = vpack.c.bf16 %v10989_v8, %v10988_v1 }
 0xa63   : > { %14795 = vmatprep.subr.bf16.mxu0 %v16018_v57 }
 0xa66   : > { %14796 = vmatpush3.bf16.msra.mxu0 %v16018_v57 }
 0xa67   : > { %14829 = vmatprep.subr.bf16.mxu0 %v16019_v54 }
 0xa69   : > { %14766 = vmatmul.mubr.msk.bf16.gmra.mrb[36].mxu0 %vm3442_vm3, %v18066_v2  ;;  %v11265_v2 = vld [vmem:[#allocation2 + $0x39] sm:$0xff] }
 0xa6a   : > { %14769 = vmatprep.mubr.msk.bf16.mxu0 %vm3442_vm3, %v18068_v29  ;;  %v11264_v29 = vld [vmem:[#allocation2 + $0x31] sm:$0xff] }
 0xa71   : > { %14770 = vmatmul.mubr.msk.bf16.gmra.mrb[40].mxu0 %vm3442_vm3, %v18074_v39  ;;  %v11296_v39 = vpack.c.bf16 %v11265_v2, %v11264_v29 }
 0xa72   : > { %14773 = vmatprep.mubr.msk.bf16.mxu0 %vm3442_vm3, %v18076_v34  ;;  %v11267_v34 = vld [vmem:[#allocation2 + $0x51] sm:$0xff] }
 0xa79   : > { %14774 = vmatmul.mubr.msk.bf16.gmra.mrb[44].mxu0 %vm3442_vm3, %v18082_v47  ;;  %v11269_v47 = vld [vmem:[#allocation2 + $0x69] sm:$0xff] }
 0xa7a   : > { %14777 = vmatprep.mubr.msk.bf16.mxu0 %vm3442_vm3, %v18084_v10  ;;  %v11266_v10 = vld [vmem:[#allocation2 + $0x49] sm:$0xff] }
 0xa81   : > { %14778 = vmatmul.mubr.msk.bf16.gmra.mrb[48].mxu0 %vm3442_vm3, %v18090_v20  ;;  %v11297_v20 = vpack.c.bf16 %v11267_v34, %v11266_v10 }
 0xa82   : > { %14781 = vmatprep.mubr.msk.bf16.mxu0 %vm3442_vm3, %v18092_v55  ;;  %v11268_v55 = vld [vmem:[#allocation2 + $0x61] sm:$0xff] }
 0xa89   : > { %14782 = vmatmul.mubr.msk.bf16.gmra.mrb[52].mxu0 %vm3442_vm3, %v18098_v15  ;;  %v16020_v15 = vld [vmem:[%s18553_s4 + $0x88] sm:$0xff]  }
 0xa8a   : > { %14785 = vmatprep.mubr.msk.bf16.mxu0 %vm3442_vm3, %v18100_v6  ;;  %v11298_v6 = vpack.c.bf16 %v11269_v47, %v11268_v55 }
 0xa91   : > { %14786 = vmatmul.mubr.msk.bf16.gmra.mrb[56].mxu0 %vm3442_vm3, %v18106_v46  ;;  %v11271_v46 = vld [vmem:[#allocation2 + $0x81] sm:$0xff] }
 0xa92   : > { %14789 = vmatprep.mubr.msk.bf16.mxu0 %vm3442_vm3, %v18214_v32  ;;  %v11299_v28 = vpack.c.bf16 %v11271_v46, %v11270_v56  ;;  %v11295_v32 = vld [vmem:[#allocation2 + $0x1a1] sm:$0xff] }
 0xa93   : > { %v11311_v52 = vpack.c.bf16 %v11295_v32, %v11294_v49 }
 0xa99   : > { %14790 = vmatmul.mubr.msk.bf16.gmra.mrb[60].mxu0 %vm3442_vm3, %v11005_v14 }
 0xa9a   : > { %14797 = vmatprep.mubr.msk.bf16.mxu0 %vm3442_vm3, %v11296_v39 }
 0xaa1   : > { %14798 = vmatmul.mubr.msk.bf16.vlgmr.msra.gmra.mrb[32].mxu0 %vm3442_vm3, %v11297_v20 }
 0xaa2   : > { %14801 = vmatprep.mubr.msk.bf16.mxu0 %vm3442_vm3, %v11298_v6  ;;  %14830 = vmatpush3.bf16.msra.mxu0 %v16019_v54 }
 0xaa3   : > { %14831 = vmatprep.subr.bf16.mxu0 %v16020_v15 }
 0xaa6   : > { %14832 = vmatpush3.bf16.msra.mxu0 %v16020_v15 }
 0xaa9   : > { %14802 = vmatmul.mubr.msk.bf16.gmra.mrb[36].mxu0 %vm3442_vm3, %v11299_v28 }
 0xaaa   : > { %14805 = vmatprep.mubr.msk.bf16.mxu0 %vm3442_vm3, %v11300_v51 }
 0xab1   : > { %14806 = vmatmul.mubr.msk.bf16.gmra.mrb[40].mxu0 %vm3442_vm3, %v11301_v13 }
 0xab2   : > { %14809 = vmatprep.mubr.msk.bf16.mxu0 %vm3442_vm3, %v11302_v22 }
 0xab9   : > { %14810 = vmatmul.mubr.msk.bf16.gmra.mrb[44].mxu0 %vm3442_vm3, %v11303_v38 }
 0xaba   : > { %14813 = vmatprep.mubr.msk.bf16.mxu0 %vm3442_vm3, %v11304_v4 }
 0xac1   : > { %14814 = vmatmul.mubr.msk.bf16.gmra.mrb[48].mxu0 %vm3442_vm3, %v18008_v41  ;;  %v11600_v41 = vld [vmem:[#allocation2 + $0x19a] sm:$0xff] }
 0xac2   : > { %14817 = vmatprep.mubr.msk.bf16.mxu0 %vm3442_vm3, %v18011_v30  ;;  %v11601_v30 = vld [vmem:[#allocation2 + $0x1a2] sm:$0xff] }
 0xac9   : > { %14818 = vmatmul.mubr.msk.bf16.gmra.mrb[52].mxu0 %vm3442_vm3, %v18027_v58  ;;  %v11617_v58 = vpack.c.bf16 %v11601_v30, %v11600_v41 }
 0xaca   : > { %14821 = vmatprep.mubr.msk.bf16.mxu0 %vm3442_vm3, %v18029_v59  ;;  %v18397_v59 = vld [vmem:[%s18557_s8] ss:$0 sm:$0xff] }
 0xad1   : > { %14822 = vmatmul.mubr.msk.bf16.gmra.mrb[56].mxu0 %vm3442_vm3, %v18035_v45 }
 0xad2   : > { %14825 = vmatprep.mubr.msk.bf16.mxu0 %vm3442_vm3, %v18254_v12 }
 0xad9   : > { %14826 = vmatmul.mubr.msk.bf16.gmra.mrb[60].mxu0 %vm3442_vm3, %v11311_v52 }
 0xada   : > { %14833 = vmatprep.mubr.msk.bf16.mxu0 %vm3442_vm3, %v18116_v33 }
 0xae1   : > { %14834 = vmatmul.mubr.msk.bf16.vlgmr.msra.gmra.mrb[32].mxu0 %vm3442_vm3, %v18126_v62 }
 0xae2   : > { %14837 = vmatprep.mubr.msk.bf16.mxu0 %vm3442_vm3, %v18128_v3 }
 0xae9   : > { %14838 = vmatmul.mubr.msk.bf16.gmra.mrb[36].mxu0 %vm3442_vm3, %v18134_v5 }
 0xaea   : > { %14841 = vmatprep.mubr.msk.bf16.mxu0 %vm3442_vm3, %v18136_v40 }
 0xaf1   : > { %14842 = vmatmul.mubr.msk.bf16.gmra.mrb[40].mxu0 %vm3442_vm3, %v18142_v17 }
 0xaf2   : > { %14845 = vmatprep.mubr.msk.bf16.mxu0 %vm3442_vm3, %v18144_v18 }
 0xaf9   : > { %14846 = vmatmul.mubr.msk.bf16.gmra.mrb[44].mxu0 %vm3442_vm3, %v18150_v61 }
 0xafa   : > { %14849 = vmatprep.mubr.msk.bf16.mxu0 %vm3442_vm3, %v18152_v21 }
 0xb01   : > { %14850 = vmatmul.mubr.msk.bf16.gmra.mrb[48].mxu0 %vm3442_vm3, %v18158_v63 }
 0xb02   : > { %14853 = vmatprep.mubr.msk.bf16.mxu0 %vm3442_vm3, %v18160_v27 }
 0xb09   : > { %14854 = vmatmul.mubr.msk.bf16.gmra.mrb[52].mxu0 %vm3442_vm3, %v18166_v23 }
 0xb0a   : > { %14857 = vmatprep.mubr.msk.bf16.mxu0 %vm3442_vm3, %v18168_v0 }
 0xb11   : > { %14858 = vmatmul.mubr.msk.bf16.gmra.mrb[56].mxu0 %vm3442_vm3, %v18174_v31 }
 0xb12   : > { %14861 = vmatprep.mubr.msk.bf16.mxu0 %vm3442_vm3, %v18294_v43 }
 0xb19   : > { %14862 = vmatmul.mubr.msk.bf16.gmra.mrb[60].mxu0 %vm3442_vm3, %v11617_v58 }
 0xbb4   : > { %v14835_v45 = vpop.f32.mrb[32].mxu0 }
 0xbb5   : > { %v11885_v33 = vadd.f32 %v14835_v45, %v18397_v59  ;;  %v11717_v62 = vpop.f32.mrb[33].mxu0 }
 0xbb6   : > { %v11883_v3 = vadd.f32 %v18397_v59, %v11717_v62  ;;  %v14836_v5 = vpop.f32.mrb[34].mxu0 }
 0xbb7   : > { %11917 = vst.msk [vmem:[%s18401_s11 + $0x10] sm:$0xff] %vm361_vm0, %v11885_v33  ;;  %v11886_v40 = vadd.f32 %v14836_v5, %v18397_v59  ;;  %v11720_v17 = vpop.f32.mrb[35].mxu0 }
 0xbb8   : > { %11915 = vst.msk [vmem:[%s18401_s11] sm:$0xff] %vm361_vm0, %v11883_v3  ;;  %v11884_v18 = vadd.f32 %v18397_v59, %v11720_v17 }
 0xbb9   : > { %11918 = vst.msk [vmem:[%s18401_s11 + $0x18] sm:$0xff] %vm361_vm0, %v11886_v40 }
 0xbba   : > { %11916 = vst.msk [vmem:[%s18401_s11 + $0x8] sm:$0xff] %vm361_vm0, %v11884_v18 }
 0xbbc   : > { %v14839_v61 = vpop.f32.mrb[36].mxu0 }
 0xbbd   : > { %v11889_v21 = vadd.f32 %v14839_v61, %v18397_v59  ;;  %v11733_v63 = vpop.f32.mrb[37].mxu0 }
 0xbbe   : > { %v11887_v27 = vadd.f32 %v18397_v59, %v11733_v63  ;;  %v14840_v23 = vpop.f32.mrb[38].mxu0 }
 0xbbf   : > { %11921 = vst.msk [vmem:[%s18401_s11 + $0x30] sm:$0xff] %vm361_vm0, %v11889_v21  ;;  %v11890_v0 = vadd.f32 %v14840_v23, %v18397_v59  ;;  %v11736_v31 = vpop.f32.mrb[39].mxu0 }
 0xbc0   : > { %11919 = vst.msk [vmem:[%s18401_s11 + $0x20] sm:$0xff] %vm361_vm0, %v11887_v27  ;;  %v11888_v11 = vadd.f32 %v18397_v59, %v11736_v31 }
 0xbc1   : > { %11922 = vst.msk [vmem:[%s18401_s11 + $0x38] sm:$0xff] %vm361_vm0, %v11890_v0 }
 0xbc2   : > { %11920 = vst.msk [vmem:[%s18401_s11 + $0x28] sm:$0xff] %vm361_vm0, %v11888_v11 }
 0xbc4   : > { %v14843_v7 = vpop.f32.mrb[40].mxu0 }
 0xbc5   : > { %v11893_v25 = vadd.f32 %v14843_v7, %v18397_v59  ;;  %v11749_v12 = vpop.f32.mrb[41].mxu0 }
 0xbc6   : > { %v11891_v42 = vadd.f32 %v18397_v59, %v11749_v12  ;;  %v14844_v16 = vpop.f32.mrb[42].mxu0 }
 0xbc7   : > { %11925 = vst.msk [vmem:[%s18401_s11 + $0x50] sm:$0xff] %vm361_vm0, %v11893_v25  ;;  %v11894_v48 = vadd.f32 %v14844_v16, %v18397_v59  ;;  %v11752_v35 = vpop.f32.mrb[43].mxu0 }
 0xbc8   : > { %11923 = vst.msk [vmem:[%s18401_s11 + $0x40] sm:$0xff] %vm361_vm0, %v11891_v42  ;;  %v11892_v43 = vadd.f32 %v18397_v59, %v11752_v35 }
 0xbc9   : > { %11926 = vst.msk [vmem:[%s18401_s11 + $0x58] sm:$0xff] %vm361_vm0, %v11894_v48 }
 0xbca   : > { %11924 = vst.msk [vmem:[%s18401_s11 + $0x48] sm:$0xff] %vm361_vm0, %v11892_v43 }
 0xbcc   : > { %v14847_v57 = vpop.f32.mrb[44].mxu0 }
 0xbcd   : > { %v11897_v54 = vadd.f32 %v14847_v57, %v18397_v59  ;;  %v11765_v1 = vpop.f32.mrb[45].mxu0 }
 0xbce   : > { %v11895_v8 = vadd.f32 %v18397_v59, %v11765_v1  ;;  %v14848_v14 = vpop.f32.mrb[46].mxu0 }
 0xbcf   : > { %11929 = vst.msk [vmem:[%s18401_s11 + $0x70] sm:$0xff] %vm361_vm0, %v11897_v54  ;;  %v11898_v2 = vadd.f32 %v14848_v14, %v18397_v59  ;;  %v11768_v29 = vpop.f32.mrb[47].mxu0 }
 0xbd0   : > { %11927 = vst.msk [vmem:[%s18401_s11 + $0x60] sm:$0xff] %vm361_vm0, %v11895_v8  ;;  %v11896_v39 = vadd.f32 %v18397_v59, %v11768_v29 }
 0xbd1   : > { %11930 = vst.msk [vmem:[%s18401_s11 + $0x78] sm:$0xff] %vm361_vm0, %v11898_v2 }
 0xbd2   : > { %11928 = vst.msk [vmem:[%s18401_s11 + $0x68] sm:$0xff] %vm361_vm0, %v11896_v39 }
 0xbd4   : > { %v14851_v34 = vpop.f32.mrb[48].mxu0 }
 0xbd5   : > { %v11901_v47 = vadd.f32 %v14851_v34, %v18397_v59  ;;  %v11781_v10 = vpop.f32.mrb[49].mxu0 }
 0xbd6   : > { %v11899_v20 = vadd.f32 %v18397_v59, %v11781_v10  ;;  %v14852_v55 = vpop.f32.mrb[50].mxu0 }
 0xbd7   : > { %11933 = vst.msk [vmem:[%s18401_s11 + $0x90] sm:$0xff] %vm361_vm0, %v11901_v47  ;;  %v11902_v15 = vadd.f32 %v14852_v55, %v18397_v59  ;;  %v11784_v6 = vpop.f32.mrb[51].mxu0 }
 0xbd8   : > { %11931 = vst.msk [vmem:[%s18401_s11 + $0x80] sm:$0xff] %vm361_vm0, %v11899_v20  ;;  %v11900_v46 = vadd.f32 %v18397_v59, %v11784_v6 }
 0xbd9   : > { %11934 = vst.msk [vmem:[%s18401_s11 + $0x98] sm:$0xff] %vm361_vm0, %v11902_v15 }
 0xbda   : > { %11932 = vst.msk [vmem:[%s18401_s11 + $0x88] sm:$0xff] %vm361_vm0, %v11900_v46 }
 0xbdc   : > { %v14855_v60 = vpop.f32.mrb[52].mxu0 }
 0xbdd   : > { %v11905_v56 = vadd.f32 %v14855_v60, %v18397_v59  ;;  %v11797_v28 = vpop.f32.mrb[53].mxu0 }
 0xbde   : > { %v11903_v50 = vadd.f32 %v18397_v59, %v11797_v28  ;;  %v14856_v51 = vpop.f32.mrb[54].mxu0 }
 0xbdf   : > { %11937 = vst.msk [vmem:[%s18401_s11 + $0xb0] sm:$0xff] %vm361_vm0, %v11905_v56  ;;  %v11906_v53 = vadd.f32 %v14856_v51, %v18397_v59  ;;  %v11800_v44 = vpop.f32.mrb[55].mxu0 }
 0xbe0   : > { %11935 = vst.msk [vmem:[%s18401_s11 + $0xa0] sm:$0xff] %vm361_vm0, %v11903_v50  ;;  %v11904_v19 = vadd.f32 %v18397_v59, %v11800_v44 }
 0xbe1   : > { %11938 = vst.msk [vmem:[%s18401_s11 + $0xb8] sm:$0xff] %vm361_vm0, %v11906_v53 }
 0xbe2   : > { %11936 = vst.msk [vmem:[%s18401_s11 + $0xa8] sm:$0xff] %vm361_vm0, %v11904_v19 }
 0xbe4   : > { %v14859_v13 = vpop.f32.mrb[56].mxu0 }
 0xbe5   : > { %v11909_v24 = vadd.f32 %v14859_v13, %v18397_v59  ;;  %v11813_v22 = vpop.f32.mrb[57].mxu0 }
 0xbe6   : > { %v11907_v36 = vadd.f32 %v18397_v59, %v11813_v22  ;;  %v14860_v9 = vpop.f32.mrb[58].mxu0 }
 0xbe7   : > { %11941 = vst.msk [vmem:[%s18401_s11 + $0xd0] sm:$0xff] %vm361_vm0, %v11909_v24  ;;  %v11910_v37 = vadd.f32 %v14860_v9, %v18397_v59  ;;  %v11816_v38 = vpop.f32.mrb[59].mxu0 }
 0xbe8   : > { %11939 = vst.msk [vmem:[%s18401_s11 + $0xc0] sm:$0xff] %vm361_vm0, %v11907_v36  ;;  %v11908_v26 = vadd.f32 %v18397_v59, %v11816_v38 }
 0xbe9   : > { %11942 = vst.msk [vmem:[%s18401_s11 + $0xd8] sm:$0xff] %vm361_vm0, %v11910_v37 }
 0xbea   : > { %11940 = vst.msk [vmem:[%s18401_s11 + $0xc8] sm:$0xff] %vm361_vm0, %v11908_v26 }
 0xbec   : > { %v14863_v4 = vpop.f32.mrb[60].mxu0 }
 0xbed   : > { %v11913_v49 = vadd.f32 %v14863_v4, %v18397_v59  ;;  %v11829_v32 = vpop.f32.mrb[61].mxu0 }
 0xbee   : > { %v11911_v52 = vadd.f32 %v18397_v59, %v11829_v32  ;;  %v14864_v41 = vpop.f32.mrb[62].mxu0 }
 0xbef   : > { %11945 = vst.msk [vmem:[%s18401_s11 + $0xf0] sm:$0xff] %vm361_vm0, %v11913_v49  ;;  %v11914_v30 = vadd.f32 %v14864_v41, %v18397_v59  ;;  %v11832_v58 = vpop.f32.mrb[63].mxu0 }
 0xbf0   : > { %11943 = vst.msk [vmem:[%s18401_s11 + $0xe0] sm:$0xff] %vm361_vm0, %v11911_v52  ;;  %v11912_v45 = vadd.f32 %v18397_v59, %v11832_v58 }
 0xbf1   : > { %11946 = vst.msk [vmem:[%s18401_s11 + $0xf8] sm:$0xff] %vm361_vm0, %v11914_v30 }
 0xbf2   : > { %11944 = vst.msk [vmem:[%s18401_s11 + $0xe8] sm:$0xff] %vm361_vm0, %v11912_v45 }
 0xbf3   : > { %16034 = shalt.err (!%p16031_p3)
}
 0xbf4   : > { %s16035_s27 = scalar_lea.hbm %s18495_s19, 4096  ;;  %s16039_s12 = scalar_lea.hbm %s18559_s10, 8192 }
 0xbf5   : > { %p16036_p4 = scmp.ne.s32.totalorder %s18495_s19, %s16035_s27  ;;  %p16040_p9 = scmp.lt.u32.totalorder %s18495_s19, %s18559_s10 }
 0xbf6   : > { %p16041_p10 = scmp.lt.u32.totalorder %s16039_s12, %s16035_s27  ;;  %p16043_p12 = scmp.lt.u32.totalorder %s16035_s27, %s18495_s19 }
 0xbf7   : > { %p16037_p7 = pnand %p16036_p4, %p16185_p5 }
 0xbf8   : > { %p16042_p11 = por %p16041_p10, %p16040_p9 }
 0xbf9   : > { %p16038_p8 = pneg %p16037_p7 }
 0xbfa   : > { %p16044_p13 = por %p16043_p12, %p16042_p11 }
 0xbfc   : > { %p16045_p0 = pnand %p16044_p13, %p16038_p8 }
 0xbfe   : > { %16048 = shalt.err (!%p16045_p0)
}
 0xbff   : > { %s16087_s21 = smov 128   ;;  %s16088_s22 = smov 8  }
 0xc00   : > { %15889 = dma.vmem_to_hbm [thread:$0]  (%p16185_p5), %s18497_s13, 4096, %s18495_s19, %s18508_s9, %s16087_s21, %s16087_s21, %s16088_s22  }
 0xc01 PF: > { %p15895_p1 = scmp.ge.s32.totalorder %s16083_s18, 2  ;;  %s11976_s28 = sand.u32 1, %s16071_s15  }
 0xc02   : > { %s11977_s29 = scalar_lea.sflag [#allocation5], %s11976_s28 }
 0xc03   : > { %p15892_p2 = pnand %p15895_p1, %p16189_p6 }
 0xc05   : > { %16066 = dma.done.wait (!%p15892_p2), %s11977_s29, 4096  }
 0xc06   : > { %16068 = vsyncadd (!%p15892_p2), %s11977_s29, 4294963200  ;;  %p21_p3 = scmp.ge.s32.totalorder %s16172_s20, 4   ;;  %s18562_s15 = smov %s16075_s16 }
 0xc07   : > { %s18563_s16 = smov %s16079_s17  ;;  %s18564_s17 = smov %s16183_s23 }
 0xc08   : > { %s18565_s18 = smov %s16172_s20  ;;  %23 = sbr.rel (!%p21_p3) target bundleno = 5 (0x5), region = 130 }
 0xc0f   :  { %11982 = vsyncpa [#allocation5], 1 }
 0xc10   :  { %11984 = vsyncpa [#allocation5 + $0x1], 1 }

</bundles_post_ra>
